<compile_context>
chip_gen: v7x
topology: tpu7x:2x2x1
jax: 0.10.0
libtpu: 0.0.40
codegen_flags: <defaults>
</compile_context>

<pallas_src>
import functools
import math

import jax
import jax.numpy as jnp
from jax.experimental import pallas as pl
from jax.experimental.pallas import tpu as pltpu

_VMEM = pl.BlockSpec(memory_space=pltpu.MemorySpace.VMEM)
_SMEM = pl.BlockSpec(memory_space=pltpu.MemorySpace.SMEM)


# ----------------------------------------------------------------------------- #
# Fused kernel: GRU encoder -> latent SDE (Euler--Maruyama) -> output MLP.
# ----------------------------------------------------------------------------- #
def make_fused_kernel(B, S, theta, mu, sigma):
    # Fold _stable_division(., g) with the constant diagonal diffusion g == sigma
    # into one trace-time scalar (no abs/sign/where/div per SDE step).
    if abs(sigma) > 1e-7:
        _denom = sigma
    elif sigma != 0.0:
        _denom = math.copysign(1e-7, sigma)
    else:
        _denom = 0.0                       # reference divides by zero here as well
    inv_sigma = (1.0 / _denom) if _denom != 0.0 else float("inf")

    def kernel(xt_ref,
               wih_r, wih_z, wih_n, whh_r, whh_z, whh_n,
               b_gr, b_gz, bih_n, bhh_n, wlat, blat, rep_ref,
               wt_in, bt_in, wt_h, bt_h, wt_out, bt_out,
               wd_in_y, wd_in_u, bd_in, wd_h, bd_h, wd_out, bd_out,
               tvals_ref, t0_ref, eps_ref, dt_ref, sgdt_ref,
               w_in3, b_in, w_h, b_h, w_out, b_out,
               lat_ref, logqp_ref, pred_ref):
        f32 = jnp.float32
        dot = functools.partial(jnp.dot, preferred_element_type=f32)

        T = xt_ref.shape[0]
        H = whh_r.shape[0]
        latent = wlat.shape[1]
        L, N, _ = lat_ref.shape
        SL = S * L

        # ---------------------------------------------------------------- #
        # 1) GRU encoder (+ hid2lat) on the B unique rows only.  Per-gate
        #    weights (no lane slicing in the loop), weights loaded & biases
        #    broadcast ONCE, T fully unrolled.  The num_samples repetition is
        #    applied afterwards with a one-hot (N, B) matmul.
        # ---------------------------------------------------------------- #
        Wir, Wiz, Wig = wih_r[...], wih_z[...], wih_n[...]
        Whr, Whz, Whn = whh_r[...], whh_z[...], whh_n[...]
        br = jnp.broadcast_to(b_gr[...], (B, H))
        bz = jnp.broadcast_to(b_gz[...], (B, H))
        bni = jnp.broadcast_to(bih_n[...], (B, H))
        bnh = jnp.broadcast_to(bhh_n[...], (B, H))

        h = jnp.zeros((B, H), f32)
        for t in range(T):                                       # static trip count
            x_t = xt_ref[t]                                      # (B, Din+1)
            r = jax.nn.sigmoid(dot(x_t, Wir) + dot(h, Whr) + br)
            zg = jax.nn.sigmoid(dot(x_t, Wiz) + dot(h, Whz) + bz)
            n = jnp.tanh(dot(x_t, Wig) + bni + r * (dot(h, Whn) + bnh))
            h = (1.0 - zg) * n + zg * h
        y0_b = dot(h, wlat[...]) + blat[...]                     # (B, latent)
        y0 = dot(rep_ref[...], y0_b)                             # (N, latent) repeat

        # ---------------------------------------------------------------- #
        # 2) Treatment MLP hoisted out of the time loop (all rows share the
        #    same t_i): evaluate once, batched over L-1 time points.  Its
        #    first-layer projection into the drift MLP (u @ W_u) is also
        #    hoisted here so the SDE loop only does a broadcast multiply.
        # ---------------------------------------------------------------- #
        ht = jnp.maximum(dot(tvals_ref[...], wt_in[...]) + bt_in[...], 0.0)
        for k in range(wt_h.shape[0]):
            ht = jnp.maximum(dot(ht, wt_h[k]) + bt_h[k], 0.0)
        u_all = dot(ht, wt_out[...]) + bt_out[...]               # (L-1, u_dim)
        ubar_all = dot(u_all, wd_in_u[...])                      # (L-1, hid)

        # ---------------------------------------------------------------- #
        # 3) Euler--Maruyama on the augmented latent SDE.  Drift-MLP weights
        #    loaded & biases broadcast once; loop fully unrolled; constant
        #    diagonal diffusion folded into the precomputed sigma*sqrt(dt).
        # ---------------------------------------------------------------- #
        Wdy, Wdo = wd_in_y[...], wd_out[...]
        hid = Wdy.shape[1]
        bdi = jnp.broadcast_to(bd_in[...], (N, hid))
        Wdh = [wd_h[k] for k in range(wd_h.shape[0])]
        Bdh = [jnp.broadcast_to(bd_h[k], (N, hid)) for k in range(bd_h.shape[0])]
        bdo = jnp.broadcast_to(bd_out[...], (N, latent))
        Tvec = t0_ref[...]                                       # (N, 1) treatment flag

        y = y0
        q = jnp.zeros((N, 1), f32)
        lat_ref[0] = y
        logqp_ref[0] = q
        y_slices = [y]                                           # time-ordered latents
        for i in range(L - 1):                                   # static trip count
            dt = dt_ref[i]                                       # SMEM scalar
            g_scale = sgdt_ref[i]                                # sigma * sqrt(dt)
            # u_t @ W_u == Tvec * (u_i @ W_u)   (hoisted matmul, per-step VPU mul)
            hd = jnp.maximum(dot(y, Wdy) + Tvec * ubar_all[i:i + 1, :] + bdi, 0.0)
            for k in range(len(Wdh)):
                hd = jnp.tanh(dot(hd, Wdh[k]) + Bdh[k])
            drift = dot(hd, Wdo) + bdo
            h_ou = theta * (mu - y)
            f = drift - h_ou                                     # posterior drift f_aug
            u_sd = (f - h_ou) * inv_sigma                        # _stable_division(f-h, g)
            f_logqp = 0.5 * jnp.sum(u_sd * u_sd, axis=1, keepdims=True)
            y = y + f * dt + g_scale * eps_ref[i]
            q = q + f_logqp * dt
            lat_ref[i + 1] = y
            logqp_ref[i + 1] = q
            y_slices.append(y)

        # ---------------------------------------------------------------- #
        # 4) Output MLP epilogue (fused).  The reference flattens the latent
        #    trajectory AFTER a reshape that mixes time/sample axes; instead of
        #    materializing that flatten (sublane->lane relayout) the first
        #    linear layer is a sum of per-row matmuls using the same index
        #    arithmetic:  flat[b] chunk r == y at (time k//N, row k%N) with
        #    k = b*S*L + r, contracted with w_in[r*latent:(r+1)*latent, :].
        # ---------------------------------------------------------------- #
        W3 = [w_in3[r] for r in range(SL)]                       # hoisted weight loads
        Wq, Wo = w_h[...], w_out[...]
        bi1, bh1, bo1 = b_in[...], b_h[...], b_out[...]
        Hout = Wq.shape[0]
        for b in range(B):
            acc = jnp.zeros((1, Hout), f32)
            for r in range(SL):
                k = b * SL + r
                ti, nn = divmod(k, N)
                acc = acc + dot(y_slices[ti][nn:nn + 1, :], W3[r])
            h1 = jnp.maximum(acc + bi1, 0.0)
            h2 = jnp.maximum(dot(h1, Wq) + bh1, 0.0)   # Dropout (eval) == identity
            pred_ref[b:b + 1, :] = dot(h2, Wo) + bo1

    return kernel


# ----------------------------------------------------------------------------- #
# Forward wrapper (tiny XLA glue + one fused pallas_call).
# ----------------------------------------------------------------------------- #
def sde_vae_forward(x, Tx, time_in, time_out, noise_eps, params, cfg):
    """SDE_VAE.forward, latent_type='SDE', use_whole_trajectory=True, MAP=True."""
    B, T, _ = x.shape
    S = cfg["num_samples"]
    latent = cfg["latent_dim"]
    out_dim = cfg["output_dim"]
    theta, mu, sigma = cfg["theta"], cfg["mu"], cfg["sigma"]
    N = B * S

    # ---- encoder input prep (Encoder.forward: t_diff, concat) ----
    t_diff = jnp.concatenate(
        [jnp.zeros((B, 1), x.dtype), time_in[:, 1:] - time_in[:, :-1]], axis=1)
    xt = jnp.concatenate([x, t_diff[..., None]], axis=-1)              # (B, T, Din+1)
    xt = jnp.transpose(xt, (1, 0, 2)).astype(jnp.float32)              # (T, B, Din+1)
    # One-hot (N, B) sample-repeat operator applied to the encoder output in-kernel.
    rep = jnp.repeat(jnp.eye(B, dtype=jnp.float32), S, axis=0)         # (N, B)

    # ---- SDE time grid (Neural_Expert_SDE_integrator.forward) ----
    t = time_out[0] if time_out.ndim > 1 else time_out
    t = t.reshape(-1).astype(jnp.float32)                              # (L,)
    L = t.shape[0]
    dts = t[1:] - t[:-1]                                               # (L-1,)  SMEM
    sig_sqdt = sigma * jnp.sqrt(dts)                                   # (L-1,)  SMEM
    tvals = t[:-1][:, None]                                            # (L-1, 1)
    t0 = jnp.repeat(Tx.astype(jnp.float32), S)[:, None]                # (N, 1)

    enc, sde, omlp = params["encoder"], params["sde"], params["out_mlp"]
    H = enc["whh"].shape[0]
    # Per-gate GRU weight split (torch.nn.GRU gate order r|z|n); r/z input+hidden
    # biases are pre-summed since they sit outside the reset-gate multiplication.
    wih, whh, bih, bhh = enc["wih"], enc["whh"], enc["bih"], enc["bhh"]
    wih_r, wih_z, wih_n = wih[:, :H], wih[:, H:2 * H], wih[:, 2 * H:]
    whh_r, whh_z, whh_n = whh[:, :H], whh[:, H:2 * H], whh[:, 2 * H:]
    b_gr = bih[:, :H] + bhh[:, :H]
    b_gz = bih[:, H:2 * H] + bhh[:, H:2 * H]
    bih_n, bhh_n = bih[:, 2 * H:], bhh[:, 2 * H:]

    dout = omlp["w_out"].shape[1]
    Hout = omlp["w_h"].shape[0]
    w_in3 = omlp["w_in"].reshape(S * L, latent, Hout)                  # row groups per r

    kernel = make_fused_kernel(B, S, theta, mu, sigma)
    lat_path, logqp_path, pred_flat = pl.pallas_call(
        kernel,
        out_shape=(jax.ShapeDtypeStruct((L, N, latent), jnp.float32),
                   jax.ShapeDtypeStruct((L, N, 1), jnp.float32),
                   jax.ShapeDtypeStruct((B, dout), jnp.float32)),
        in_specs=[_VMEM] * 30 + [_SMEM, _SMEM] + [_VMEM] * 6,
        out_specs=(_VMEM, _VMEM, _VMEM),
    )(xt,
      wih_r, wih_z, wih_n, whh_r, whh_z, whh_n,
      b_gr, b_gz, bih_n, bhh_n, enc["wlat"], enc["blat"], rep,
      sde["wt_in"], sde["bt_in"], sde["wt_h"], sde["bt_h"], sde["wt_out"], sde["bt_out"],
      sde["wd_in_y"], sde["wd_in_u"], sde["bd_in"], sde["wd_h"], sde["bd_h"],
      sde["wd_out"], sde["bd_out"],
      tvals, t0, noise_eps.astype(jnp.float32), dts, sig_sqdt,
      w_in3, omlp["b_in"], omlp["w_h"], omlp["b_h"], omlp["w_out"], omlp["b_out"])

    # ---- assemble return values ----
    # The reference's aug_ys.reshape(-1, S, L, dim_aug) mixes time/sample axes but
    # only remaps the leading (L*N) "row" axis; the channel axis is untouched, so
    # slicing latent / logqp channels first and reshaping gives identical results.
    z_SDE = lat_path[0].reshape(B, S, latent)                           # encoder repeat
    latent_traj_SDE = lat_path.reshape(B, S, L, latent)                 # buggy reshape
    logqp_SDE = logqp_path.reshape(B, S, L)[:, :, -1]                   # (B, S)
    predicted_traj_SDE = pred_flat.reshape(B, S, L, out_dim)

    # forward() return tuple for latent_type == 'SDE'
    return (None, None, None, None, None,
            z_SDE, latent_traj_SDE, logqp_SDE, predicted_traj_SDE, None)


# ----------------------------------------------------------------------------- #
# Deterministic synthetic parameters.
# ----------------------------------------------------------------------------- #
def _lin(key, fan_in, fan_out, scale=0.1):
    kw, kb = jax.random.split(key)
    w = scale * jax.random.normal(kw, (fan_in, fan_out), jnp.float32)  # pre-transposed
    b = scale * jax.random.normal(kb, (1, fan_out), jnp.float32)
    return w, b


def build_params(key, cfg):
    input_dim, hidden_dim = cfg["input_dim"], cfg["hidden_dim"]
    latent, out_dim = cfg["latent_dim"], cfg["output_dim"]
    u_dim = latent // 5
    S, L = cfg["num_samples"], cfg["post_tx_ode_len"]
    keys = jax.random.split(key, 32)

    # GRU encoder (input_dim+1 -> hidden_dim), gates packed [r|z|n], + hid2lat.
    wih, _ = _lin(keys[0], input_dim + 1, 3 * hidden_dim)
    whh, _ = _lin(keys[1], hidden_dim, 3 * hidden_dim)
    bih = 0.1 * jax.random.normal(keys[2], (1, 3 * hidden_dim), jnp.float32)
    bhh = 0.1 * jax.random.normal(keys[3], (1, 3 * hidden_dim), jnp.float32)
    wlat, blat = _lin(keys[4], hidden_dim, latent)
    encoder = dict(wih=wih, whh=whh, bih=bih, bhh=bhh, wlat=wlat, blat=blat)

    # LatentSDE: treatment_fun MLP(1 -> 20 x4 -> u_dim), sde_drift MLP(latent+u -> 4L x4 -> latent)
    wt_in, bt_in = _lin(keys[5], 1, 20)
    wt_h = jnp.stack([_lin(keys[6 + k], 20, 20)[0] for k in range(4)])
    bt_h = jnp.stack([_lin(keys[6 + k], 20, 20)[1] for k in range(4)])
    wt_out, bt_out = _lin(keys[10], 20, u_dim)
    hid4 = 4 * latent
    wd_in_full, bd_in = _lin(keys[11], latent + u_dim, hid4)
    wd_in_y, wd_in_u = wd_in_full[:latent, :], wd_in_full[latent:, :]
    wd_h = jnp.stack([_lin(keys[12 + k], hid4, hid4)[0] for k in range(4)])
    bd_h = jnp.stack([_lin(keys[12 + k], hid4, hid4)[1] for k in range(4)])
    wd_out, bd_out = _lin(keys[16], hid4, latent)
    sde = dict(wt_in=wt_in, bt_in=bt_in, wt_h=wt_h, bt_h=bt_h,
               wt_out=wt_out, bt_out=bt_out,
               wd_in_y=wd_in_y, wd_in_u=wd_in_u, bd_in=bd_in,
               wd_h=wd_h, bd_h=bd_h, wd_out=wd_out, bd_out=bd_out)

    # output_fun_SDE: MLPSimple(latent*L*S -> hidden=latent -> out_dim*L*S), depth=1
    din, dout, h = latent * L * S, out_dim * L * S, latent
    w_in, b_in = _lin(keys[17], din, h)
    w_h, b_h = _lin(keys[18], h, h)
    w_out, b_out = _lin(keys[19], h, dout)
    out_mlp = dict(w_in=w_in, b_in=b_in, w_h=w_h, b_h=b_h, w_out=w_out, b_out=b_out)

    return dict(encoder=encoder, sde=sde, out_mlp=out_mlp)


# ----------------------------------------------------------------------------- #
if __name__ == "__main__":
    cfg = dict(input_dim=4, hidden_dim=32, latent_dim=10, output_dim=2,
               num_samples=3, post_tx_ode_len=5,
               theta=1.0, mu=0.5, sigma=0.1)
    B, Tseq, L, S = 2, 8, cfg["post_tx_ode_len"], cfg["num_samples"]

    key = jax.random.PRNGKey(0)
    kx, ktx, knoise, kparam = jax.random.split(key, 4)

    x = jax.random.normal(kx, (B, Tseq, cfg["input_dim"]), jnp.float32)
    Tx = jax.random.bernoulli(ktx, 0.5, (B,)).astype(jnp.float32)
    time_in = jnp.broadcast_to(jnp.linspace(0.0, 1.0, Tseq, dtype=jnp.float32), (B, Tseq))
    time_out = jnp.broadcast_to(jnp.linspace(0.0, 0.2, L, dtype=jnp.float32), (B, L))
    # Brownian-increment standard normals for the SDE kernel (deterministic).
    noise_eps = jax.random.normal(knoise, (L - 1, B * S, cfg["latent_dim"]), jnp.float32)

    params = build_params(kparam, cfg)

    fwd = jax.jit(functools.partial(sde_vae_forward, cfg=cfg))
    outputs = fwd(x, Tx, time_in, time_out, noise_eps, params)
    (_, _, _, _, _, z_SDE, latent_traj_SDE, logqp_SDE, predicted_traj_SDE, _) = outputs

    jax.block_until_ready((z_SDE, latent_traj_SDE, logqp_SDE, predicted_traj_SDE))

    assert z_SDE.shape == (B, S, cfg["latent_dim"])
    assert latent_traj_SDE.shape == (B, S, L, cfg["latent_dim"])
    assert logqp_SDE.shape == (B, S)
    assert predicted_traj_SDE.shape == (B, S, L, cfg["output_dim"])
    print("KERNEL_OK")
</pallas_src>

<mosaic_0001>
module attributes {stable_mosaic.version = 11 : i64} {
  func.func @kernel(%arg0: memref<8x2x5xf32, #tpu.memory_space<vmem>>, %arg1: memref<5x32xf32, #tpu.memory_space<vmem>>, %arg2: memref<5x32xf32, #tpu.memory_space<vmem>>, %arg3: memref<5x32xf32, #tpu.memory_space<vmem>>, %arg4: memref<32x32xf32, #tpu.memory_space<vmem>>, %arg5: memref<32x32xf32, #tpu.memory_space<vmem>>, %arg6: memref<32x32xf32, #tpu.memory_space<vmem>>, %arg7: memref<1x32xf32, #tpu.memory_space<vmem>>, %arg8: memref<1x32xf32, #tpu.memory_space<vmem>>, %arg9: memref<1x32xf32, #tpu.memory_space<vmem>>, %arg10: memref<1x32xf32, #tpu.memory_space<vmem>>, %arg11: memref<32x10xf32, #tpu.memory_space<vmem>>, %arg12: memref<1x10xf32, #tpu.memory_space<vmem>>, %arg13: memref<6x2xf32, #tpu.memory_space<vmem>>, %arg14: memref<1x20xf32, #tpu.memory_space<vmem>>, %arg15: memref<1x20xf32, #tpu.memory_space<vmem>>, %arg16: memref<4x20x20xf32, #tpu.memory_space<vmem>>, %arg17: memref<4x1x20xf32, #tpu.memory_space<vmem>>, %arg18: memref<20x2xf32, #tpu.memory_space<vmem>>, %arg19: memref<1x2xf32, #tpu.memory_space<vmem>>, %arg20: memref<10x40xf32, #tpu.memory_space<vmem>>, %arg21: memref<2x40xf32, #tpu.memory_space<vmem>>, %arg22: memref<1x40xf32, #tpu.memory_space<vmem>>, %arg23: memref<4x40x40xf32, #tpu.memory_space<vmem>>, %arg24: memref<4x1x40xf32, #tpu.memory_space<vmem>>, %arg25: memref<40x10xf32, #tpu.memory_space<vmem>>, %arg26: memref<1x10xf32, #tpu.memory_space<vmem>>, %arg27: memref<4x1xf32, #tpu.memory_space<vmem>>, %arg28: memref<6x1xf32, #tpu.memory_space<vmem>>, %arg29: memref<4x6x10xf32, #tpu.memory_space<vmem>>, %arg30: memref<4xf32, #tpu.memory_space<smem>>, %arg31: memref<4xf32, #tpu.memory_space<smem>>, %arg32: memref<15x10x10xf32, #tpu.memory_space<vmem>>, %arg33: memref<1x10xf32, #tpu.memory_space<vmem>>, %arg34: memref<10x10xf32, #tpu.memory_space<vmem>>, %arg35: memref<1x10xf32, #tpu.memory_space<vmem>>, %arg36: memref<10x30xf32, #tpu.memory_space<vmem>>, %arg37: memref<1x30xf32, #tpu.memory_space<vmem>>, %arg38: memref<5x6x10xf32, #tpu.memory_space<vmem>>, %arg39: memref<5x6x1xf32, #tpu.memory_space<vmem>>, %arg40: memref<2x30xf32, #tpu.memory_space<vmem>>) attributes {dimension_semantics = [], scalar_prefetch = 0 : i64, scratch_operands = 0 : i64, tpu.core_type = #tpu.core_type<tc>} {
    %c0 = arith.constant 0 : index
    %c0_0 = arith.constant 0 : index
    %0 = vector.load %arg1[%c0, %c0_0] : memref<5x32xf32, #tpu.memory_space<vmem>>, vector<5x32xf32>
    %c0_1 = arith.constant 0 : index
    %c0_2 = arith.constant 0 : index
    %1 = vector.load %arg2[%c0_1, %c0_2] : memref<5x32xf32, #tpu.memory_space<vmem>>, vector<5x32xf32>
    %c0_3 = arith.constant 0 : index
    %c0_4 = arith.constant 0 : index
    %2 = vector.load %arg3[%c0_3, %c0_4] : memref<5x32xf32, #tpu.memory_space<vmem>>, vector<5x32xf32>
    %c0_5 = arith.constant 0 : index
    %c0_6 = arith.constant 0 : index
    %3 = vector.load %arg4[%c0_5, %c0_6] : memref<32x32xf32, #tpu.memory_space<vmem>>, vector<32x32xf32>
    %c0_7 = arith.constant 0 : index
    %c0_8 = arith.constant 0 : index
    %4 = vector.load %arg5[%c0_7, %c0_8] : memref<32x32xf32, #tpu.memory_space<vmem>>, vector<32x32xf32>
    %c0_9 = arith.constant 0 : index
    %c0_10 = arith.constant 0 : index
    %5 = vector.load %arg6[%c0_9, %c0_10] : memref<32x32xf32, #tpu.memory_space<vmem>>, vector<32x32xf32>
    %c0_11 = arith.constant 0 : index
    %c0_12 = arith.constant 0 : index
    %6 = vector.load %arg7[%c0_11, %c0_12] : memref<1x32xf32, #tpu.memory_space<vmem>>, vector<1x32xf32>
    %7 = vector.shape_cast %6 : vector<1x32xf32> to vector<1x32xf32>
    %8 = vector.broadcast %7 : vector<1x32xf32> to vector<2x32xf32>
    %c0_13 = arith.constant 0 : index
    %c0_14 = arith.constant 0 : index
    %9 = vector.load %arg8[%c0_13, %c0_14] : memref<1x32xf32, #tpu.memory_space<vmem>>, vector<1x32xf32>
    %10 = vector.shape_cast %9 : vector<1x32xf32> to vector<1x32xf32>
    %11 = vector.broadcast %10 : vector<1x32xf32> to vector<2x32xf32>
    %c0_15 = arith.constant 0 : index
    %c0_16 = arith.constant 0 : index
    %12 = vector.load %arg9[%c0_15, %c0_16] : memref<1x32xf32, #tpu.memory_space<vmem>>, vector<1x32xf32>
    %13 = vector.shape_cast %12 : vector<1x32xf32> to vector<1x32xf32>
    %14 = vector.broadcast %13 : vector<1x32xf32> to vector<2x32xf32>
    %c0_17 = arith.constant 0 : index
    %c0_18 = arith.constant 0 : index
    %15 = vector.load %arg10[%c0_17, %c0_18] : memref<1x32xf32, #tpu.memory_space<vmem>>, vector<1x32xf32>
    %16 = vector.shape_cast %15 : vector<1x32xf32> to vector<1x32xf32>
    %17 = vector.broadcast %16 : vector<1x32xf32> to vector<2x32xf32>
    %cst = arith.constant 0.000000e+00 : f32
    %18 = vector.broadcast %cst : f32 to vector<2x32xf32>
    %c0_19 = arith.constant 0 : index
    %c0_20 = arith.constant 0 : index
    %c0_21 = arith.constant 0 : index
    %19 = vector.load %arg0[%c0_19, %c0_20, %c0_21] : memref<8x2x5xf32, #tpu.memory_space<vmem>>, vector<1x2x5xf32>
    %20 = vector.shape_cast %19 : vector<1x2x5xf32> to vector<2x5xf32>
    %cst_22 = arith.constant dense<0.000000e+00> : vector<2x32xf32>
    %21 = tpu.matmul %20, %0, %cst_22 {dimension_numbers = #tpu.dot_dimension_numbers<[1], [0], [0], [1], [0, 0, 1, 1], [], []>} : vector<2x5xf32>, vector<5x32xf32>, vector<2x32xf32> -> vector<2x32xf32>
    %cst_23 = arith.constant dense<0.000000e+00> : vector<2x32xf32>
    %22 = tpu.matmul %18, %3, %cst_23 {dimension_numbers = #tpu.dot_dimension_numbers<[1], [0], [0], [1], [0, 0, 1, 1], [], []>} : vector<2x32xf32>, vector<32x32xf32>, vector<2x32xf32> -> vector<2x32xf32>
    %23 = arith.addf %21, %22 : vector<2x32xf32>
    %24 = arith.addf %23, %8 : vector<2x32xf32>
    %25 = arith.negf %24 : vector<2x32xf32>
    %26 = math.exp %25 : vector<2x32xf32>
    %cst_24 = arith.constant 1.000000e+00 : f32
    %27 = vector.broadcast %cst_24 : f32 to vector<2x32xf32>
    %28 = arith.addf %27, %26 : vector<2x32xf32>
    %29 = arith.divf %27, %28 : vector<2x32xf32>
    %cst_25 = arith.constant dense<0.000000e+00> : vector<2x32xf32>
    %30 = tpu.matmul %20, %1, %cst_25 {dimension_numbers = #tpu.dot_dimension_numbers<[1], [0], [0], [1], [0, 0, 1, 1], [], []>} : vector<2x5xf32>, vector<5x32xf32>, vector<2x32xf32> -> vector<2x32xf32>
    %cst_26 = arith.constant dense<0.000000e+00> : vector<2x32xf32>
    %31 = tpu.matmul %18, %4, %cst_26 {dimension_numbers = #tpu.dot_dimension_numbers<[1], [0], [0], [1], [0, 0, 1, 1], [], []>} : vector<2x32xf32>, vector<32x32xf32>, vector<2x32xf32> -> vector<2x32xf32>
    %32 = arith.addf %30, %31 : vector<2x32xf32>
    %33 = arith.addf %32, %11 : vector<2x32xf32>
    %34 = arith.negf %33 : vector<2x32xf32>
    %35 = math.exp %34 : vector<2x32xf32>
    %cst_27 = arith.constant 1.000000e+00 : f32
    %36 = vector.broadcast %cst_27 : f32 to vector<2x32xf32>
    %37 = arith.addf %36, %35 : vector<2x32xf32>
    %38 = arith.divf %36, %37 : vector<2x32xf32>
    %cst_28 = arith.constant dense<0.000000e+00> : vector<2x32xf32>
    %39 = tpu.matmul %20, %2, %cst_28 {dimension_numbers = #tpu.dot_dimension_numbers<[1], [0], [0], [1], [0, 0, 1, 1], [], []>} : vector<2x5xf32>, vector<5x32xf32>, vector<2x32xf32> -> vector<2x32xf32>
    %40 = arith.addf %39, %14 : vector<2x32xf32>
    %cst_29 = arith.constant dense<0.000000e+00> : vector<2x32xf32>
    %41 = tpu.matmul %18, %5, %cst_29 {dimension_numbers = #tpu.dot_dimension_numbers<[1], [0], [0], [1], [0, 0, 1, 1], [], []>} : vector<2x32xf32>, vector<32x32xf32>, vector<2x32xf32> -> vector<2x32xf32>
    %42 = arith.addf %41, %17 : vector<2x32xf32>
    %43 = arith.mulf %29, %42 : vector<2x32xf32>
    %44 = arith.addf %40, %43 : vector<2x32xf32>
    %45 = math.tanh %44 : vector<2x32xf32>
    %cst_30 = arith.constant 1.000000e+00 : f32
    %46 = vector.broadcast %cst_30 : f32 to vector<2x32xf32>
    %47 = arith.subf %46, %38 : vector<2x32xf32>
    %48 = arith.mulf %47, %45 : vector<2x32xf32>
    %49 = arith.mulf %38, %18 : vector<2x32xf32>
    %50 = arith.addf %48, %49 : vector<2x32xf32>
    %c1 = arith.constant 1 : index
    %c0_31 = arith.constant 0 : index
    %c0_32 = arith.constant 0 : index
    %51 = vector.load %arg0[%c1, %c0_31, %c0_32] : memref<8x2x5xf32, #tpu.memory_space<vmem>>, vector<1x2x5xf32>
    %52 = vector.shape_cast %51 : vector<1x2x5xf32> to vector<2x5xf32>
    %cst_33 = arith.constant dense<0.000000e+00> : vector<2x32xf32>
    %53 = tpu.matmul %52, %0, %cst_33 {dimension_numbers = #tpu.dot_dimension_numbers<[1], [0], [0], [1], [0, 0, 1, 1], [], []>} : vector<2x5xf32>, vector<5x32xf32>, vector<2x32xf32> -> vector<2x32xf32>
    %cst_34 = arith.constant dense<0.000000e+00> : vector<2x32xf32>
    %54 = tpu.matmul %50, %3, %cst_34 {dimension_numbers = #tpu.dot_dimension_numbers<[1], [0], [0], [1], [0, 0, 1, 1], [], []>} : vector<2x32xf32>, vector<32x32xf32>, vector<2x32xf32> -> vector<2x32xf32>
    %55 = arith.addf %53, %54 : vector<2x32xf32>
    %56 = arith.addf %55, %8 : vector<2x32xf32>
    %57 = arith.negf %56 : vector<2x32xf32>
    %58 = math.exp %57 : vector<2x32xf32>
    %cst_35 = arith.constant 1.000000e+00 : f32
    %59 = vector.broadcast %cst_35 : f32 to vector<2x32xf32>
    %60 = arith.addf %59, %58 : vector<2x32xf32>
    %61 = arith.divf %59, %60 : vector<2x32xf32>
    %cst_36 = arith.constant dense<0.000000e+00> : vector<2x32xf32>
    %62 = tpu.matmul %52, %1, %cst_36 {dimension_numbers = #tpu.dot_dimension_numbers<[1], [0], [0], [1], [0, 0, 1, 1], [], []>} : vector<2x5xf32>, vector<5x32xf32>, vector<2x32xf32> -> vector<2x32xf32>
    %cst_37 = arith.constant dense<0.000000e+00> : vector<2x32xf32>
    %63 = tpu.matmul %50, %4, %cst_37 {dimension_numbers = #tpu.dot_dimension_numbers<[1], [0], [0], [1], [0, 0, 1, 1], [], []>} : vector<2x32xf32>, vector<32x32xf32>, vector<2x32xf32> -> vector<2x32xf32>
    %64 = arith.addf %62, %63 : vector<2x32xf32>
    %65 = arith.addf %64, %11 : vector<2x32xf32>
    %66 = arith.negf %65 : vector<2x32xf32>
    %67 = math.exp %66 : vector<2x32xf32>
    %cst_38 = arith.constant 1.000000e+00 : f32
    %68 = vector.broadcast %cst_38 : f32 to vector<2x32xf32>
    %69 = arith.addf %68, %67 : vector<2x32xf32>
    %70 = arith.divf %68, %69 : vector<2x32xf32>
    %cst_39 = arith.constant dense<0.000000e+00> : vector<2x32xf32>
    %71 = tpu.matmul %52, %2, %cst_39 {dimension_numbers = #tpu.dot_dimension_numbers<[1], [0], [0], [1], [0, 0, 1, 1], [], []>} : vector<2x5xf32>, vector<5x32xf32>, vector<2x32xf32> -> vector<2x32xf32>
    %72 = arith.addf %71, %14 : vector<2x32xf32>
    %cst_40 = arith.constant dense<0.000000e+00> : vector<2x32xf32>
    %73 = tpu.matmul %50, %5, %cst_40 {dimension_numbers = #tpu.dot_dimension_numbers<[1], [0], [0], [1], [0, 0, 1, 1], [], []>} : vector<2x32xf32>, vector<32x32xf32>, vector<2x32xf32> -> vector<2x32xf32>
    %74 = arith.addf %73, %17 : vector<2x32xf32>
    %75 = arith.mulf %61, %74 : vector<2x32xf32>
    %76 = arith.addf %72, %75 : vector<2x32xf32>
    %77 = math.tanh %76 : vector<2x32xf32>
    %cst_41 = arith.constant 1.000000e+00 : f32
    %78 = vector.broadcast %cst_41 : f32 to vector<2x32xf32>
    %79 = arith.subf %78, %70 : vector<2x32xf32>
    %80 = arith.mulf %79, %77 : vector<2x32xf32>
    %81 = arith.mulf %70, %50 : vector<2x32xf32>
    %82 = arith.addf %80, %81 : vector<2x32xf32>
    %c2 = arith.constant 2 : index
    %c0_42 = arith.constant 0 : index
    %c0_43 = arith.constant 0 : index
    %83 = vector.load %arg0[%c2, %c0_42, %c0_43] : memref<8x2x5xf32, #tpu.memory_space<vmem>>, vector<1x2x5xf32>
    %84 = vector.shape_cast %83 : vector<1x2x5xf32> to vector<2x5xf32>
    %cst_44 = arith.constant dense<0.000000e+00> : vector<2x32xf32>
    %85 = tpu.matmul %84, %0, %cst_44 {dimension_numbers = #tpu.dot_dimension_numbers<[1], [0], [0], [1], [0, 0, 1, 1], [], []>} : vector<2x5xf32>, vector<5x32xf32>, vector<2x32xf32> -> vector<2x32xf32>
    %cst_45 = arith.constant dense<0.000000e+00> : vector<2x32xf32>
    %86 = tpu.matmul %82, %3, %cst_45 {dimension_numbers = #tpu.dot_dimension_numbers<[1], [0], [0], [1], [0, 0, 1, 1], [], []>} : vector<2x32xf32>, vector<32x32xf32>, vector<2x32xf32> -> vector<2x32xf32>
    %87 = arith.addf %85, %86 : vector<2x32xf32>
    %88 = arith.addf %87, %8 : vector<2x32xf32>
    %89 = arith.negf %88 : vector<2x32xf32>
    %90 = math.exp %89 : vector<2x32xf32>
    %cst_46 = arith.constant 1.000000e+00 : f32
    %91 = vector.broadcast %cst_46 : f32 to vector<2x32xf32>
    %92 = arith.addf %91, %90 : vector<2x32xf32>
    %93 = arith.divf %91, %92 : vector<2x32xf32>
    %cst_47 = arith.constant dense<0.000000e+00> : vector<2x32xf32>
    %94 = tpu.matmul %84, %1, %cst_47 {dimension_numbers = #tpu.dot_dimension_numbers<[1], [0], [0], [1], [0, 0, 1, 1], [], []>} : vector<2x5xf32>, vector<5x32xf32>, vector<2x32xf32> -> vector<2x32xf32>
    %cst_48 = arith.constant dense<0.000000e+00> : vector<2x32xf32>
    %95 = tpu.matmul %82, %4, %cst_48 {dimension_numbers = #tpu.dot_dimension_numbers<[1], [0], [0], [1], [0, 0, 1, 1], [], []>} : vector<2x32xf32>, vector<32x32xf32>, vector<2x32xf32> -> vector<2x32xf32>
    %96 = arith.addf %94, %95 : vector<2x32xf32>
    %97 = arith.addf %96, %11 : vector<2x32xf32>
    %98 = arith.negf %97 : vector<2x32xf32>
    %99 = math.exp %98 : vector<2x32xf32>
    %cst_49 = arith.constant 1.000000e+00 : f32
    %100 = vector.broadcast %cst_49 : f32 to vector<2x32xf32>
    %101 = arith.addf %100, %99 : vector<2x32xf32>
    %102 = arith.divf %100, %101 : vector<2x32xf32>
    %cst_50 = arith.constant dense<0.000000e+00> : vector<2x32xf32>
    %103 = tpu.matmul %84, %2, %cst_50 {dimension_numbers = #tpu.dot_dimension_numbers<[1], [0], [0], [1], [0, 0, 1, 1], [], []>} : vector<2x5xf32>, vector<5x32xf32>, vector<2x32xf32> -> vector<2x32xf32>
    %104 = arith.addf %103, %14 : vector<2x32xf32>
    %cst_51 = arith.constant dense<0.000000e+00> : vector<2x32xf32>
    %105 = tpu.matmul %82, %5, %cst_51 {dimension_numbers = #tpu.dot_dimension_numbers<[1], [0], [0], [1], [0, 0, 1, 1], [], []>} : vector<2x32xf32>, vector<32x32xf32>, vector<2x32xf32> -> vector<2x32xf32>
    %106 = arith.addf %105, %17 : vector<2x32xf32>
    %107 = arith.mulf %93, %106 : vector<2x32xf32>
    %108 = arith.addf %104, %107 : vector<2x32xf32>
    %109 = math.tanh %108 : vector<2x32xf32>
    %cst_52 = arith.constant 1.000000e+00 : f32
    %110 = vector.broadcast %cst_52 : f32 to vector<2x32xf32>
    %111 = arith.subf %110, %102 : vector<2x32xf32>
    %112 = arith.mulf %111, %109 : vector<2x32xf32>
    %113 = arith.mulf %102, %82 : vector<2x32xf32>
    %114 = arith.addf %112, %113 : vector<2x32xf32>
    %c3 = arith.constant 3 : index
    %c0_53 = arith.constant 0 : index
    %c0_54 = arith.constant 0 : index
    %115 = vector.load %arg0[%c3, %c0_53, %c0_54] : memref<8x2x5xf32, #tpu.memory_space<vmem>>, vector<1x2x5xf32>
    %116 = vector.shape_cast %115 : vector<1x2x5xf32> to vector<2x5xf32>
    %cst_55 = arith.constant dense<0.000000e+00> : vector<2x32xf32>
    %117 = tpu.matmul %116, %0, %cst_55 {dimension_numbers = #tpu.dot_dimension_numbers<[1], [0], [0], [1], [0, 0, 1, 1], [], []>} : vector<2x5xf32>, vector<5x32xf32>, vector<2x32xf32> -> vector<2x32xf32>
    %cst_56 = arith.constant dense<0.000000e+00> : vector<2x32xf32>
    %118 = tpu.matmul %114, %3, %cst_56 {dimension_numbers = #tpu.dot_dimension_numbers<[1], [0], [0], [1], [0, 0, 1, 1], [], []>} : vector<2x32xf32>, vector<32x32xf32>, vector<2x32xf32> -> vector<2x32xf32>
    %119 = arith.addf %117, %118 : vector<2x32xf32>
    %120 = arith.addf %119, %8 : vector<2x32xf32>
    %121 = arith.negf %120 : vector<2x32xf32>
    %122 = math.exp %121 : vector<2x32xf32>
    %cst_57 = arith.constant 1.000000e+00 : f32
    %123 = vector.broadcast %cst_57 : f32 to vector<2x32xf32>
    %124 = arith.addf %123, %122 : vector<2x32xf32>
    %125 = arith.divf %123, %124 : vector<2x32xf32>
    %cst_58 = arith.constant dense<0.000000e+00> : vector<2x32xf32>
    %126 = tpu.matmul %116, %1, %cst_58 {dimension_numbers = #tpu.dot_dimension_numbers<[1], [0], [0], [1], [0, 0, 1, 1], [], []>} : vector<2x5xf32>, vector<5x32xf32>, vector<2x32xf32> -> vector<2x32xf32>
    %cst_59 = arith.constant dense<0.000000e+00> : vector<2x32xf32>
    %127 = tpu.matmul %114, %4, %cst_59 {dimension_numbers = #tpu.dot_dimension_numbers<[1], [0], [0], [1], [0, 0, 1, 1], [], []>} : vector<2x32xf32>, vector<32x32xf32>, vector<2x32xf32> -> vector<2x32xf32>
    %128 = arith.addf %126, %127 : vector<2x32xf32>
    %129 = arith.addf %128, %11 : vector<2x32xf32>
    %130 = arith.negf %129 : vector<2x32xf32>
    %131 = math.exp %130 : vector<2x32xf32>
    %cst_60 = arith.constant 1.000000e+00 : f32
    %132 = vector.broadcast %cst_60 : f32 to vector<2x32xf32>
    %133 = arith.addf %132, %131 : vector<2x32xf32>
    %134 = arith.divf %132, %133 : vector<2x32xf32>
    %cst_61 = arith.constant dense<0.000000e+00> : vector<2x32xf32>
    %135 = tpu.matmul %116, %2, %cst_61 {dimension_numbers = #tpu.dot_dimension_numbers<[1], [0], [0], [1], [0, 0, 1, 1], [], []>} : vector<2x5xf32>, vector<5x32xf32>, vector<2x32xf32> -> vector<2x32xf32>
    %136 = arith.addf %135, %14 : vector<2x32xf32>
    %cst_62 = arith.constant dense<0.000000e+00> : vector<2x32xf32>
    %137 = tpu.matmul %114, %5, %cst_62 {dimension_numbers = #tpu.dot_dimension_numbers<[1], [0], [0], [1], [0, 0, 1, 1], [], []>} : vector<2x32xf32>, vector<32x32xf32>, vector<2x32xf32> -> vector<2x32xf32>
    %138 = arith.addf %137, %17 : vector<2x32xf32>
    %139 = arith.mulf %125, %138 : vector<2x32xf32>
    %140 = arith.addf %136, %139 : vector<2x32xf32>
    %141 = math.tanh %140 : vector<2x32xf32>
    %cst_63 = arith.constant 1.000000e+00 : f32
    %142 = vector.broadcast %cst_63 : f32 to vector<2x32xf32>
    %143 = arith.subf %142, %134 : vector<2x32xf32>
    %144 = arith.mulf %143, %141 : vector<2x32xf32>
    %145 = arith.mulf %134, %114 : vector<2x32xf32>
    %146 = arith.addf %144, %145 : vector<2x32xf32>
    %c4 = arith.constant 4 : index
    %c0_64 = arith.constant 0 : index
    %c0_65 = arith.constant 0 : index
    %147 = vector.load %arg0[%c4, %c0_64, %c0_65] : memref<8x2x5xf32, #tpu.memory_space<vmem>>, vector<1x2x5xf32>
    %148 = vector.shape_cast %147 : vector<1x2x5xf32> to vector<2x5xf32>
    %cst_66 = arith.constant dense<0.000000e+00> : vector<2x32xf32>
    %149 = tpu.matmul %148, %0, %cst_66 {dimension_numbers = #tpu.dot_dimension_numbers<[1], [0], [0], [1], [0, 0, 1, 1], [], []>} : vector<2x5xf32>, vector<5x32xf32>, vector<2x32xf32> -> vector<2x32xf32>
    %cst_67 = arith.constant dense<0.000000e+00> : vector<2x32xf32>
    %150 = tpu.matmul %146, %3, %cst_67 {dimension_numbers = #tpu.dot_dimension_numbers<[1], [0], [0], [1], [0, 0, 1, 1], [], []>} : vector<2x32xf32>, vector<32x32xf32>, vector<2x32xf32> -> vector<2x32xf32>
    %151 = arith.addf %149, %150 : vector<2x32xf32>
    %152 = arith.addf %151, %8 : vector<2x32xf32>
    %153 = arith.negf %152 : vector<2x32xf32>
    %154 = math.exp %153 : vector<2x32xf32>
    %cst_68 = arith.constant 1.000000e+00 : f32
    %155 = vector.broadcast %cst_68 : f32 to vector<2x32xf32>
    %156 = arith.addf %155, %154 : vector<2x32xf32>
    %157 = arith.divf %155, %156 : vector<2x32xf32>
    %cst_69 = arith.constant dense<0.000000e+00> : vector<2x32xf32>
    %158 = tpu.matmul %148, %1, %cst_69 {dimension_numbers = #tpu.dot_dimension_numbers<[1], [0], [0], [1], [0, 0, 1, 1], [], []>} : vector<2x5xf32>, vector<5x32xf32>, vector<2x32xf32> -> vector<2x32xf32>
    %cst_70 = arith.constant dense<0.000000e+00> : vector<2x32xf32>
    %159 = tpu.matmul %146, %4, %cst_70 {dimension_numbers = #tpu.dot_dimension_numbers<[1], [0], [0], [1], [0, 0, 1, 1], [], []>} : vector<2x32xf32>, vector<32x32xf32>, vector<2x32xf32> -> vector<2x32xf32>
    %160 = arith.addf %158, %159 : vector<2x32xf32>
    %161 = arith.addf %160, %11 : vector<2x32xf32>
    %162 = arith.negf %161 : vector<2x32xf32>
    %163 = math.exp %162 : vector<2x32xf32>
    %cst_71 = arith.constant 1.000000e+00 : f32
    %164 = vector.broadcast %cst_71 : f32 to vector<2x32xf32>
    %165 = arith.addf %164, %163 : vector<2x32xf32>
    %166 = arith.divf %164, %165 : vector<2x32xf32>
    %cst_72 = arith.constant dense<0.000000e+00> : vector<2x32xf32>
    %167 = tpu.matmul %148, %2, %cst_72 {dimension_numbers = #tpu.dot_dimension_numbers<[1], [0], [0], [1], [0, 0, 1, 1], [], []>} : vector<2x5xf32>, vector<5x32xf32>, vector<2x32xf32> -> vector<2x32xf32>
    %168 = arith.addf %167, %14 : vector<2x32xf32>
    %cst_73 = arith.constant dense<0.000000e+00> : vector<2x32xf32>
    %169 = tpu.matmul %146, %5, %cst_73 {dimension_numbers = #tpu.dot_dimension_numbers<[1], [0], [0], [1], [0, 0, 1, 1], [], []>} : vector<2x32xf32>, vector<32x32xf32>, vector<2x32xf32> -> vector<2x32xf32>
    %170 = arith.addf %169, %17 : vector<2x32xf32>
    %171 = arith.mulf %157, %170 : vector<2x32xf32>
    %172 = arith.addf %168, %171 : vector<2x32xf32>
    %173 = math.tanh %172 : vector<2x32xf32>
    %cst_74 = arith.constant 1.000000e+00 : f32
    %174 = vector.broadcast %cst_74 : f32 to vector<2x32xf32>
    %175 = arith.subf %174, %166 : vector<2x32xf32>
    %176 = arith.mulf %175, %173 : vector<2x32xf32>
    %177 = arith.mulf %166, %146 : vector<2x32xf32>
    %178 = arith.addf %176, %177 : vector<2x32xf32>
    %c5 = arith.constant 5 : index
    %c0_75 = arith.constant 0 : index
    %c0_76 = arith.constant 0 : index
    %179 = vector.load %arg0[%c5, %c0_75, %c0_76] : memref<8x2x5xf32, #tpu.memory_space<vmem>>, vector<1x2x5xf32>
    %180 = vector.shape_cast %179 : vector<1x2x5xf32> to vector<2x5xf32>
    %cst_77 = arith.constant dense<0.000000e+00> : vector<2x32xf32>
    %181 = tpu.matmul %180, %0, %cst_77 {dimension_numbers = #tpu.dot_dimension_numbers<[1], [0], [0], [1], [0, 0, 1, 1], [], []>} : vector<2x5xf32>, vector<5x32xf32>, vector<2x32xf32> -> vector<2x32xf32>
    %cst_78 = arith.constant dense<0.000000e+00> : vector<2x32xf32>
    %182 = tpu.matmul %178, %3, %cst_78 {dimension_numbers = #tpu.dot_dimension_numbers<[1], [0], [0], [1], [0, 0, 1, 1], [], []>} : vector<2x32xf32>, vector<32x32xf32>, vector<2x32xf32> -> vector<2x32xf32>
    %183 = arith.addf %181, %182 : vector<2x32xf32>
    %184 = arith.addf %183, %8 : vector<2x32xf32>
    %185 = arith.negf %184 : vector<2x32xf32>
    %186 = math.exp %185 : vector<2x32xf32>
    %cst_79 = arith.constant 1.000000e+00 : f32
    %187 = vector.broadcast %cst_79 : f32 to vector<2x32xf32>
    %188 = arith.addf %187, %186 : vector<2x32xf32>
    %189 = arith.divf %187, %188 : vector<2x32xf32>
    %cst_80 = arith.constant dense<0.000000e+00> : vector<2x32xf32>
    %190 = tpu.matmul %180, %1, %cst_80 {dimension_numbers = #tpu.dot_dimension_numbers<[1], [0], [0], [1], [0, 0, 1, 1], [], []>} : vector<2x5xf32>, vector<5x32xf32>, vector<2x32xf32> -> vector<2x32xf32>
    %cst_81 = arith.constant dense<0.000000e+00> : vector<2x32xf32>
    %191 = tpu.matmul %178, %4, %cst_81 {dimension_numbers = #tpu.dot_dimension_numbers<[1], [0], [0], [1], [0, 0, 1, 1], [], []>} : vector<2x32xf32>, vector<32x32xf32>, vector<2x32xf32> -> vector<2x32xf32>
    %192 = arith.addf %190, %191 : vector<2x32xf32>
    %193 = arith.addf %192, %11 : vector<2x32xf32>
    %194 = arith.negf %193 : vector<2x32xf32>
    %195 = math.exp %194 : vector<2x32xf32>
    %cst_82 = arith.constant 1.000000e+00 : f32
    %196 = vector.broadcast %cst_82 : f32 to vector<2x32xf32>
    %197 = arith.addf %196, %195 : vector<2x32xf32>
    %198 = arith.divf %196, %197 : vector<2x32xf32>
    %cst_83 = arith.constant dense<0.000000e+00> : vector<2x32xf32>
    %199 = tpu.matmul %180, %2, %cst_83 {dimension_numbers = #tpu.dot_dimension_numbers<[1], [0], [0], [1], [0, 0, 1, 1], [], []>} : vector<2x5xf32>, vector<5x32xf32>, vector<2x32xf32> -> vector<2x32xf32>
    %200 = arith.addf %199, %14 : vector<2x32xf32>
    %cst_84 = arith.constant dense<0.000000e+00> : vector<2x32xf32>
    %201 = tpu.matmul %178, %5, %cst_84 {dimension_numbers = #tpu.dot_dimension_numbers<[1], [0], [0], [1], [0, 0, 1, 1], [], []>} : vector<2x32xf32>, vector<32x32xf32>, vector<2x32xf32> -> vector<2x32xf32>
    %202 = arith.addf %201, %17 : vector<2x32xf32>
    %203 = arith.mulf %189, %202 : vector<2x32xf32>
    %204 = arith.addf %200, %203 : vector<2x32xf32>
    %205 = math.tanh %204 : vector<2x32xf32>
    %cst_85 = arith.constant 1.000000e+00 : f32
    %206 = vector.broadcast %cst_85 : f32 to vector<2x32xf32>
    %207 = arith.subf %206, %198 : vector<2x32xf32>
    %208 = arith.mulf %207, %205 : vector<2x32xf32>
    %209 = arith.mulf %198, %178 : vector<2x32xf32>
    %210 = arith.addf %208, %209 : vector<2x32xf32>
    %c6 = arith.constant 6 : index
    %c0_86 = arith.constant 0 : index
    %c0_87 = arith.constant 0 : index
    %211 = vector.load %arg0[%c6, %c0_86, %c0_87] : memref<8x2x5xf32, #tpu.memory_space<vmem>>, vector<1x2x5xf32>
    %212 = vector.shape_cast %211 : vector<1x2x5xf32> to vector<2x5xf32>
    %cst_88 = arith.constant dense<0.000000e+00> : vector<2x32xf32>
    %213 = tpu.matmul %212, %0, %cst_88 {dimension_numbers = #tpu.dot_dimension_numbers<[1], [0], [0], [1], [0, 0, 1, 1], [], []>} : vector<2x5xf32>, vector<5x32xf32>, vector<2x32xf32> -> vector<2x32xf32>
    %cst_89 = arith.constant dense<0.000000e+00> : vector<2x32xf32>
    %214 = tpu.matmul %210, %3, %cst_89 {dimension_numbers = #tpu.dot_dimension_numbers<[1], [0], [0], [1], [0, 0, 1, 1], [], []>} : vector<2x32xf32>, vector<32x32xf32>, vector<2x32xf32> -> vector<2x32xf32>
    %215 = arith.addf %213, %214 : vector<2x32xf32>
    %216 = arith.addf %215, %8 : vector<2x32xf32>
    %217 = arith.negf %216 : vector<2x32xf32>
    %218 = math.exp %217 : vector<2x32xf32>
    %cst_90 = arith.constant 1.000000e+00 : f32
    %219 = vector.broadcast %cst_90 : f32 to vector<2x32xf32>
    %220 = arith.addf %219, %218 : vector<2x32xf32>
    %221 = arith.divf %219, %220 : vector<2x32xf32>
    %cst_91 = arith.constant dense<0.000000e+00> : vector<2x32xf32>
    %222 = tpu.matmul %212, %1, %cst_91 {dimension_numbers = #tpu.dot_dimension_numbers<[1], [0], [0], [1], [0, 0, 1, 1], [], []>} : vector<2x5xf32>, vector<5x32xf32>, vector<2x32xf32> -> vector<2x32xf32>
    %cst_92 = arith.constant dense<0.000000e+00> : vector<2x32xf32>
    %223 = tpu.matmul %210, %4, %cst_92 {dimension_numbers = #tpu.dot_dimension_numbers<[1], [0], [0], [1], [0, 0, 1, 1], [], []>} : vector<2x32xf32>, vector<32x32xf32>, vector<2x32xf32> -> vector<2x32xf32>
    %224 = arith.addf %222, %223 : vector<2x32xf32>
    %225 = arith.addf %224, %11 : vector<2x32xf32>
    %226 = arith.negf %225 : vector<2x32xf32>
    %227 = math.exp %226 : vector<2x32xf32>
    %cst_93 = arith.constant 1.000000e+00 : f32
    %228 = vector.broadcast %cst_93 : f32 to vector<2x32xf32>
    %229 = arith.addf %228, %227 : vector<2x32xf32>
    %230 = arith.divf %228, %229 : vector<2x32xf32>
    %cst_94 = arith.constant dense<0.000000e+00> : vector<2x32xf32>
    %231 = tpu.matmul %212, %2, %cst_94 {dimension_numbers = #tpu.dot_dimension_numbers<[1], [0], [0], [1], [0, 0, 1, 1], [], []>} : vector<2x5xf32>, vector<5x32xf32>, vector<2x32xf32> -> vector<2x32xf32>
    %232 = arith.addf %231, %14 : vector<2x32xf32>
    %cst_95 = arith.constant dense<0.000000e+00> : vector<2x32xf32>
    %233 = tpu.matmul %210, %5, %cst_95 {dimension_numbers = #tpu.dot_dimension_numbers<[1], [0], [0], [1], [0, 0, 1, 1], [], []>} : vector<2x32xf32>, vector<32x32xf32>, vector<2x32xf32> -> vector<2x32xf32>
    %234 = arith.addf %233, %17 : vector<2x32xf32>
    %235 = arith.mulf %221, %234 : vector<2x32xf32>
    %236 = arith.addf %232, %235 : vector<2x32xf32>
    %237 = math.tanh %236 : vector<2x32xf32>
    %cst_96 = arith.constant 1.000000e+00 : f32
    %238 = vector.broadcast %cst_96 : f32 to vector<2x32xf32>
    %239 = arith.subf %238, %230 : vector<2x32xf32>
    %240 = arith.mulf %239, %237 : vector<2x32xf32>
    %241 = arith.mulf %230, %210 : vector<2x32xf32>
    %242 = arith.addf %240, %241 : vector<2x32xf32>
    %c7 = arith.constant 7 : index
    %c0_97 = arith.constant 0 : index
    %c0_98 = arith.constant 0 : index
    %243 = vector.load %arg0[%c7, %c0_97, %c0_98] : memref<8x2x5xf32, #tpu.memory_space<vmem>>, vector<1x2x5xf32>
    %244 = vector.shape_cast %243 : vector<1x2x5xf32> to vector<2x5xf32>
    %cst_99 = arith.constant dense<0.000000e+00> : vector<2x32xf32>
    %245 = tpu.matmul %244, %0, %cst_99 {dimension_numbers = #tpu.dot_dimension_numbers<[1], [0], [0], [1], [0, 0, 1, 1], [], []>} : vector<2x5xf32>, vector<5x32xf32>, vector<2x32xf32> -> vector<2x32xf32>
    %cst_100 = arith.constant dense<0.000000e+00> : vector<2x32xf32>
    %246 = tpu.matmul %242, %3, %cst_100 {dimension_numbers = #tpu.dot_dimension_numbers<[1], [0], [0], [1], [0, 0, 1, 1], [], []>} : vector<2x32xf32>, vector<32x32xf32>, vector<2x32xf32> -> vector<2x32xf32>
    %247 = arith.addf %245, %246 : vector<2x32xf32>
    %248 = arith.addf %247, %8 : vector<2x32xf32>
    %249 = arith.negf %248 : vector<2x32xf32>
    %250 = math.exp %249 : vector<2x32xf32>
    %cst_101 = arith.constant 1.000000e+00 : f32
    %251 = vector.broadcast %cst_101 : f32 to vector<2x32xf32>
    %252 = arith.addf %251, %250 : vector<2x32xf32>
    %253 = arith.divf %251, %252 : vector<2x32xf32>
    %cst_102 = arith.constant dense<0.000000e+00> : vector<2x32xf32>
    %254 = tpu.matmul %244, %1, %cst_102 {dimension_numbers = #tpu.dot_dimension_numbers<[1], [0], [0], [1], [0, 0, 1, 1], [], []>} : vector<2x5xf32>, vector<5x32xf32>, vector<2x32xf32> -> vector<2x32xf32>
    %cst_103 = arith.constant dense<0.000000e+00> : vector<2x32xf32>
    %255 = tpu.matmul %242, %4, %cst_103 {dimension_numbers = #tpu.dot_dimension_numbers<[1], [0], [0], [1], [0, 0, 1, 1], [], []>} : vector<2x32xf32>, vector<32x32xf32>, vector<2x32xf32> -> vector<2x32xf32>
    %256 = arith.addf %254, %255 : vector<2x32xf32>
    %257 = arith.addf %256, %11 : vector<2x32xf32>
    %258 = arith.negf %257 : vector<2x32xf32>
    %259 = math.exp %258 : vector<2x32xf32>
    %cst_104 = arith.constant 1.000000e+00 : f32
    %260 = vector.broadcast %cst_104 : f32 to vector<2x32xf32>
    %261 = arith.addf %260, %259 : vector<2x32xf32>
    %262 = arith.divf %260, %261 : vector<2x32xf32>
    %cst_105 = arith.constant dense<0.000000e+00> : vector<2x32xf32>
    %263 = tpu.matmul %244, %2, %cst_105 {dimension_numbers = #tpu.dot_dimension_numbers<[1], [0], [0], [1], [0, 0, 1, 1], [], []>} : vector<2x5xf32>, vector<5x32xf32>, vector<2x32xf32> -> vector<2x32xf32>
    %264 = arith.addf %263, %14 : vector<2x32xf32>
    %cst_106 = arith.constant dense<0.000000e+00> : vector<2x32xf32>
    %265 = tpu.matmul %242, %5, %cst_106 {dimension_numbers = #tpu.dot_dimension_numbers<[1], [0], [0], [1], [0, 0, 1, 1], [], []>} : vector<2x32xf32>, vector<32x32xf32>, vector<2x32xf32> -> vector<2x32xf32>
    %266 = arith.addf %265, %17 : vector<2x32xf32>
    %267 = arith.mulf %253, %266 : vector<2x32xf32>
    %268 = arith.addf %264, %267 : vector<2x32xf32>
    %269 = math.tanh %268 : vector<2x32xf32>
    %cst_107 = arith.constant 1.000000e+00 : f32
    %270 = vector.broadcast %cst_107 : f32 to vector<2x32xf32>
    %271 = arith.subf %270, %262 : vector<2x32xf32>
    %272 = arith.mulf %271, %269 : vector<2x32xf32>
    %273 = arith.mulf %262, %242 : vector<2x32xf32>
    %274 = arith.addf %272, %273 : vector<2x32xf32>
    %c0_108 = arith.constant 0 : index
    %c0_109 = arith.constant 0 : index
    %275 = vector.load %arg11[%c0_108, %c0_109] : memref<32x10xf32, #tpu.memory_space<vmem>>, vector<32x10xf32>
    %cst_110 = arith.constant dense<0.000000e+00> : vector<2x10xf32>
    %276 = tpu.matmul %274, %275, %cst_110 {dimension_numbers = #tpu.dot_dimension_numbers<[1], [0], [0], [1], [0, 0, 1, 1], [], []>} : vector<2x32xf32>, vector<32x10xf32>, vector<2x10xf32> -> vector<2x10xf32>
    %c0_111 = arith.constant 0 : index
    %c0_112 = arith.constant 0 : index
    %277 = vector.load %arg12[%c0_111, %c0_112] : memref<1x10xf32, #tpu.memory_space<vmem>>, vector<1x10xf32>
    %278 = vector.broadcast %277 : vector<1x10xf32> to vector<2x10xf32>
    %279 = arith.addf %276, %278 : vector<2x10xf32>
    %c0_113 = arith.constant 0 : index
    %c0_114 = arith.constant 0 : index
    %280 = vector.load %arg13[%c0_113, %c0_114] : memref<6x2xf32, #tpu.memory_space<vmem>>, vector<6x2xf32>
    %cst_115 = arith.constant dense<0.000000e+00> : vector<6x10xf32>
    %281 = tpu.matmul %280, %279, %cst_115 {dimension_numbers = #tpu.dot_dimension_numbers<[1], [0], [0], [1], [0, 0, 1, 1], [], []>} : vector<6x2xf32>, vector<2x10xf32>, vector<6x10xf32> -> vector<6x10xf32>
    %c0_116 = arith.constant 0 : index
    %c0_117 = arith.constant 0 : index
    %282 = vector.load %arg27[%c0_116, %c0_117] : memref<4x1xf32, #tpu.memory_space<vmem>>, vector<4x1xf32>
    %c0_118 = arith.constant 0 : index
    %c0_119 = arith.constant 0 : index
    %283 = vector.load %arg14[%c0_118, %c0_119] : memref<1x20xf32, #tpu.memory_space<vmem>>, vector<1x20xf32>
    %cst_120 = arith.constant dense<0.000000e+00> : vector<4x20xf32>
    %284 = tpu.matmul %282, %283, %cst_120 {dimension_numbers = #tpu.dot_dimension_numbers<[1], [0], [0], [1], [0, 0, 1, 1], [], []>} : vector<4x1xf32>, vector<1x20xf32>, vector<4x20xf32> -> vector<4x20xf32>
    %c0_121 = arith.constant 0 : index
    %c0_122 = arith.constant 0 : index
    %285 = vector.load %arg15[%c0_121, %c0_122] : memref<1x20xf32, #tpu.memory_space<vmem>>, vector<1x20xf32>
    %286 = vector.broadcast %285 : vector<1x20xf32> to vector<4x20xf32>
    %287 = arith.addf %284, %286 : vector<4x20xf32>
    %cst_123 = arith.constant 0.000000e+00 : f32
    %288 = vector.broadcast %cst_123 : f32 to vector<4x20xf32>
    %289 = arith.maximumf %287, %288 : vector<4x20xf32>
    %c0_124 = arith.constant 0 : index
    %c0_125 = arith.constant 0 : index
    %c0_126 = arith.constant 0 : index
    %290 = vector.load %arg16[%c0_124, %c0_125, %c0_126] : memref<4x20x20xf32, #tpu.memory_space<vmem>>, vector<1x20x20xf32>
    %291 = vector.shape_cast %290 : vector<1x20x20xf32> to vector<20x20xf32>
    %cst_127 = arith.constant dense<0.000000e+00> : vector<4x20xf32>
    %292 = tpu.matmul %289, %291, %cst_127 {dimension_numbers = #tpu.dot_dimension_numbers<[1], [0], [0], [1], [0, 0, 1, 1], [], []>} : vector<4x20xf32>, vector<20x20xf32>, vector<4x20xf32> -> vector<4x20xf32>
    %c0_128 = arith.constant 0 : index
    %c0_129 = arith.constant 0 : index
    %c0_130 = arith.constant 0 : index
    %293 = vector.load %arg17[%c0_128, %c0_129, %c0_130] : memref<4x1x20xf32, #tpu.memory_space<vmem>>, vector<1x1x20xf32>
    %294 = vector.shape_cast %293 : vector<1x1x20xf32> to vector<1x20xf32>
    %295 = vector.broadcast %294 : vector<1x20xf32> to vector<4x20xf32>
    %296 = arith.addf %292, %295 : vector<4x20xf32>
    %cst_131 = arith.constant 0.000000e+00 : f32
    %297 = vector.broadcast %cst_131 : f32 to vector<4x20xf32>
    %298 = arith.maximumf %296, %297 : vector<4x20xf32>
    %c1_132 = arith.constant 1 : index
    %c0_133 = arith.constant 0 : index
    %c0_134 = arith.constant 0 : index
    %299 = vector.load %arg16[%c1_132, %c0_133, %c0_134] : memref<4x20x20xf32, #tpu.memory_space<vmem>>, vector<1x20x20xf32>
    %300 = vector.shape_cast %299 : vector<1x20x20xf32> to vector<20x20xf32>
    %cst_135 = arith.constant dense<0.000000e+00> : vector<4x20xf32>
    %301 = tpu.matmul %298, %300, %cst_135 {dimension_numbers = #tpu.dot_dimension_numbers<[1], [0], [0], [1], [0, 0, 1, 1], [], []>} : vector<4x20xf32>, vector<20x20xf32>, vector<4x20xf32> -> vector<4x20xf32>
    %c1_136 = arith.constant 1 : index
    %c0_137 = arith.constant 0 : index
    %c0_138 = arith.constant 0 : index
    %302 = vector.load %arg17[%c1_136, %c0_137, %c0_138] : memref<4x1x20xf32, #tpu.memory_space<vmem>>, vector<1x1x20xf32>
    %303 = vector.shape_cast %302 : vector<1x1x20xf32> to vector<1x20xf32>
    %304 = vector.broadcast %303 : vector<1x20xf32> to vector<4x20xf32>
    %305 = arith.addf %301, %304 : vector<4x20xf32>
    %cst_139 = arith.constant 0.000000e+00 : f32
    %306 = vector.broadcast %cst_139 : f32 to vector<4x20xf32>
    %307 = arith.maximumf %305, %306 : vector<4x20xf32>
    %c2_140 = arith.constant 2 : index
    %c0_141 = arith.constant 0 : index
    %c0_142 = arith.constant 0 : index
    %308 = vector.load %arg16[%c2_140, %c0_141, %c0_142] : memref<4x20x20xf32, #tpu.memory_space<vmem>>, vector<1x20x20xf32>
    %309 = vector.shape_cast %308 : vector<1x20x20xf32> to vector<20x20xf32>
    %cst_143 = arith.constant dense<0.000000e+00> : vector<4x20xf32>
    %310 = tpu.matmul %307, %309, %cst_143 {dimension_numbers = #tpu.dot_dimension_numbers<[1], [0], [0], [1], [0, 0, 1, 1], [], []>} : vector<4x20xf32>, vector<20x20xf32>, vector<4x20xf32> -> vector<4x20xf32>
    %c2_144 = arith.constant 2 : index
    %c0_145 = arith.constant 0 : index
    %c0_146 = arith.constant 0 : index
    %311 = vector.load %arg17[%c2_144, %c0_145, %c0_146] : memref<4x1x20xf32, #tpu.memory_space<vmem>>, vector<1x1x20xf32>
    %312 = vector.shape_cast %311 : vector<1x1x20xf32> to vector<1x20xf32>
    %313 = vector.broadcast %312 : vector<1x20xf32> to vector<4x20xf32>
    %314 = arith.addf %310, %313 : vector<4x20xf32>
    %cst_147 = arith.constant 0.000000e+00 : f32
    %315 = vector.broadcast %cst_147 : f32 to vector<4x20xf32>
    %316 = arith.maximumf %314, %315 : vector<4x20xf32>
    %c3_148 = arith.constant 3 : index
    %c0_149 = arith.constant 0 : index
    %c0_150 = arith.constant 0 : index
    %317 = vector.load %arg16[%c3_148, %c0_149, %c0_150] : memref<4x20x20xf32, #tpu.memory_space<vmem>>, vector<1x20x20xf32>
    %318 = vector.shape_cast %317 : vector<1x20x20xf32> to vector<20x20xf32>
    %cst_151 = arith.constant dense<0.000000e+00> : vector<4x20xf32>
    %319 = tpu.matmul %316, %318, %cst_151 {dimension_numbers = #tpu.dot_dimension_numbers<[1], [0], [0], [1], [0, 0, 1, 1], [], []>} : vector<4x20xf32>, vector<20x20xf32>, vector<4x20xf32> -> vector<4x20xf32>
    %c3_152 = arith.constant 3 : index
    %c0_153 = arith.constant 0 : index
    %c0_154 = arith.constant 0 : index
    %320 = vector.load %arg17[%c3_152, %c0_153, %c0_154] : memref<4x1x20xf32, #tpu.memory_space<vmem>>, vector<1x1x20xf32>
    %321 = vector.shape_cast %320 : vector<1x1x20xf32> to vector<1x20xf32>
    %322 = vector.broadcast %321 : vector<1x20xf32> to vector<4x20xf32>
    %323 = arith.addf %319, %322 : vector<4x20xf32>
    %cst_155 = arith.constant 0.000000e+00 : f32
    %324 = vector.broadcast %cst_155 : f32 to vector<4x20xf32>
    %325 = arith.maximumf %323, %324 : vector<4x20xf32>
    %c0_156 = arith.constant 0 : index
    %c0_157 = arith.constant 0 : index
    %326 = vector.load %arg18[%c0_156, %c0_157] : memref<20x2xf32, #tpu.memory_space<vmem>>, vector<20x2xf32>
    %cst_158 = arith.constant dense<0.000000e+00> : vector<4x2xf32>
    %327 = tpu.matmul %325, %326, %cst_158 {dimension_numbers = #tpu.dot_dimension_numbers<[1], [0], [0], [1], [0, 0, 1, 1], [], []>} : vector<4x20xf32>, vector<20x2xf32>, vector<4x2xf32> -> vector<4x2xf32>
    %c0_159 = arith.constant 0 : index
    %c0_160 = arith.constant 0 : index
    %328 = vector.load %arg19[%c0_159, %c0_160] : memref<1x2xf32, #tpu.memory_space<vmem>>, vector<1x2xf32>
    %329 = vector.broadcast %328 : vector<1x2xf32> to vector<4x2xf32>
    %330 = arith.addf %327, %329 : vector<4x2xf32>
    %c0_161 = arith.constant 0 : index
    %c0_162 = arith.constant 0 : index
    %331 = vector.load %arg21[%c0_161, %c0_162] : memref<2x40xf32, #tpu.memory_space<vmem>>, vector<2x40xf32>
    %cst_163 = arith.constant dense<0.000000e+00> : vector<4x40xf32>
    %332 = tpu.matmul %330, %331, %cst_163 {dimension_numbers = #tpu.dot_dimension_numbers<[1], [0], [0], [1], [0, 0, 1, 1], [], []>} : vector<4x2xf32>, vector<2x40xf32>, vector<4x40xf32> -> vector<4x40xf32>
    %c0_164 = arith.constant 0 : index
    %c0_165 = arith.constant 0 : index
    %333 = vector.load %arg20[%c0_164, %c0_165] : memref<10x40xf32, #tpu.memory_space<vmem>>, vector<10x40xf32>
    %c0_166 = arith.constant 0 : index
    %c0_167 = arith.constant 0 : index
    %334 = vector.load %arg25[%c0_166, %c0_167] : memref<40x10xf32, #tpu.memory_space<vmem>>, vector<40x10xf32>
    %c0_168 = arith.constant 0 : index
    %c0_169 = arith.constant 0 : index
    %335 = vector.load %arg22[%c0_168, %c0_169] : memref<1x40xf32, #tpu.memory_space<vmem>>, vector<1x40xf32>
    %336 = vector.shape_cast %335 : vector<1x40xf32> to vector<1x40xf32>
    %337 = vector.broadcast %336 : vector<1x40xf32> to vector<6x40xf32>
    %c0_170 = arith.constant 0 : index
    %c0_171 = arith.constant 0 : index
    %c0_172 = arith.constant 0 : index
    %338 = vector.load %arg23[%c0_170, %c0_171, %c0_172] : memref<4x40x40xf32, #tpu.memory_space<vmem>>, vector<1x40x40xf32>
    %339 = vector.shape_cast %338 : vector<1x40x40xf32> to vector<40x40xf32>
    %c1_173 = arith.constant 1 : index
    %c0_174 = arith.constant 0 : index
    %c0_175 = arith.constant 0 : index
    %340 = vector.load %arg23[%c1_173, %c0_174, %c0_175] : memref<4x40x40xf32, #tpu.memory_space<vmem>>, vector<1x40x40xf32>
    %341 = vector.shape_cast %340 : vector<1x40x40xf32> to vector<40x40xf32>
    %c2_176 = arith.constant 2 : index
    %c0_177 = arith.constant 0 : index
    %c0_178 = arith.constant 0 : index
    %342 = vector.load %arg23[%c2_176, %c0_177, %c0_178] : memref<4x40x40xf32, #tpu.memory_space<vmem>>, vector<1x40x40xf32>
    %343 = vector.shape_cast %342 : vector<1x40x40xf32> to vector<40x40xf32>
    %c3_179 = arith.constant 3 : index
    %c0_180 = arith.constant 0 : index
    %c0_181 = arith.constant 0 : index
    %344 = vector.load %arg23[%c3_179, %c0_180, %c0_181] : memref<4x40x40xf32, #tpu.memory_space<vmem>>, vector<1x40x40xf32>
    %345 = vector.shape_cast %344 : vector<1x40x40xf32> to vector<40x40xf32>
    %c0_182 = arith.constant 0 : index
    %c0_183 = arith.constant 0 : index
    %c0_184 = arith.constant 0 : index
    %346 = vector.load %arg24[%c0_182, %c0_183, %c0_184] : memref<4x1x40xf32, #tpu.memory_space<vmem>>, vector<1x1x40xf32>
    %347 = vector.shape_cast %346 : vector<1x1x40xf32> to vector<1x40xf32>
    %348 = vector.shape_cast %347 : vector<1x40xf32> to vector<1x40xf32>
    %349 = vector.broadcast %348 : vector<1x40xf32> to vector<6x40xf32>
    %c1_185 = arith.constant 1 : index
    %c0_186 = arith.constant 0 : index
    %c0_187 = arith.constant 0 : index
    %350 = vector.load %arg24[%c1_185, %c0_186, %c0_187] : memref<4x1x40xf32, #tpu.memory_space<vmem>>, vector<1x1x40xf32>
    %351 = vector.shape_cast %350 : vector<1x1x40xf32> to vector<1x40xf32>
    %352 = vector.shape_cast %351 : vector<1x40xf32> to vector<1x40xf32>
    %353 = vector.broadcast %352 : vector<1x40xf32> to vector<6x40xf32>
    %c2_188 = arith.constant 2 : index
    %c0_189 = arith.constant 0 : index
    %c0_190 = arith.constant 0 : index
    %354 = vector.load %arg24[%c2_188, %c0_189, %c0_190] : memref<4x1x40xf32, #tpu.memory_space<vmem>>, vector<1x1x40xf32>
    %355 = vector.shape_cast %354 : vector<1x1x40xf32> to vector<1x40xf32>
    %356 = vector.shape_cast %355 : vector<1x40xf32> to vector<1x40xf32>
    %357 = vector.broadcast %356 : vector<1x40xf32> to vector<6x40xf32>
    %c3_191 = arith.constant 3 : index
    %c0_192 = arith.constant 0 : index
    %c0_193 = arith.constant 0 : index
    %358 = vector.load %arg24[%c3_191, %c0_192, %c0_193] : memref<4x1x40xf32, #tpu.memory_space<vmem>>, vector<1x1x40xf32>
    %359 = vector.shape_cast %358 : vector<1x1x40xf32> to vector<1x40xf32>
    %360 = vector.shape_cast %359 : vector<1x40xf32> to vector<1x40xf32>
    %361 = vector.broadcast %360 : vector<1x40xf32> to vector<6x40xf32>
    %c0_194 = arith.constant 0 : index
    %c0_195 = arith.constant 0 : index
    %362 = vector.load %arg26[%c0_194, %c0_195] : memref<1x10xf32, #tpu.memory_space<vmem>>, vector<1x10xf32>
    %363 = vector.shape_cast %362 : vector<1x10xf32> to vector<1x10xf32>
    %364 = vector.broadcast %363 : vector<1x10xf32> to vector<6x10xf32>
    %c0_196 = arith.constant 0 : index
    %c0_197 = arith.constant 0 : index
    %365 = vector.load %arg28[%c0_196, %c0_197] : memref<6x1xf32, #tpu.memory_space<vmem>>, vector<6x1xf32>
    %cst_198 = arith.constant 0.000000e+00 : f32
    %366 = vector.broadcast %cst_198 : f32 to vector<6x1xf32>
    %c0_199 = arith.constant 0 : index
    %c0_200 = arith.constant 0 : index
    %c0_201 = arith.constant 0 : index
    %367 = vector.load %arg38[%c0_199, %c0_200, %c0_201] : memref<5x6x10xf32, #tpu.memory_space<vmem>>, vector<1x6x10xf32>
    %368 = vector.shape_cast %367 : vector<1x6x10xf32> to vector<6x10xf32>
    %369 = vector.shape_cast %281 : vector<6x10xf32> to vector<1x6x10xf32>
    tpu.vector_store %arg38[%c0_199, %c0_200, %c0_201], %369 {strides = array<i32>} : memref<5x6x10xf32, #tpu.memory_space<vmem>>, vector<1x6x10xf32>,
    %c0_202 = arith.constant 0 : index
    %c0_203 = arith.constant 0 : index
    %c0_204 = arith.constant 0 : index
    %370 = vector.load %arg39[%c0_202, %c0_203, %c0_204] : memref<5x6x1xf32, #tpu.memory_space<vmem>>, vector<1x6x1xf32>
    %371 = vector.shape_cast %370 : vector<1x6x1xf32> to vector<6x1xf32>
    %372 = vector.shape_cast %366 : vector<6x1xf32> to vector<1x6x1xf32>
    tpu.vector_store %arg39[%c0_202, %c0_203, %c0_204], %372 {strides = array<i32>} : memref<5x6x1xf32, #tpu.memory_space<vmem>>, vector<1x6x1xf32>,
    %c0_205 = arith.constant 0 : index
    %373 = memref.load %arg30[%c0_205] : memref<4xf32, #tpu.memory_space<smem>>
    %c0_206 = arith.constant 0 : index
    %374 = memref.load %arg31[%c0_206] : memref<4xf32, #tpu.memory_space<smem>>
    %cst_207 = arith.constant dense<0.000000e+00> : vector<6x40xf32>
    %375 = tpu.matmul %281, %333, %cst_207 {dimension_numbers = #tpu.dot_dimension_numbers<[1], [0], [0], [1], [0, 0, 1, 1], [], []>} : vector<6x10xf32>, vector<10x40xf32>, vector<6x40xf32> -> vector<6x40xf32>
    %376 = vector.extract_strided_slice %332 {offsets = [0, 0], sizes = [1, 40], strides = [1, 1]} : vector<4x40xf32> to vector<1x40xf32>
    %377 = vector.broadcast %365 : vector<6x1xf32> to vector<6x40xf32>
    %378 = vector.broadcast %376 : vector<1x40xf32> to vector<6x40xf32>
    %379 = arith.mulf %377, %378 : vector<6x40xf32>
    %380 = arith.addf %375, %379 : vector<6x40xf32>
    %381 = arith.addf %380, %337 : vector<6x40xf32>
    %cst_208 = arith.constant 0.000000e+00 : f32
    %382 = vector.broadcast %cst_208 : f32 to vector<6x40xf32>
    %383 = arith.maximumf %381, %382 : vector<6x40xf32>
    %cst_209 = arith.constant dense<0.000000e+00> : vector<6x40xf32>
    %384 = tpu.matmul %383, %339, %cst_209 {dimension_numbers = #tpu.dot_dimension_numbers<[1], [0], [0], [1], [0, 0, 1, 1], [], []>} : vector<6x40xf32>, vector<40x40xf32>, vector<6x40xf32> -> vector<6x40xf32>
    %385 = arith.addf %384, %349 : vector<6x40xf32>
    %386 = math.tanh %385 : vector<6x40xf32>
    %cst_210 = arith.constant dense<0.000000e+00> : vector<6x40xf32>
    %387 = tpu.matmul %386, %341, %cst_210 {dimension_numbers = #tpu.dot_dimension_numbers<[1], [0], [0], [1], [0, 0, 1, 1], [], []>} : vector<6x40xf32>, vector<40x40xf32>, vector<6x40xf32> -> vector<6x40xf32>
    %388 = arith.addf %387, %353 : vector<6x40xf32>
    %389 = math.tanh %388 : vector<6x40xf32>
    %cst_211 = arith.constant dense<0.000000e+00> : vector<6x40xf32>
    %390 = tpu.matmul %389, %343, %cst_211 {dimension_numbers = #tpu.dot_dimension_numbers<[1], [0], [0], [1], [0, 0, 1, 1], [], []>} : vector<6x40xf32>, vector<40x40xf32>, vector<6x40xf32> -> vector<6x40xf32>
    %391 = arith.addf %390, %357 : vector<6x40xf32>
    %392 = math.tanh %391 : vector<6x40xf32>
    %cst_212 = arith.constant dense<0.000000e+00> : vector<6x40xf32>
    %393 = tpu.matmul %392, %345, %cst_212 {dimension_numbers = #tpu.dot_dimension_numbers<[1], [0], [0], [1], [0, 0, 1, 1], [], []>} : vector<6x40xf32>, vector<40x40xf32>, vector<6x40xf32> -> vector<6x40xf32>
    %394 = arith.addf %393, %361 : vector<6x40xf32>
    %395 = math.tanh %394 : vector<6x40xf32>
    %cst_213 = arith.constant dense<0.000000e+00> : vector<6x10xf32>
    %396 = tpu.matmul %395, %334, %cst_213 {dimension_numbers = #tpu.dot_dimension_numbers<[1], [0], [0], [1], [0, 0, 1, 1], [], []>} : vector<6x40xf32>, vector<40x10xf32>, vector<6x10xf32> -> vector<6x10xf32>
    %397 = arith.addf %396, %364 : vector<6x10xf32>
    %cst_214 = arith.constant 5.000000e-01 : f32
    %398 = vector.broadcast %cst_214 : f32 to vector<6x10xf32>
    %399 = arith.subf %398, %281 : vector<6x10xf32>
    %cst_215 = arith.constant 1.000000e+00 : f32
    %400 = vector.broadcast %cst_215 : f32 to vector<6x10xf32>
    %401 = arith.mulf %400, %399 : vector<6x10xf32>
    %402 = arith.subf %397, %401 : vector<6x10xf32>
    %403 = arith.subf %402, %401 : vector<6x10xf32>
    %cst_216 = arith.constant 1.000000e+01 : f32
    %404 = vector.broadcast %cst_216 : f32 to vector<6x10xf32>
    %405 = arith.mulf %403, %404 : vector<6x10xf32>
    %406 = arith.mulf %405, %405 : vector<6x10xf32>
    %cst_217 = arith.constant dense<0.000000e+00> : vector<6xf32>
    %407 = vector.multi_reduction <add>, %406, %cst_217 [1] : vector<6x10xf32> to vector<6xf32>
    %408 = vector.shape_cast %407 : vector<6xf32> to vector<6x1xf32>
    %cst_218 = arith.constant 5.000000e-01 : f32
    %409 = vector.broadcast %cst_218 : f32 to vector<6x1xf32>
    %410 = arith.mulf %409, %408 : vector<6x1xf32>
    %411 = vector.broadcast %373 : f32 to vector<6x10xf32>
    %412 = arith.mulf %402, %411 : vector<6x10xf32>
    %413 = arith.addf %281, %412 : vector<6x10xf32>
    %c0_219 = arith.constant 0 : index
    %c0_220 = arith.constant 0 : index
    %c0_221 = arith.constant 0 : index
    %414 = vector.load %arg29[%c0_219, %c0_220, %c0_221] : memref<4x6x10xf32, #tpu.memory_space<vmem>>, vector<1x6x10xf32>
    %415 = vector.shape_cast %414 : vector<1x6x10xf32> to vector<6x10xf32>
    %416 = vector.broadcast %374 : f32 to vector<6x10xf32>
    %417 = arith.mulf %416, %415 : vector<6x10xf32>
    %418 = arith.addf %413, %417 : vector<6x10xf32>
    %419 = vector.broadcast %373 : f32 to vector<6x1xf32>
    %420 = arith.mulf %410, %419 : vector<6x1xf32>
    %421 = arith.addf %366, %420 : vector<6x1xf32>
    %c1_222 = arith.constant 1 : index
    %c0_223 = arith.constant 0 : index
    %c0_224 = arith.constant 0 : index
    %422 = vector.load %arg38[%c1_222, %c0_223, %c0_224] : memref<5x6x10xf32, #tpu.memory_space<vmem>>, vector<1x6x10xf32>
    %423 = vector.shape_cast %422 : vector<1x6x10xf32> to vector<6x10xf32>
    %424 = vector.shape_cast %418 : vector<6x10xf32> to vector<1x6x10xf32>
    tpu.vector_store %arg38[%c1_222, %c0_223, %c0_224], %424 {strides = array<i32>} : memref<5x6x10xf32, #tpu.memory_space<vmem>>, vector<1x6x10xf32>,
    %c1_225 = arith.constant 1 : index
    %c0_226 = arith.constant 0 : index
    %c0_227 = arith.constant 0 : index
    %425 = vector.load %arg39[%c1_225, %c0_226, %c0_227] : memref<5x6x1xf32, #tpu.memory_space<vmem>>, vector<1x6x1xf32>
    %426 = vector.shape_cast %425 : vector<1x6x1xf32> to vector<6x1xf32>
    %427 = vector.shape_cast %421 : vector<6x1xf32> to vector<1x6x1xf32>
    tpu.vector_store %arg39[%c1_225, %c0_226, %c0_227], %427 {strides = array<i32>} : memref<5x6x1xf32, #tpu.memory_space<vmem>>, vector<1x6x1xf32>,
    %c1_228 = arith.constant 1 : index
    %428 = memref.load %arg30[%c1_228] : memref<4xf32, #tpu.memory_space<smem>>
    %c1_229 = arith.constant 1 : index
    %429 = memref.load %arg31[%c1_229] : memref<4xf32, #tpu.memory_space<smem>>
    %cst_230 = arith.constant dense<0.000000e+00> : vector<6x40xf32>
    %430 = tpu.matmul %418, %333, %cst_230 {dimension_numbers = #tpu.dot_dimension_numbers<[1], [0], [0], [1], [0, 0, 1, 1], [], []>} : vector<6x10xf32>, vector<10x40xf32>, vector<6x40xf32> -> vector<6x40xf32>
    %431 = vector.extract_strided_slice %332 {offsets = [1, 0], sizes = [1, 40], strides = [1, 1]} : vector<4x40xf32> to vector<1x40xf32>
    %432 = vector.broadcast %365 : vector<6x1xf32> to vector<6x40xf32>
    %433 = vector.broadcast %431 : vector<1x40xf32> to vector<6x40xf32>
    %434 = arith.mulf %432, %433 : vector<6x40xf32>
    %435 = arith.addf %430, %434 : vector<6x40xf32>
    %436 = arith.addf %435, %337 : vector<6x40xf32>
    %cst_231 = arith.constant 0.000000e+00 : f32
    %437 = vector.broadcast %cst_231 : f32 to vector<6x40xf32>
    %438 = arith.maximumf %436, %437 : vector<6x40xf32>
    %cst_232 = arith.constant dense<0.000000e+00> : vector<6x40xf32>
    %439 = tpu.matmul %438, %339, %cst_232 {dimension_numbers = #tpu.dot_dimension_numbers<[1], [0], [0], [1], [0, 0, 1, 1], [], []>} : vector<6x40xf32>, vector<40x40xf32>, vector<6x40xf32> -> vector<6x40xf32>
    %440 = arith.addf %439, %349 : vector<6x40xf32>
    %441 = math.tanh %440 : vector<6x40xf32>
    %cst_233 = arith.constant dense<0.000000e+00> : vector<6x40xf32>
    %442 = tpu.matmul %441, %341, %cst_233 {dimension_numbers = #tpu.dot_dimension_numbers<[1], [0], [0], [1], [0, 0, 1, 1], [], []>} : vector<6x40xf32>, vector<40x40xf32>, vector<6x40xf32> -> vector<6x40xf32>
    %443 = arith.addf %442, %353 : vector<6x40xf32>
    %444 = math.tanh %443 : vector<6x40xf32>
    %cst_234 = arith.constant dense<0.000000e+00> : vector<6x40xf32>
    %445 = tpu.matmul %444, %343, %cst_234 {dimension_numbers = #tpu.dot_dimension_numbers<[1], [0], [0], [1], [0, 0, 1, 1], [], []>} : vector<6x40xf32>, vector<40x40xf32>, vector<6x40xf32> -> vector<6x40xf32>
    %446 = arith.addf %445, %357 : vector<6x40xf32>
    %447 = math.tanh %446 : vector<6x40xf32>
    %cst_235 = arith.constant dense<0.000000e+00> : vector<6x40xf32>
    %448 = tpu.matmul %447, %345, %cst_235 {dimension_numbers = #tpu.dot_dimension_numbers<[1], [0], [0], [1], [0, 0, 1, 1], [], []>} : vector<6x40xf32>, vector<40x40xf32>, vector<6x40xf32> -> vector<6x40xf32>
    %449 = arith.addf %448, %361 : vector<6x40xf32>
    %450 = math.tanh %449 : vector<6x40xf32>
    %cst_236 = arith.constant dense<0.000000e+00> : vector<6x10xf32>
    %451 = tpu.matmul %450, %334, %cst_236 {dimension_numbers = #tpu.dot_dimension_numbers<[1], [0], [0], [1], [0, 0, 1, 1], [], []>} : vector<6x40xf32>, vector<40x10xf32>, vector<6x10xf32> -> vector<6x10xf32>
    %452 = arith.addf %451, %364 : vector<6x10xf32>
    %cst_237 = arith.constant 5.000000e-01 : f32
    %453 = vector.broadcast %cst_237 : f32 to vector<6x10xf32>
    %454 = arith.subf %453, %418 : vector<6x10xf32>
    %cst_238 = arith.constant 1.000000e+00 : f32
    %455 = vector.broadcast %cst_238 : f32 to vector<6x10xf32>
    %456 = arith.mulf %455, %454 : vector<6x10xf32>
    %457 = arith.subf %452, %456 : vector<6x10xf32>
    %458 = arith.subf %457, %456 : vector<6x10xf32>
    %cst_239 = arith.constant 1.000000e+01 : f32
    %459 = vector.broadcast %cst_239 : f32 to vector<6x10xf32>
    %460 = arith.mulf %458, %459 : vector<6x10xf32>
    %461 = arith.mulf %460, %460 : vector<6x10xf32>
    %cst_240 = arith.constant dense<0.000000e+00> : vector<6xf32>
    %462 = vector.multi_reduction <add>, %461, %cst_240 [1] : vector<6x10xf32> to vector<6xf32>
    %463 = vector.shape_cast %462 : vector<6xf32> to vector<6x1xf32>
    %cst_241 = arith.constant 5.000000e-01 : f32
    %464 = vector.broadcast %cst_241 : f32 to vector<6x1xf32>
    %465 = arith.mulf %464, %463 : vector<6x1xf32>
    %466 = vector.broadcast %428 : f32 to vector<6x10xf32>
    %467 = arith.mulf %457, %466 : vector<6x10xf32>
    %468 = arith.addf %418, %467 : vector<6x10xf32>
    %c1_242 = arith.constant 1 : index
    %c0_243 = arith.constant 0 : index
    %c0_244 = arith.constant 0 : index
    %469 = vector.load %arg29[%c1_242, %c0_243, %c0_244] : memref<4x6x10xf32, #tpu.memory_space<vmem>>, vector<1x6x10xf32>
    %470 = vector.shape_cast %469 : vector<1x6x10xf32> to vector<6x10xf32>
    %471 = vector.broadcast %429 : f32 to vector<6x10xf32>
    %472 = arith.mulf %471, %470 : vector<6x10xf32>
    %473 = arith.addf %468, %472 : vector<6x10xf32>
    %474 = vector.broadcast %428 : f32 to vector<6x1xf32>
    %475 = arith.mulf %465, %474 : vector<6x1xf32>
    %476 = arith.addf %421, %475 : vector<6x1xf32>
    %c2_245 = arith.constant 2 : index
    %c0_246 = arith.constant 0 : index
    %c0_247 = arith.constant 0 : index
    %477 = vector.load %arg38[%c2_245, %c0_246, %c0_247] : memref<5x6x10xf32, #tpu.memory_space<vmem>>, vector<1x6x10xf32>
    %478 = vector.shape_cast %477 : vector<1x6x10xf32> to vector<6x10xf32>
    %479 = vector.shape_cast %473 : vector<6x10xf32> to vector<1x6x10xf32>
    tpu.vector_store %arg38[%c2_245, %c0_246, %c0_247], %479 {strides = array<i32>} : memref<5x6x10xf32, #tpu.memory_space<vmem>>, vector<1x6x10xf32>,
    %c2_248 = arith.constant 2 : index
    %c0_249 = arith.constant 0 : index
    %c0_250 = arith.constant 0 : index
    %480 = vector.load %arg39[%c2_248, %c0_249, %c0_250] : memref<5x6x1xf32, #tpu.memory_space<vmem>>, vector<1x6x1xf32>
    %481 = vector.shape_cast %480 : vector<1x6x1xf32> to vector<6x1xf32>
    %482 = vector.shape_cast %476 : vector<6x1xf32> to vector<1x6x1xf32>
    tpu.vector_store %arg39[%c2_248, %c0_249, %c0_250], %482 {strides = array<i32>} : memref<5x6x1xf32, #tpu.memory_space<vmem>>, vector<1x6x1xf32>,
    %c2_251 = arith.constant 2 : index
    %483 = memref.load %arg30[%c2_251] : memref<4xf32, #tpu.memory_space<smem>>
    %c2_252 = arith.constant 2 : index
    %484 = memref.load %arg31[%c2_252] : memref<4xf32, #tpu.memory_space<smem>>
    %cst_253 = arith.constant dense<0.000000e+00> : vector<6x40xf32>
    %485 = tpu.matmul %473, %333, %cst_253 {dimension_numbers = #tpu.dot_dimension_numbers<[1], [0], [0], [1], [0, 0, 1, 1], [], []>} : vector<6x10xf32>, vector<10x40xf32>, vector<6x40xf32> -> vector<6x40xf32>
    %486 = vector.extract_strided_slice %332 {offsets = [2, 0], sizes = [1, 40], strides = [1, 1]} : vector<4x40xf32> to vector<1x40xf32>
    %487 = vector.broadcast %365 : vector<6x1xf32> to vector<6x40xf32>
    %488 = vector.broadcast %486 : vector<1x40xf32> to vector<6x40xf32>
    %489 = arith.mulf %487, %488 : vector<6x40xf32>
    %490 = arith.addf %485, %489 : vector<6x40xf32>
    %491 = arith.addf %490, %337 : vector<6x40xf32>
    %cst_254 = arith.constant 0.000000e+00 : f32
    %492 = vector.broadcast %cst_254 : f32 to vector<6x40xf32>
    %493 = arith.maximumf %491, %492 : vector<6x40xf32>
    %cst_255 = arith.constant dense<0.000000e+00> : vector<6x40xf32>
    %494 = tpu.matmul %493, %339, %cst_255 {dimension_numbers = #tpu.dot_dimension_numbers<[1], [0], [0], [1], [0, 0, 1, 1], [], []>} : vector<6x40xf32>, vector<40x40xf32>, vector<6x40xf32> -> vector<6x40xf32>
    %495 = arith.addf %494, %349 : vector<6x40xf32>
    %496 = math.tanh %495 : vector<6x40xf32>
    %cst_256 = arith.constant dense<0.000000e+00> : vector<6x40xf32>
    %497 = tpu.matmul %496, %341, %cst_256 {dimension_numbers = #tpu.dot_dimension_numbers<[1], [0], [0], [1], [0, 0, 1, 1], [], []>} : vector<6x40xf32>, vector<40x40xf32>, vector<6x40xf32> -> vector<6x40xf32>
    %498 = arith.addf %497, %353 : vector<6x40xf32>
    %499 = math.tanh %498 : vector<6x40xf32>
    %cst_257 = arith.constant dense<0.000000e+00> : vector<6x40xf32>
    %500 = tpu.matmul %499, %343, %cst_257 {dimension_numbers = #tpu.dot_dimension_numbers<[1], [0], [0], [1], [0, 0, 1, 1], [], []>} : vector<6x40xf32>, vector<40x40xf32>, vector<6x40xf32> -> vector<6x40xf32>
    %501 = arith.addf %500, %357 : vector<6x40xf32>
    %502 = math.tanh %501 : vector<6x40xf32>
    %cst_258 = arith.constant dense<0.000000e+00> : vector<6x40xf32>
    %503 = tpu.matmul %502, %345, %cst_258 {dimension_numbers = #tpu.dot_dimension_numbers<[1], [0], [0], [1], [0, 0, 1, 1], [], []>} : vector<6x40xf32>, vector<40x40xf32>, vector<6x40xf32> -> vector<6x40xf32>
    %504 = arith.addf %503, %361 : vector<6x40xf32>
    %505 = math.tanh %504 : vector<6x40xf32>
    %cst_259 = arith.constant dense<0.000000e+00> : vector<6x10xf32>
    %506 = tpu.matmul %505, %334, %cst_259 {dimension_numbers = #tpu.dot_dimension_numbers<[1], [0], [0], [1], [0, 0, 1, 1], [], []>} : vector<6x40xf32>, vector<40x10xf32>, vector<6x10xf32> -> vector<6x10xf32>
    %507 = arith.addf %506, %364 : vector<6x10xf32>
    %cst_260 = arith.constant 5.000000e-01 : f32
    %508 = vector.broadcast %cst_260 : f32 to vector<6x10xf32>
    %509 = arith.subf %508, %473 : vector<6x10xf32>
    %cst_261 = arith.constant 1.000000e+00 : f32
    %510 = vector.broadcast %cst_261 : f32 to vector<6x10xf32>
    %511 = arith.mulf %510, %509 : vector<6x10xf32>
    %512 = arith.subf %507, %511 : vector<6x10xf32>
    %513 = arith.subf %512, %511 : vector<6x10xf32>
    %cst_262 = arith.constant 1.000000e+01 : f32
    %514 = vector.broadcast %cst_262 : f32 to vector<6x10xf32>
    %515 = arith.mulf %513, %514 : vector<6x10xf32>
    %516 = arith.mulf %515, %515 : vector<6x10xf32>
    %cst_263 = arith.constant dense<0.000000e+00> : vector<6xf32>
    %517 = vector.multi_reduction <add>, %516, %cst_263 [1] : vector<6x10xf32> to vector<6xf32>
    %518 = vector.shape_cast %517 : vector<6xf32> to vector<6x1xf32>
    %cst_264 = arith.constant 5.000000e-01 : f32
    %519 = vector.broadcast %cst_264 : f32 to vector<6x1xf32>
    %520 = arith.mulf %519, %518 : vector<6x1xf32>
    %521 = vector.broadcast %483 : f32 to vector<6x10xf32>
    %522 = arith.mulf %512, %521 : vector<6x10xf32>
    %523 = arith.addf %473, %522 : vector<6x10xf32>
    %c2_265 = arith.constant 2 : index
    %c0_266 = arith.constant 0 : index
    %c0_267 = arith.constant 0 : index
    %524 = vector.load %arg29[%c2_265, %c0_266, %c0_267] : memref<4x6x10xf32, #tpu.memory_space<vmem>>, vector<1x6x10xf32>
    %525 = vector.shape_cast %524 : vector<1x6x10xf32> to vector<6x10xf32>
    %526 = vector.broadcast %484 : f32 to vector<6x10xf32>
    %527 = arith.mulf %526, %525 : vector<6x10xf32>
    %528 = arith.addf %523, %527 : vector<6x10xf32>
    %529 = vector.broadcast %483 : f32 to vector<6x1xf32>
    %530 = arith.mulf %520, %529 : vector<6x1xf32>
    %531 = arith.addf %476, %530 : vector<6x1xf32>
    %c3_268 = arith.constant 3 : index
    %c0_269 = arith.constant 0 : index
    %c0_270 = arith.constant 0 : index
    %532 = vector.load %arg38[%c3_268, %c0_269, %c0_270] : memref<5x6x10xf32, #tpu.memory_space<vmem>>, vector<1x6x10xf32>
    %533 = vector.shape_cast %532 : vector<1x6x10xf32> to vector<6x10xf32>
    %534 = vector.shape_cast %528 : vector<6x10xf32> to vector<1x6x10xf32>
    tpu.vector_store %arg38[%c3_268, %c0_269, %c0_270], %534 {strides = array<i32>} : memref<5x6x10xf32, #tpu.memory_space<vmem>>, vector<1x6x10xf32>,
    %c3_271 = arith.constant 3 : index
    %c0_272 = arith.constant 0 : index
    %c0_273 = arith.constant 0 : index
    %535 = vector.load %arg39[%c3_271, %c0_272, %c0_273] : memref<5x6x1xf32, #tpu.memory_space<vmem>>, vector<1x6x1xf32>
    %536 = vector.shape_cast %535 : vector<1x6x1xf32> to vector<6x1xf32>
    %537 = vector.shape_cast %531 : vector<6x1xf32> to vector<1x6x1xf32>
    tpu.vector_store %arg39[%c3_271, %c0_272, %c0_273], %537 {strides = array<i32>} : memref<5x6x1xf32, #tpu.memory_space<vmem>>, vector<1x6x1xf32>,
    %c3_274 = arith.constant 3 : index
    %538 = memref.load %arg30[%c3_274] : memref<4xf32, #tpu.memory_space<smem>>
    %c3_275 = arith.constant 3 : index
    %539 = memref.load %arg31[%c3_275] : memref<4xf32, #tpu.memory_space<smem>>
    %cst_276 = arith.constant dense<0.000000e+00> : vector<6x40xf32>
    %540 = tpu.matmul %528, %333, %cst_276 {dimension_numbers = #tpu.dot_dimension_numbers<[1], [0], [0], [1], [0, 0, 1, 1], [], []>} : vector<6x10xf32>, vector<10x40xf32>, vector<6x40xf32> -> vector<6x40xf32>
    %541 = vector.extract_strided_slice %332 {offsets = [3, 0], sizes = [1, 40], strides = [1, 1]} : vector<4x40xf32> to vector<1x40xf32>
    %542 = vector.broadcast %365 : vector<6x1xf32> to vector<6x40xf32>
    %543 = vector.broadcast %541 : vector<1x40xf32> to vector<6x40xf32>
    %544 = arith.mulf %542, %543 : vector<6x40xf32>
    %545 = arith.addf %540, %544 : vector<6x40xf32>
    %546 = arith.addf %545, %337 : vector<6x40xf32>
    %cst_277 = arith.constant 0.000000e+00 : f32
    %547 = vector.broadcast %cst_277 : f32 to vector<6x40xf32>
    %548 = arith.maximumf %546, %547 : vector<6x40xf32>
    %cst_278 = arith.constant dense<0.000000e+00> : vector<6x40xf32>
    %549 = tpu.matmul %548, %339, %cst_278 {dimension_numbers = #tpu.dot_dimension_numbers<[1], [0], [0], [1], [0, 0, 1, 1], [], []>} : vector<6x40xf32>, vector<40x40xf32>, vector<6x40xf32> -> vector<6x40xf32>
    %550 = arith.addf %549, %349 : vector<6x40xf32>
    %551 = math.tanh %550 : vector<6x40xf32>
    %cst_279 = arith.constant dense<0.000000e+00> : vector<6x40xf32>
    %552 = tpu.matmul %551, %341, %cst_279 {dimension_numbers = #tpu.dot_dimension_numbers<[1], [0], [0], [1], [0, 0, 1, 1], [], []>} : vector<6x40xf32>, vector<40x40xf32>, vector<6x40xf32> -> vector<6x40xf32>
    %553 = arith.addf %552, %353 : vector<6x40xf32>
    %554 = math.tanh %553 : vector<6x40xf32>
    %cst_280 = arith.constant dense<0.000000e+00> : vector<6x40xf32>
    %555 = tpu.matmul %554, %343, %cst_280 {dimension_numbers = #tpu.dot_dimension_numbers<[1], [0], [0], [1], [0, 0, 1, 1], [], []>} : vector<6x40xf32>, vector<40x40xf32>, vector<6x40xf32> -> vector<6x40xf32>
    %556 = arith.addf %555, %357 : vector<6x40xf32>
    %557 = math.tanh %556 : vector<6x40xf32>
    %cst_281 = arith.constant dense<0.000000e+00> : vector<6x40xf32>
    %558 = tpu.matmul %557, %345, %cst_281 {dimension_numbers = #tpu.dot_dimension_numbers<[1], [0], [0], [1], [0, 0, 1, 1], [], []>} : vector<6x40xf32>, vector<40x40xf32>, vector<6x40xf32> -> vector<6x40xf32>
    %559 = arith.addf %558, %361 : vector<6x40xf32>
    %560 = math.tanh %559 : vector<6x40xf32>
    %cst_282 = arith.constant dense<0.000000e+00> : vector<6x10xf32>
    %561 = tpu.matmul %560, %334, %cst_282 {dimension_numbers = #tpu.dot_dimension_numbers<[1], [0], [0], [1], [0, 0, 1, 1], [], []>} : vector<6x40xf32>, vector<40x10xf32>, vector<6x10xf32> -> vector<6x10xf32>
    %562 = arith.addf %561, %364 : vector<6x10xf32>
    %cst_283 = arith.constant 5.000000e-01 : f32
    %563 = vector.broadcast %cst_283 : f32 to vector<6x10xf32>
    %564 = arith.subf %563, %528 : vector<6x10xf32>
    %cst_284 = arith.constant 1.000000e+00 : f32
    %565 = vector.broadcast %cst_284 : f32 to vector<6x10xf32>
    %566 = arith.mulf %565, %564 : vector<6x10xf32>
    %567 = arith.subf %562, %566 : vector<6x10xf32>
    %568 = arith.subf %567, %566 : vector<6x10xf32>
    %cst_285 = arith.constant 1.000000e+01 : f32
    %569 = vector.broadcast %cst_285 : f32 to vector<6x10xf32>
    %570 = arith.mulf %568, %569 : vector<6x10xf32>
    %571 = arith.mulf %570, %570 : vector<6x10xf32>
    %cst_286 = arith.constant dense<0.000000e+00> : vector<6xf32>
    %572 = vector.multi_reduction <add>, %571, %cst_286 [1] : vector<6x10xf32> to vector<6xf32>
    %573 = vector.shape_cast %572 : vector<6xf32> to vector<6x1xf32>
    %cst_287 = arith.constant 5.000000e-01 : f32
    %574 = vector.broadcast %cst_287 : f32 to vector<6x1xf32>
    %575 = arith.mulf %574, %573 : vector<6x1xf32>
    %576 = vector.broadcast %538 : f32 to vector<6x10xf32>
    %577 = arith.mulf %567, %576 : vector<6x10xf32>
    %578 = arith.addf %528, %577 : vector<6x10xf32>
    %c3_288 = arith.constant 3 : index
    %c0_289 = arith.constant 0 : index
    %c0_290 = arith.constant 0 : index
    %579 = vector.load %arg29[%c3_288, %c0_289, %c0_290] : memref<4x6x10xf32, #tpu.memory_space<vmem>>, vector<1x6x10xf32>
    %580 = vector.shape_cast %579 : vector<1x6x10xf32> to vector<6x10xf32>
    %581 = vector.broadcast %539 : f32 to vector<6x10xf32>
    %582 = arith.mulf %581, %580 : vector<6x10xf32>
    %583 = arith.addf %578, %582 : vector<6x10xf32>
    %584 = vector.broadcast %538 : f32 to vector<6x1xf32>
    %585 = arith.mulf %575, %584 : vector<6x1xf32>
    %586 = arith.addf %531, %585 : vector<6x1xf32>
    %c4_291 = arith.constant 4 : index
    %c0_292 = arith.constant 0 : index
    %c0_293 = arith.constant 0 : index
    %587 = vector.load %arg38[%c4_291, %c0_292, %c0_293] : memref<5x6x10xf32, #tpu.memory_space<vmem>>, vector<1x6x10xf32>
    %588 = vector.shape_cast %587 : vector<1x6x10xf32> to vector<6x10xf32>
    %589 = vector.shape_cast %583 : vector<6x10xf32> to vector<1x6x10xf32>
    tpu.vector_store %arg38[%c4_291, %c0_292, %c0_293], %589 {strides = array<i32>} : memref<5x6x10xf32, #tpu.memory_space<vmem>>, vector<1x6x10xf32>,
    %c4_294 = arith.constant 4 : index
    %c0_295 = arith.constant 0 : index
    %c0_296 = arith.constant 0 : index
    %590 = vector.load %arg39[%c4_294, %c0_295, %c0_296] : memref<5x6x1xf32, #tpu.memory_space<vmem>>, vector<1x6x1xf32>
    %591 = vector.shape_cast %590 : vector<1x6x1xf32> to vector<6x1xf32>
    %592 = vector.shape_cast %586 : vector<6x1xf32> to vector<1x6x1xf32>
    tpu.vector_store %arg39[%c4_294, %c0_295, %c0_296], %592 {strides = array<i32>} : memref<5x6x1xf32, #tpu.memory_space<vmem>>, vector<1x6x1xf32>,
    %c0_297 = arith.constant 0 : index
    %c0_298 = arith.constant 0 : index
    %c0_299 = arith.constant 0 : index
    %593 = vector.load %arg32[%c0_297, %c0_298, %c0_299] : memref<15x10x10xf32, #tpu.memory_space<vmem>>, vector<1x10x10xf32>
    %594 = vector.shape_cast %593 : vector<1x10x10xf32> to vector<10x10xf32>
    %c1_300 = arith.constant 1 : index
    %c0_301 = arith.constant 0 : index
    %c0_302 = arith.constant 0 : index
    %595 = vector.load %arg32[%c1_300, %c0_301, %c0_302] : memref<15x10x10xf32, #tpu.memory_space<vmem>>, vector<1x10x10xf32>
    %596 = vector.shape_cast %595 : vector<1x10x10xf32> to vector<10x10xf32>
    %c2_303 = arith.constant 2 : index
    %c0_304 = arith.constant 0 : index
    %c0_305 = arith.constant 0 : index
    %597 = vector.load %arg32[%c2_303, %c0_304, %c0_305] : memref<15x10x10xf32, #tpu.memory_space<vmem>>, vector<1x10x10xf32>
    %598 = vector.shape_cast %597 : vector<1x10x10xf32> to vector<10x10xf32>
    %c3_306 = arith.constant 3 : index
    %c0_307 = arith.constant 0 : index
    %c0_308 = arith.constant 0 : index
    %599 = vector.load %arg32[%c3_306, %c0_307, %c0_308] : memref<15x10x10xf32, #tpu.memory_space<vmem>>, vector<1x10x10xf32>
    %600 = vector.shape_cast %599 : vector<1x10x10xf32> to vector<10x10xf32>
    %c4_309 = arith.constant 4 : index
    %c0_310 = arith.constant 0 : index
    %c0_311 = arith.constant 0 : index
    %601 = vector.load %arg32[%c4_309, %c0_310, %c0_311] : memref<15x10x10xf32, #tpu.memory_space<vmem>>, vector<1x10x10xf32>
    %602 = vector.shape_cast %601 : vector<1x10x10xf32> to vector<10x10xf32>
    %c5_312 = arith.constant 5 : index
    %c0_313 = arith.constant 0 : index
    %c0_314 = arith.constant 0 : index
    %603 = vector.load %arg32[%c5_312, %c0_313, %c0_314] : memref<15x10x10xf32, #tpu.memory_space<vmem>>, vector<1x10x10xf32>
    %604 = vector.shape_cast %603 : vector<1x10x10xf32> to vector<10x10xf32>
    %c6_315 = arith.constant 6 : index
    %c0_316 = arith.constant 0 : index
    %c0_317 = arith.constant 0 : index
    %605 = vector.load %arg32[%c6_315, %c0_316, %c0_317] : memref<15x10x10xf32, #tpu.memory_space<vmem>>, vector<1x10x10xf32>
    %606 = vector.shape_cast %605 : vector<1x10x10xf32> to vector<10x10xf32>
    %c7_318 = arith.constant 7 : index
    %c0_319 = arith.constant 0 : index
    %c0_320 = arith.constant 0 : index
    %607 = vector.load %arg32[%c7_318, %c0_319, %c0_320] : memref<15x10x10xf32, #tpu.memory_space<vmem>>, vector<1x10x10xf32>
    %608 = vector.shape_cast %607 : vector<1x10x10xf32> to vector<10x10xf32>
    %c8 = arith.constant 8 : index
    %c0_321 = arith.constant 0 : index
    %c0_322 = arith.constant 0 : index
    %609 = vector.load %arg32[%c8, %c0_321, %c0_322] : memref<15x10x10xf32, #tpu.memory_space<vmem>>, vector<1x10x10xf32>
    %610 = vector.shape_cast %609 : vector<1x10x10xf32> to vector<10x10xf32>
    %c9 = arith.constant 9 : index
    %c0_323 = arith.constant 0 : index
    %c0_324 = arith.constant 0 : index
    %611 = vector.load %arg32[%c9, %c0_323, %c0_324] : memref<15x10x10xf32, #tpu.memory_space<vmem>>, vector<1x10x10xf32>
    %612 = vector.shape_cast %611 : vector<1x10x10xf32> to vector<10x10xf32>
    %c10 = arith.constant 10 : index
    %c0_325 = arith.constant 0 : index
    %c0_326 = arith.constant 0 : index
    %613 = vector.load %arg32[%c10, %c0_325, %c0_326] : memref<15x10x10xf32, #tpu.memory_space<vmem>>, vector<1x10x10xf32>
    %614 = vector.shape_cast %613 : vector<1x10x10xf32> to vector<10x10xf32>
    %c11 = arith.constant 11 : index
    %c0_327 = arith.constant 0 : index
    %c0_328 = arith.constant 0 : index
    %615 = vector.load %arg32[%c11, %c0_327, %c0_328] : memref<15x10x10xf32, #tpu.memory_space<vmem>>, vector<1x10x10xf32>
    %616 = vector.shape_cast %615 : vector<1x10x10xf32> to vector<10x10xf32>
    %c12 = arith.constant 12 : index
    %c0_329 = arith.constant 0 : index
    %c0_330 = arith.constant 0 : index
    %617 = vector.load %arg32[%c12, %c0_329, %c0_330] : memref<15x10x10xf32, #tpu.memory_space<vmem>>, vector<1x10x10xf32>
    %618 = vector.shape_cast %617 : vector<1x10x10xf32> to vector<10x10xf32>
    %c13 = arith.constant 13 : index
    %c0_331 = arith.constant 0 : index
    %c0_332 = arith.constant 0 : index
    %619 = vector.load %arg32[%c13, %c0_331, %c0_332] : memref<15x10x10xf32, #tpu.memory_space<vmem>>, vector<1x10x10xf32>
    %620 = vector.shape_cast %619 : vector<1x10x10xf32> to vector<10x10xf32>
    %c14 = arith.constant 14 : index
    %c0_333 = arith.constant 0 : index
    %c0_334 = arith.constant 0 : index
    %621 = vector.load %arg32[%c14, %c0_333, %c0_334] : memref<15x10x10xf32, #tpu.memory_space<vmem>>, vector<1x10x10xf32>
    %622 = vector.shape_cast %621 : vector<1x10x10xf32> to vector<10x10xf32>
    %c0_335 = arith.constant 0 : index
    %c0_336 = arith.constant 0 : index
    %623 = vector.load %arg34[%c0_335, %c0_336] : memref<10x10xf32, #tpu.memory_space<vmem>>, vector<10x10xf32>
    %c0_337 = arith.constant 0 : index
    %c0_338 = arith.constant 0 : index
    %624 = vector.load %arg36[%c0_337, %c0_338] : memref<10x30xf32, #tpu.memory_space<vmem>>, vector<10x30xf32>
    %c0_339 = arith.constant 0 : index
    %c0_340 = arith.constant 0 : index
    %625 = vector.load %arg33[%c0_339, %c0_340] : memref<1x10xf32, #tpu.memory_space<vmem>>, vector<1x10xf32>
    %c0_341 = arith.constant 0 : index
    %c0_342 = arith.constant 0 : index
    %626 = vector.load %arg35[%c0_341, %c0_342] : memref<1x10xf32, #tpu.memory_space<vmem>>, vector<1x10xf32>
    %c0_343 = arith.constant 0 : index
    %c0_344 = arith.constant 0 : index
    %627 = vector.load %arg37[%c0_343, %c0_344] : memref<1x30xf32, #tpu.memory_space<vmem>>, vector<1x30xf32>
    %cst_345 = arith.constant 0.000000e+00 : f32
    %628 = vector.broadcast %cst_345 : f32 to vector<1x10xf32>
    %629 = vector.extract_strided_slice %281 {offsets = [0, 0], sizes = [1, 10], strides = [1, 1]} : vector<6x10xf32> to vector<1x10xf32>
    %cst_346 = arith.constant dense<0.000000e+00> : vector<1x10xf32>
    %630 = tpu.matmul %629, %594, %cst_346 {dimension_numbers = #tpu.dot_dimension_numbers<[1], [0], [0], [1], [0, 0, 1, 1], [], []>} : vector<1x10xf32>, vector<10x10xf32>, vector<1x10xf32> -> vector<1x10xf32>
    %631 = arith.addf %628, %630 : vector<1x10xf32>
    %632 = vector.extract_strided_slice %281 {offsets = [1, 0], sizes = [1, 10], strides = [1, 1]} : vector<6x10xf32> to vector<1x10xf32>
    %cst_347 = arith.constant dense<0.000000e+00> : vector<1x10xf32>
    %633 = tpu.matmul %632, %596, %cst_347 {dimension_numbers = #tpu.dot_dimension_numbers<[1], [0], [0], [1], [0, 0, 1, 1], [], []>} : vector<1x10xf32>, vector<10x10xf32>, vector<1x10xf32> -> vector<1x10xf32>
    %634 = arith.addf %631, %633 : vector<1x10xf32>
    %635 = vector.extract_strided_slice %281 {offsets = [2, 0], sizes = [1, 10], strides = [1, 1]} : vector<6x10xf32> to vector<1x10xf32>
    %cst_348 = arith.constant dense<0.000000e+00> : vector<1x10xf32>
    %636 = tpu.matmul %635, %598, %cst_348 {dimension_numbers = #tpu.dot_dimension_numbers<[1], [0], [0], [1], [0, 0, 1, 1], [], []>} : vector<1x10xf32>, vector<10x10xf32>, vector<1x10xf32> -> vector<1x10xf32>
    %637 = arith.addf %634, %636 : vector<1x10xf32>
    %638 = vector.extract_strided_slice %281 {offsets = [3, 0], sizes = [1, 10], strides = [1, 1]} : vector<6x10xf32> to vector<1x10xf32>
    %cst_349 = arith.constant dense<0.000000e+00> : vector<1x10xf32>
    %639 = tpu.matmul %638, %600, %cst_349 {dimension_numbers = #tpu.dot_dimension_numbers<[1], [0], [0], [1], [0, 0, 1, 1], [], []>} : vector<1x10xf32>, vector<10x10xf32>, vector<1x10xf32> -> vector<1x10xf32>
    %640 = arith.addf %637, %639 : vector<1x10xf32>
    %641 = vector.extract_strided_slice %281 {offsets = [4, 0], sizes = [1, 10], strides = [1, 1]} : vector<6x10xf32> to vector<1x10xf32>
    %cst_350 = arith.constant dense<0.000000e+00> : vector<1x10xf32>
    %642 = tpu.matmul %641, %602, %cst_350 {dimension_numbers = #tpu.dot_dimension_numbers<[1], [0], [0], [1], [0, 0, 1, 1], [], []>} : vector<1x10xf32>, vector<10x10xf32>, vector<1x10xf32> -> vector<1x10xf32>
    %643 = arith.addf %640, %642 : vector<1x10xf32>
    %644 = vector.extract_strided_slice %281 {offsets = [5, 0], sizes = [1, 10], strides = [1, 1]} : vector<6x10xf32> to vector<1x10xf32>
    %cst_351 = arith.constant dense<0.000000e+00> : vector<1x10xf32>
    %645 = tpu.matmul %644, %604, %cst_351 {dimension_numbers = #tpu.dot_dimension_numbers<[1], [0], [0], [1], [0, 0, 1, 1], [], []>} : vector<1x10xf32>, vector<10x10xf32>, vector<1x10xf32> -> vector<1x10xf32>
    %646 = arith.addf %643, %645 : vector<1x10xf32>
    %647 = vector.extract_strided_slice %418 {offsets = [0, 0], sizes = [1, 10], strides = [1, 1]} : vector<6x10xf32> to vector<1x10xf32>
    %cst_352 = arith.constant dense<0.000000e+00> : vector<1x10xf32>
    %648 = tpu.matmul %647, %606, %cst_352 {dimension_numbers = #tpu.dot_dimension_numbers<[1], [0], [0], [1], [0, 0, 1, 1], [], []>} : vector<1x10xf32>, vector<10x10xf32>, vector<1x10xf32> -> vector<1x10xf32>
    %649 = arith.addf %646, %648 : vector<1x10xf32>
    %650 = vector.extract_strided_slice %418 {offsets = [1, 0], sizes = [1, 10], strides = [1, 1]} : vector<6x10xf32> to vector<1x10xf32>
    %cst_353 = arith.constant dense<0.000000e+00> : vector<1x10xf32>
    %651 = tpu.matmul %650, %608, %cst_353 {dimension_numbers = #tpu.dot_dimension_numbers<[1], [0], [0], [1], [0, 0, 1, 1], [], []>} : vector<1x10xf32>, vector<10x10xf32>, vector<1x10xf32> -> vector<1x10xf32>
    %652 = arith.addf %649, %651 : vector<1x10xf32>
    %653 = vector.extract_strided_slice %418 {offsets = [2, 0], sizes = [1, 10], strides = [1, 1]} : vector<6x10xf32> to vector<1x10xf32>
    %cst_354 = arith.constant dense<0.000000e+00> : vector<1x10xf32>
    %654 = tpu.matmul %653, %610, %cst_354 {dimension_numbers = #tpu.dot_dimension_numbers<[1], [0], [0], [1], [0, 0, 1, 1], [], []>} : vector<1x10xf32>, vector<10x10xf32>, vector<1x10xf32> -> vector<1x10xf32>
    %655 = arith.addf %652, %654 : vector<1x10xf32>
    %656 = vector.extract_strided_slice %418 {offsets = [3, 0], sizes = [1, 10], strides = [1, 1]} : vector<6x10xf32> to vector<1x10xf32>
    %cst_355 = arith.constant dense<0.000000e+00> : vector<1x10xf32>
    %657 = tpu.matmul %656, %612, %cst_355 {dimension_numbers = #tpu.dot_dimension_numbers<[1], [0], [0], [1], [0, 0, 1, 1], [], []>} : vector<1x10xf32>, vector<10x10xf32>, vector<1x10xf32> -> vector<1x10xf32>
    %658 = arith.addf %655, %657 : vector<1x10xf32>
    %659 = vector.extract_strided_slice %418 {offsets = [4, 0], sizes = [1, 10], strides = [1, 1]} : vector<6x10xf32> to vector<1x10xf32>
    %cst_356 = arith.constant dense<0.000000e+00> : vector<1x10xf32>
    %660 = tpu.matmul %659, %614, %cst_356 {dimension_numbers = #tpu.dot_dimension_numbers<[1], [0], [0], [1], [0, 0, 1, 1], [], []>} : vector<1x10xf32>, vector<10x10xf32>, vector<1x10xf32> -> vector<1x10xf32>
    %661 = arith.addf %658, %660 : vector<1x10xf32>
    %662 = vector.extract_strided_slice %418 {offsets = [5, 0], sizes = [1, 10], strides = [1, 1]} : vector<6x10xf32> to vector<1x10xf32>
    %cst_357 = arith.constant dense<0.000000e+00> : vector<1x10xf32>
    %663 = tpu.matmul %662, %616, %cst_357 {dimension_numbers = #tpu.dot_dimension_numbers<[1], [0], [0], [1], [0, 0, 1, 1], [], []>} : vector<1x10xf32>, vector<10x10xf32>, vector<1x10xf32> -> vector<1x10xf32>
    %664 = arith.addf %661, %663 : vector<1x10xf32>
    %665 = vector.extract_strided_slice %473 {offsets = [0, 0], sizes = [1, 10], strides = [1, 1]} : vector<6x10xf32> to vector<1x10xf32>
    %cst_358 = arith.constant dense<0.000000e+00> : vector<1x10xf32>
    %666 = tpu.matmul %665, %618, %cst_358 {dimension_numbers = #tpu.dot_dimension_numbers<[1], [0], [0], [1], [0, 0, 1, 1], [], []>} : vector<1x10xf32>, vector<10x10xf32>, vector<1x10xf32> -> vector<1x10xf32>
    %667 = arith.addf %664, %666 : vector<1x10xf32>
    %668 = vector.extract_strided_slice %473 {offsets = [1, 0], sizes = [1, 10], strides = [1, 1]} : vector<6x10xf32> to vector<1x10xf32>
    %cst_359 = arith.constant dense<0.000000e+00> : vector<1x10xf32>
    %669 = tpu.matmul %668, %620, %cst_359 {dimension_numbers = #tpu.dot_dimension_numbers<[1], [0], [0], [1], [0, 0, 1, 1], [], []>} : vector<1x10xf32>, vector<10x10xf32>, vector<1x10xf32> -> vector<1x10xf32>
    %670 = arith.addf %667, %669 : vector<1x10xf32>
    %671 = vector.extract_strided_slice %473 {offsets = [2, 0], sizes = [1, 10], strides = [1, 1]} : vector<6x10xf32> to vector<1x10xf32>
    %cst_360 = arith.constant dense<0.000000e+00> : vector<1x10xf32>
    %672 = tpu.matmul %671, %622, %cst_360 {dimension_numbers = #tpu.dot_dimension_numbers<[1], [0], [0], [1], [0, 0, 1, 1], [], []>} : vector<1x10xf32>, vector<10x10xf32>, vector<1x10xf32> -> vector<1x10xf32>
    %673 = arith.addf %670, %672 : vector<1x10xf32>
    %674 = arith.addf %673, %625 : vector<1x10xf32>
    %cst_361 = arith.constant 0.000000e+00 : f32
    %675 = vector.broadcast %cst_361 : f32 to vector<1x10xf32>
    %676 = arith.maximumf %674, %675 : vector<1x10xf32>
    %cst_362 = arith.constant dense<0.000000e+00> : vector<1x10xf32>
    %677 = tpu.matmul %676, %623, %cst_362 {dimension_numbers = #tpu.dot_dimension_numbers<[1], [0], [0], [1], [0, 0, 1, 1], [], []>} : vector<1x10xf32>, vector<10x10xf32>, vector<1x10xf32> -> vector<1x10xf32>
    %678 = arith.addf %677, %626 : vector<1x10xf32>
    %cst_363 = arith.constant 0.000000e+00 : f32
    %679 = vector.broadcast %cst_363 : f32 to vector<1x10xf32>
    %680 = arith.maximumf %678, %679 : vector<1x10xf32>
    %cst_364 = arith.constant dense<0.000000e+00> : vector<1x30xf32>
    %681 = tpu.matmul %680, %624, %cst_364 {dimension_numbers = #tpu.dot_dimension_numbers<[1], [0], [0], [1], [0, 0, 1, 1], [], []>} : vector<1x10xf32>, vector<10x30xf32>, vector<1x30xf32> -> vector<1x30xf32>
    %682 = arith.addf %681, %627 : vector<1x30xf32>
    %c0_365 = arith.constant 0 : index
    %c0_366 = arith.constant 0 : index
    %683 = vector.load %arg40[%c0_365, %c0_366] : memref<2x30xf32, #tpu.memory_space<vmem>>, vector<1x30xf32>
    tpu.vector_store %arg40[%c0_365, %c0_366], %682 {strides = array<i32>} : memref<2x30xf32, #tpu.memory_space<vmem>>, vector<1x30xf32>,
    %cst_367 = arith.constant 0.000000e+00 : f32
    %684 = vector.broadcast %cst_367 : f32 to vector<1x10xf32>
    %685 = vector.extract_strided_slice %473 {offsets = [3, 0], sizes = [1, 10], strides = [1, 1]} : vector<6x10xf32> to vector<1x10xf32>
    %cst_368 = arith.constant dense<0.000000e+00> : vector<1x10xf32>
    %686 = tpu.matmul %685, %594, %cst_368 {dimension_numbers = #tpu.dot_dimension_numbers<[1], [0], [0], [1], [0, 0, 1, 1], [], []>} : vector<1x10xf32>, vector<10x10xf32>, vector<1x10xf32> -> vector<1x10xf32>
    %687 = arith.addf %684, %686 : vector<1x10xf32>
    %688 = vector.extract_strided_slice %473 {offsets = [4, 0], sizes = [1, 10], strides = [1, 1]} : vector<6x10xf32> to vector<1x10xf32>
    %cst_369 = arith.constant dense<0.000000e+00> : vector<1x10xf32>
    %689 = tpu.matmul %688, %596, %cst_369 {dimension_numbers = #tpu.dot_dimension_numbers<[1], [0], [0], [1], [0, 0, 1, 1], [], []>} : vector<1x10xf32>, vector<10x10xf32>, vector<1x10xf32> -> vector<1x10xf32>
    %690 = arith.addf %687, %689 : vector<1x10xf32>
    %691 = vector.extract_strided_slice %473 {offsets = [5, 0], sizes = [1, 10], strides = [1, 1]} : vector<6x10xf32> to vector<1x10xf32>
    %cst_370 = arith.constant dense<0.000000e+00> : vector<1x10xf32>
    %692 = tpu.matmul %691, %598, %cst_370 {dimension_numbers = #tpu.dot_dimension_numbers<[1], [0], [0], [1], [0, 0, 1, 1], [], []>} : vector<1x10xf32>, vector<10x10xf32>, vector<1x10xf32> -> vector<1x10xf32>
    %693 = arith.addf %690, %692 : vector<1x10xf32>
    %694 = vector.extract_strided_slice %528 {offsets = [0, 0], sizes = [1, 10], strides = [1, 1]} : vector<6x10xf32> to vector<1x10xf32>
    %cst_371 = arith.constant dense<0.000000e+00> : vector<1x10xf32>
    %695 = tpu.matmul %694, %600, %cst_371 {dimension_numbers = #tpu.dot_dimension_numbers<[1], [0], [0], [1], [0, 0, 1, 1], [], []>} : vector<1x10xf32>, vector<10x10xf32>, vector<1x10xf32> -> vector<1x10xf32>
    %696 = arith.addf %693, %695 : vector<1x10xf32>
    %697 = vector.extract_strided_slice %528 {offsets = [1, 0], sizes = [1, 10], strides = [1, 1]} : vector<6x10xf32> to vector<1x10xf32>
    %cst_372 = arith.constant dense<0.000000e+00> : vector<1x10xf32>
    %698 = tpu.matmul %697, %602, %cst_372 {dimension_numbers = #tpu.dot_dimension_numbers<[1], [0], [0], [1], [0, 0, 1, 1], [], []>} : vector<1x10xf32>, vector<10x10xf32>, vector<1x10xf32> -> vector<1x10xf32>
    %699 = arith.addf %696, %698 : vector<1x10xf32>
    %700 = vector.extract_strided_slice %528 {offsets = [2, 0], sizes = [1, 10], strides = [1, 1]} : vector<6x10xf32> to vector<1x10xf32>
    %cst_373 = arith.constant dense<0.000000e+00> : vector<1x10xf32>
    %701 = tpu.matmul %700, %604, %cst_373 {dimension_numbers = #tpu.dot_dimension_numbers<[1], [0], [0], [1], [0, 0, 1, 1], [], []>} : vector<1x10xf32>, vector<10x10xf32>, vector<1x10xf32> -> vector<1x10xf32>
    %702 = arith.addf %699, %701 : vector<1x10xf32>
    %703 = vector.extract_strided_slice %528 {offsets = [3, 0], sizes = [1, 10], strides = [1, 1]} : vector<6x10xf32> to vector<1x10xf32>
    %cst_374 = arith.constant dense<0.000000e+00> : vector<1x10xf32>
    %704 = tpu.matmul %703, %606, %cst_374 {dimension_numbers = #tpu.dot_dimension_numbers<[1], [0], [0], [1], [0, 0, 1, 1], [], []>} : vector<1x10xf32>, vector<10x10xf32>, vector<1x10xf32> -> vector<1x10xf32>
    %705 = arith.addf %702, %704 : vector<1x10xf32>
    %706 = vector.extract_strided_slice %528 {offsets = [4, 0], sizes = [1, 10], strides = [1, 1]} : vector<6x10xf32> to vector<1x10xf32>
    %cst_375 = arith.constant dense<0.000000e+00> : vector<1x10xf32>
    %707 = tpu.matmul %706, %608, %cst_375 {dimension_numbers = #tpu.dot_dimension_numbers<[1], [0], [0], [1], [0, 0, 1, 1], [], []>} : vector<1x10xf32>, vector<10x10xf32>, vector<1x10xf32> -> vector<1x10xf32>
    %708 = arith.addf %705, %707 : vector<1x10xf32>
    %709 = vector.extract_strided_slice %528 {offsets = [5, 0], sizes = [1, 10], strides = [1, 1]} : vector<6x10xf32> to vector<1x10xf32>
    %cst_376 = arith.constant dense<0.000000e+00> : vector<1x10xf32>
    %710 = tpu.matmul %709, %610, %cst_376 {dimension_numbers = #tpu.dot_dimension_numbers<[1], [0], [0], [1], [0, 0, 1, 1], [], []>} : vector<1x10xf32>, vector<10x10xf32>, vector<1x10xf32> -> vector<1x10xf32>
    %711 = arith.addf %708, %710 : vector<1x10xf32>
    %712 = vector.extract_strided_slice %583 {offsets = [0, 0], sizes = [1, 10], strides = [1, 1]} : vector<6x10xf32> to vector<1x10xf32>
    %cst_377 = arith.constant dense<0.000000e+00> : vector<1x10xf32>
    %713 = tpu.matmul %712, %612, %cst_377 {dimension_numbers = #tpu.dot_dimension_numbers<[1], [0], [0], [1], [0, 0, 1, 1], [], []>} : vector<1x10xf32>, vector<10x10xf32>, vector<1x10xf32> -> vector<1x10xf32>
    %714 = arith.addf %711, %713 : vector<1x10xf32>
    %715 = vector.extract_strided_slice %583 {offsets = [1, 0], sizes = [1, 10], strides = [1, 1]} : vector<6x10xf32> to vector<1x10xf32>
    %cst_378 = arith.constant dense<0.000000e+00> : vector<1x10xf32>
    %716 = tpu.matmul %715, %614, %cst_378 {dimension_numbers = #tpu.dot_dimension_numbers<[1], [0], [0], [1], [0, 0, 1, 1], [], []>} : vector<1x10xf32>, vector<10x10xf32>, vector<1x10xf32> -> vector<1x10xf32>
    %717 = arith.addf %714, %716 : vector<1x10xf32>
    %718 = vector.extract_strided_slice %583 {offsets = [2, 0], sizes = [1, 10], strides = [1, 1]} : vector<6x10xf32> to vector<1x10xf32>
    %cst_379 = arith.constant dense<0.000000e+00> : vector<1x10xf32>
    %719 = tpu.matmul %718, %616, %cst_379 {dimension_numbers = #tpu.dot_dimension_numbers<[1], [0], [0], [1], [0, 0, 1, 1], [], []>} : vector<1x10xf32>, vector<10x10xf32>, vector<1x10xf32> -> vector<1x10xf32>
    %720 = arith.addf %717, %719 : vector<1x10xf32>
    %721 = vector.extract_strided_slice %583 {offsets = [3, 0], sizes = [1, 10], strides = [1, 1]} : vector<6x10xf32> to vector<1x10xf32>
    %cst_380 = arith.constant dense<0.000000e+00> : vector<1x10xf32>
    %722 = tpu.matmul %721, %618, %cst_380 {dimension_numbers = #tpu.dot_dimension_numbers<[1], [0], [0], [1], [0, 0, 1, 1], [], []>} : vector<1x10xf32>, vector<10x10xf32>, vector<1x10xf32> -> vector<1x10xf32>
    %723 = arith.addf %720, %722 : vector<1x10xf32>
    %724 = vector.extract_strided_slice %583 {offsets = [4, 0], sizes = [1, 10], strides = [1, 1]} : vector<6x10xf32> to vector<1x10xf32>
    %cst_381 = arith.constant dense<0.000000e+00> : vector<1x10xf32>
    %725 = tpu.matmul %724, %620, %cst_381 {dimension_numbers = #tpu.dot_dimension_numbers<[1], [0], [0], [1], [0, 0, 1, 1], [], []>} : vector<1x10xf32>, vector<10x10xf32>, vector<1x10xf32> -> vector<1x10xf32>
    %726 = arith.addf %723, %725 : vector<1x10xf32>
    %727 = vector.extract_strided_slice %583 {offsets = [5, 0], sizes = [1, 10], strides = [1, 1]} : vector<6x10xf32> to vector<1x10xf32>
    %cst_382 = arith.constant dense<0.000000e+00> : vector<1x10xf32>
    %728 = tpu.matmul %727, %622, %cst_382 {dimension_numbers = #tpu.dot_dimension_numbers<[1], [0], [0], [1], [0, 0, 1, 1], [], []>} : vector<1x10xf32>, vector<10x10xf32>, vector<1x10xf32> -> vector<1x10xf32>
    %729 = arith.addf %726, %728 : vector<1x10xf32>
    %730 = arith.addf %729, %625 : vector<1x10xf32>
    %cst_383 = arith.constant 0.000000e+00 : f32
    %731 = vector.broadcast %cst_383 : f32 to vector<1x10xf32>
    %732 = arith.maximumf %730, %731 : vector<1x10xf32>
    %cst_384 = arith.constant dense<0.000000e+00> : vector<1x10xf32>
    %733 = tpu.matmul %732, %623, %cst_384 {dimension_numbers = #tpu.dot_dimension_numbers<[1], [0], [0], [1], [0, 0, 1, 1], [], []>} : vector<1x10xf32>, vector<10x10xf32>, vector<1x10xf32> -> vector<1x10xf32>
    %734 = arith.addf %733, %626 : vector<1x10xf32>
    %cst_385 = arith.constant 0.000000e+00 : f32
    %735 = vector.broadcast %cst_385 : f32 to vector<1x10xf32>
    %736 = arith.maximumf %734, %735 : vector<1x10xf32>
    %cst_386 = arith.constant dense<0.000000e+00> : vector<1x30xf32>
    %737 = tpu.matmul %736, %624, %cst_386 {dimension_numbers = #tpu.dot_dimension_numbers<[1], [0], [0], [1], [0, 0, 1, 1], [], []>} : vector<1x10xf32>, vector<10x30xf32>, vector<1x30xf32> -> vector<1x30xf32>
    %738 = arith.addf %737, %627 : vector<1x30xf32>
    %c1_387 = arith.constant 1 : index
    %c0_388 = arith.constant 0 : index
    %739 = vector.load %arg40[%c1_387, %c0_388] : memref<2x30xf32, #tpu.memory_space<vmem>>, vector<1x30xf32>
    tpu.vector_store %arg40[%c1_387, %c0_388], %738 {strides = array<i32>} : memref<2x30xf32, #tpu.memory_space<vmem>>, vector<1x30xf32>,
    return
  }
}

</mosaic_0001>

<bundles_post_ra>
// kernel: squeeze.4
= control target key start
LH: loop header
LB: loop body
LE: loop exit
PB: predicated region body
PF: predicated region fallthrough
CT: control target
= control target key end

     0   :  { %vm3_vm0 = vcmask 80896   ;;  %s38_s0 = inlined_call_operand.vmem [shape: f32[1,6,10], index: 0, kind: input, shape index: {}]   ;;  %s39_s1 = inlined_call_operand.vmem [shape: f32[2,3,10], index: 1, kind: output, shape index: {}]  }
   0x1   :  { %v2_v0 = vld [vmem:[%s38_s0] sm:$0x3f]  }
   0x2   :  { %4 = vst.msk [vmem:[#allocation0] sm:$0x7] %vm3_vm0, %v2_v0   ;;  %6 = vst.msk [vmem:[#allocation0 + $0x5] sm:$0x38] %vm3_vm0, %v2_v0  }
   0x9   :  { %v10_v1 = vld [vmem:[#allocation0] sm:$0xf]  ;;  %v14_v2 = vld [vmem:[#allocation0 + $0x8] sm:$0xf] }
   0xa   :  { %12 = vst [vmem:[%s39_s1] sm:$0xf] %v10_v1  ;;  %18 = vst [vmem:[%s39_s1 + $0x4] sm:$0xf] %v14_v2 }

// kernel: sde_vae_forward.1
= control target key start
LH: loop header
LB: loop body
LE: loop exit
PB: predicated region body
PF: predicated region fallthrough
CT: control target
= control target key end

     0   :  { %s11586_s6 = smov 1   ;;  %s11587_s10 = smov 2   ;;  %s13129_s0 = inlined_call_operand.smem [shape: u32[41], index: -1, kind: input, shape index: {}] }
   0x1   :  { %s11641_s5 = sld [smem:[%s13129_s0]]   ;;  %s11588_s14 = smov 3  }
   0x2   :  { %s11646_s9 = sld [smem:[%s13129_s0 + %s11586_s6]]   ;;  %s11589_s18 = smov 4  }
   0x3   :  { %s11651_s13 = sld [smem:[%s13129_s0 + %s11587_s10]]   ;;  %s11590_s22 = smov 5  }
   0x4   :  { %s11656_s17 = sld [smem:[%s13129_s0 + %s11588_s14]]   ;;  %s11591_s26 = smov 6  }
   0x5   :  { %s11661_s21 = sld [smem:[%s13129_s0 + %s11589_s18]]   ;;  %s11592_s30 = smov 7  }
   0x6   :  { %s11666_s25 = sld [smem:[%s13129_s0 + %s11590_s22]]   ;;  %s11593_s4 = smov 8  }
   0x7   :  { %s11671_s29 = sld [smem:[%s13129_s0 + %s11591_s26]]   ;;  %s11594_s10 = smov 9  }
   0x8   :  { %s11676_s3 = sld [smem:[%s13129_s0 + %s11592_s30]]   ;;  %s11595_s15 = smov 10  }
   0x9   :  { %s11681_s8 = sld [smem:[%s13129_s0 + %s11593_s4]]   ;;  %s11596_s20 = smov 11  }
   0xa   :  { %s11686_s14 = sld [smem:[%s13129_s0 + %s11594_s10]]   ;;  %s11597_s26 = smov 12  }
   0xb   :  { %s11691_s19 = sld [smem:[%s13129_s0 + %s11595_s15]]   ;;  %s11598_s1 = smov 13  }
   0xc   :  { %s11696_s24 = sld [smem:[%s13129_s0 + %s11596_s20]]   ;;  %s11599_s7 = smov 14  }
   0xd   :  { %s11701_s30 = sld [smem:[%s13129_s0 + %s11597_s26]]   ;;  %s11600_s15 = smov 15  }
   0xe   :  { %s11706_s6 = sld [smem:[%s13129_s0 + %s11598_s1]]   ;;  %s11601_s22 = smov 16  }
   0xf   :  { %s11711_s12 = sld [smem:[%s13129_s0 + %s11599_s7]]   ;;  %s11602_s28 = smov 17  }
  0x10   :  { %s11716_s20 = sld [smem:[%s13129_s0 + %s11600_s15]]   ;;  %s11603_s7 = smov 18  }
  0x11   :  { %s11721_s27 = sld [smem:[%s13129_s0 + %s11601_s22]]   ;;  %s11604_s15 = smov 19  }
  0x12   :  { %s11726_s4 = sld [smem:[%s13129_s0 + %s11602_s28]]   ;;  %s11605_s22 = smov 20  }
  0x13   :  { %13141 = sst [smem:[#allocation8_spill]] %s11701_s30  ;;  %s11606_s28 = smov 21  }
  0x14   :  { %13142 = sst [smem:[#allocation9_spill]] %s11706_s6  ;;  %s11616_s16 = smov 31  }
  0x15   :  { %13143 = sst [smem:[#allocation10_spill]] %s11711_s12  ;;  %s11617_s23 = smov 32  }
  0x16   :  { %13144 = sst [smem:[#allocation11_spill]] %s11716_s20  ;;  %s11618_s1 = smov 33  }
  0x17   :  { %13145 = sst [smem:[#allocation12_spill]] %s11721_s27  ;;  %s11619_s10 = smov 34  }
  0x18   :  { %13146 = sst [smem:[#allocation13_spill]] %s11726_s4 }
  0x19   :  { %s11731_s6 = sld [smem:[%s13129_s0 + %s11603_s7]]   ;;  %s11607_s7 = smov 22  }
  0x1a   :  { %s11736_s20 = sld [smem:[%s13129_s0 + %s11604_s15]]   ;;  %s11608_s15 = smov 23  }
  0x1b   :  { %s11741_s27 = sld [smem:[%s13129_s0 + %s11605_s22]]   ;;  %s11609_s22 = smov 24  }
  0x1c   :  { %s11746_s4 = sld [smem:[%s13129_s0 + %s11606_s28]]   ;;  %s11610_s28 = smov 25  }
  0x1d   :  { %s11794_s30 = sld [smem:[%s13129_s0 + %s11616_s16]]   ;;  %s11620_s16 = smov 35  }
  0x1e   :  { %s11814_s12 = sld [smem:[%s13129_s0 + %s11620_s16]]   ;;  %s11624_s16 = smov 39  }
  0x1f   :  { %13147 = sst [smem:[#allocation14_spill]] %s11731_s6 }
  0x20   :  { %13148 = sst [smem:[#allocation15_spill]] %s11736_s20 }
  0x21   :  { %13149 = sst [smem:[#allocation16_spill]] %s11741_s27 }
  0x22   :  { %13150 = sst [smem:[#allocation17_spill]] %s11746_s4 }
  0x23   :  { %s11751_s6 = sld [smem:[%s13129_s0 + %s11607_s7]]   ;;  %s11611_s7 = smov 26  }
  0x24   :  { %s11756_s20 = sld [smem:[%s13129_s0 + %s11608_s15]]   ;;  %s11612_s15 = smov 27  }
  0x25   :  { %s11761_s27 = sld [smem:[%s13129_s0 + %s11609_s22]]   ;;  %s11613_s22 = smov 28  }
  0x26   :  { %s11766_s4 = sld [smem:[%s13129_s0 + %s11610_s28]]   ;;  %s11614_s28 = smov 29  }
  0x27   :  { %13162 = sst [smem:[#allocation29_spill]] %s11814_s12 }
  0x28   :  { %s11834_s12 = sld [smem:[%s13129_s0 + %s11624_s16]]  }
  0x29   :  { %13151 = sst [smem:[#allocation18_spill]] %s11751_s6 }
  0x2a   :  { %13152 = sst [smem:[#allocation19_spill]] %s11756_s20 }
  0x2b   :  { %13153 = sst [smem:[#allocation20_spill]] %s11761_s27 }
  0x2c   :  { %13154 = sst [smem:[#allocation21_spill]] %s11766_s4 }
  0x2d   :  { %s11771_s6 = sld [smem:[%s13129_s0 + %s11611_s7]]   ;;  %s11615_s7 = smov 30  }
  0x2e   :  { %s11776_s20 = sld [smem:[%s13129_s0 + %s11612_s15]]  }
  0x2f   :  { %s11781_s27 = sld [smem:[%s13129_s0 + %s11613_s22]]  }
  0x30   :  { %s11786_s4 = sld [smem:[%s13129_s0 + %s11614_s28]]  }
  0x33   :  { %13155 = sst [smem:[#allocation22_spill]] %s11771_s6 }
  0x34   :  { %13156 = sst [smem:[#allocation23_spill]] %s11776_s20 }
  0x35   :  { %13157 = sst [smem:[#allocation24_spill]] %s11781_s27 }
  0x36   :  { %13158 = sst [smem:[#allocation25_spill]] %s11786_s4 }
  0x37   :  { %s9239_s6 = sld [smem:[%s13129_s0 + %s11615_s7]]  }
  0x38   :  { %s11799_s27 = sld [smem:[%s13129_s0 + %s11617_s23]]   ;;  %s11621_s23 = smov 36  }
  0x39   :  { %s11804_s4 = sld [smem:[%s13129_s0 + %s11618_s1]]   ;;  %s11622_s1 = smov 37  }
  0x3a   :  { %s11809_s20 = sld [smem:[%s13129_s0 + %s11619_s10]]   ;;  %s11623_s10 = smov 38  }
  0x3e   :  { %13159 = sst [smem:[#allocation26_spill]] %s11799_s27 }
  0x3f   :  { %13160 = sst [smem:[#allocation27_spill]] %s11804_s4 }
  0x40   :  { %13161 = sst [smem:[#allocation28_spill]] %s11809_s20 }
  0x41   :  { %s11819_s27 = sld [smem:[%s13129_s0 + %s11621_s23]]   ;;  %s11625_s23 = smov 40  }
  0x42   :  { %s11824_s4 = sld [smem:[%s13129_s0 + %s11622_s1]]  }
  0x43   :  { %s11829_s20 = sld [smem:[%s13129_s0 + %s11623_s10]]  }
  0x47   :  { %13163 = sst [smem:[#allocation30_spill]] %s11819_s27 }
  0x48   :  { %s11839_s27 = sld [smem:[%s13129_s0 + %s11625_s23]]  }
  0x49   :  { %87 = vsyncpa [#allocation3], 0  ;;  %s155_s1 = sshll.u32 %s9239_s6, 4  ;;  %s156_s1 = int_to_ptr.vmem [resolvable:$true] %s155_s1 }
  0x4a   :  { %88 = vsyncpa [#allocation5], 0  ;;  %s165_s28 = sshll.u32 %s11794_s30, 4  ;;  %s11558_s2 = scalar_lea.vmem %s156_s1, 16  ;;  %s166_s28 = int_to_ptr.vmem [resolvable:$true] %s165_s28 }
  0x4b   :  { %p11559_p0 = scmp.ne.s32.totalorder %s156_s1, %s11558_s2  ;;  %p11563_p1 = scmp.lt.s32.totalorder %s156_s1, %s156_s1 }
  0x4c   :  { %p11564_p2 = scmp.lt.s32.totalorder %s11558_s2, %s11558_s2 }
  0x4e   :  { %p11565_p3 = por %p11564_p2, %p11563_p1 }
  0x50   :  { %p11566_p4 = pnand %p11565_p3, %p11559_p0 }
  0x52   :  { %11569 = shalt.err (!%p11566_p4)
}
  0x53   :  { %s11626_s10 = smov [#allocation2]   ;;  %s11570_s7 = scalar_lea.vmem %s166_s28, 16 }
  0x54   :  { %158 = dma.vmem_to_smem %s156_s1, 16, %s11626_s10, [#allocation3]  }
  0x55   :  { %p11571_p5 = scmp.ne.s32.totalorder %s166_s28, %s11570_s7  ;;  %p11575_p6 = scmp.lt.s32.totalorder %s166_s28, %s166_s28 }
  0x56   :  { %p11576_p7 = scmp.lt.s32.totalorder %s11570_s7, %s11570_s7 }
  0x58   :  { %p11577_p8 = por %p11576_p7, %p11575_p6 }
  0x5a   :  { %p11578_p9 = pnand %p11577_p8, %p11571_p5 }
  0x5c   :  { %11581 = shalt.err (!%p11578_p9)
}
  0x5d   :  { %s11627_s0 = smov [#allocation4]  }
  0x5e   :  { %168 = dma.vmem_to_smem %s166_s28, 16, %s11627_s0, [#allocation5]  }
  0x5f   :  { %11582 = dma.done.wait [#allocation3], 16  }
  0x60   :  { %11583 = vsyncadd [#allocation3], 4294967280 }
  0x61   :  { %11584 = dma.done.wait [#allocation5], 16  }
  0x62   :  { %11585 = vsyncadd [#allocation5], 4294967280 }
  0x63   :  { %187 = sfence }
  0x64   :  { %v191_v0 = vld [vmem:[%s11661_s21] sm:$0xff]  ;;  %v192_v1 = vld [vmem:[%s11661_s21 + $0x8] sm:$0xff]  ;;  %v193_v2 = vld [vmem:[%s11661_s21 + $0x10] sm:$0xff]  ;;  %vm310_vm0 = vcmask 1044480   ;;  %v11628_v3 = vmov 0.0|0.0   ;;  %v11629_v6 = vmov 0.0  }
  0x65   :  { %10961 = vmatprep.subr.bf16.mxu0 %v11628_v3  ;;  %v11846_v4 = vpack.c.bf16 %v192_v1, %v191_v0  ;;  %v194_v5 = vld [vmem:[%s11661_s21 + $0x18] sm:$0xff]  ;;  %9991 = vmatprep.subr.mxu1 %v11629_v6  ;;  %v11851_v7 = vld [vmem:[%s11646_s9] sm:$0x1f]  ;;  %vm11630_vm1 = vmmov 0   ;;  %vm306_vm2 = vcmask 39936   ;;  %v196_v10 = vld [vmem:[%s11666_s25 + $0x8] sm:$0xff] }
  0x66   :  { %v231_v8 = vld [vmem:[%s11641_s5] sm:$0x3]  ;;  %9992 = vmatpush3.msk.msra.mxu1 %vm310_vm0, %v11851_v7  ;;  %9993 = vmatprep.mubr.msk.f32.mxu1 %vm11630_vm1, %v11629_v6  ;;  %v11861_v11 = vpack.c.bf16 %v194_v5, %v193_v2  ;;  %v197_v13 = vld [vmem:[%s11666_s25 + $0x10] sm:$0xff]  ;;  %v198_v14 = vld [vmem:[%s11666_s25 + $0x18] sm:$0xff]  ;;  %vm232_vm3 = vcmask 261120   ;;  %s13165_s9 = sld [smem:[#allocation23_spill]] }
  0x67   :  { %v195_v9 = vld [vmem:[%s11666_s25] sm:$0xff]  ;;  %10963 = vmatpush3.bf16.msra.mxu0 %v11846_v4  ;;  %9988 = vmatprep.mubr.msk.f32.mxu0 %vm11630_vm1, %v11629_v6  ;;  %v11875_v15 = vpack.c.bf16 %v198_v14, %v197_v13  ;;  %v200_v18 = vld [vmem:[%s11671_s29 + $0x8] sm:$0xff]  ;;  %v201_v21 = vld [vmem:[%s11671_s29 + $0x10] sm:$0xff]  ;;  %vm4010_vm4 = vcmask 1040384   ;;  %s13168_s21 = sld [smem:[#allocation9_spill]]  ;;  %s13169_s25 = sld [smem:[#allocation11_spill]] }
  0x68   :  { %v11865_v12 = vpack.c.bf16 %v196_v10, %v195_v9  ;;  %10964 = vmatprep.subr.bf16.mxu0 %v11628_v3  ;;  %9994 = vmatmul.mubr.msk.f32.vlgmr.msra.gmra.mrb[0].mxu1 %vm306_vm2, %v231_v8  ;;  %v11881_v16 = vld [vmem:[%s11651_s13] sm:$0x1f]  ;;  %v202_v22 = vld [vmem:[%s11671_s29 + $0x18] sm:$0xff]  ;;  %s13166_s13 = sld [smem:[#allocation8_spill]]  ;;  %vm4006_vm5 = vcmask 7168   ;;  %vm3923_vm6 = vcmask 1041408  }
  0x69   :  { %10967 = vmatprep.subr.bf16.mxu1 %v11628_v3  ;;  %10004 = vmatprep.mubr.msk.f32.mxu1 %vm11630_vm1, %v11629_v6  ;;  %v199_v17 = vld [vmem:[%s11671_s29] sm:$0xff]  ;;  %v11905_v23 = vpack.c.bf16 %v202_v22, %v201_v21  ;;  %vm3919_vm7 = vcmask 15360   ;;  %vm4099_vm8 = vcmask 1043456   ;;  %vm4095_vm9 = vcmask 162816   ;;  %s13170_s29 = sld [smem:[#allocation13_spill]]  ;;  %s13176_s30 = sld [smem:[#allocation19_spill]] }
  0x6a   :  { %10969 = vmatpush3.bf16.msra.mxu1 %v11865_v12  ;;  %v11891_v19 = vpack.c.bf16 %v200_v18, %v199_v17  ;;  %v11894_v20 = vld [vmem:[%s11656_s17] sm:$0x1f]  ;;  %s13167_s17 = sld [smem:[#allocation12_spill]]  ;;  %vm4680_vm10 = vcmask 78848   ;;  %vm11632_vm11 = vmmov 1   ;;  %vm4696_vm13 = vcmask 80896  }
  0x6b   :  { %10966 = vmatpush3.bf16.msra.mxu0 %v11861_v11  ;;  %10970 = vmatprep.subr.bf16.mxu1 %v11628_v3  ;;  %v9262_v24 = vld [vmem:[%s11641_s5 + $0x2] sm:$0x3]  ;;  %v11949_v27 = vld [vmem:[%s11676_s3] ss:$0 sm:$0xff]  ;;  %s13171_s3 = sld [smem:[#allocation14_spill]]  ;;  %vm12367_vm12 = vmpackc.low %vm3923_vm6, %vm11632_vm11  ;;  %s13179_s6 = sld [smem:[#allocation18_spill]] }
  0x6c   :  { %10007 = vmatprep.subr.mxu0 %v11629_v6  ;;  %v11953_v33 = vld [vmem:[%s11681_s8] ss:$0 sm:$0xff]  ;;  %s13172_s8 = sld [smem:[#allocation17_spill]]  ;;  %vm4775_vm14 = vcmask 326656   ;;  %s13180_s11 = sld [smem:[#allocation20_spill]]  ;;  %vm4682_vm15 = vcmask 5120  }
  0x6d   :  { %v11957_v48 = vld [vmem:[%s11691_s19] ss:$0 sm:$0xff]  ;;  %s13174_s19 = sld [smem:[#allocation16_spill]]  ;;  %s13181_s16 = sld [smem:[#allocation21_spill]]  ;;  %4683 = vst.msk [vmem:[%s11834_s12] sm:$0x3f] %vm4682_vm15, %v11629_v6 }
  0x6e   :  { %9989 = vmatmul.mubr.f32.vlgmr.msra.gmra.mrb[0].mxu0 %v11629_v6  ;;  %10972 = vmatpush3.bf16.msra.mxu1 %v11875_v15  ;;  %v11960_v50 = vld [vmem:[%s11686_s14] ss:$0 sm:$0xff]  ;;  %s13173_s14 = sld [smem:[#allocation24_spill]]  ;;  %s13182_s15 = sld [smem:[#allocation22_spill]] }
  0x6f   :  { %10008 = vmatpush3.msk.msra.mxu0 %vm310_vm0, %v11881_v16  ;;  %10009 = vmatprep.mubr.msk.f32.mxu0 %vm11630_vm1, %v11629_v6  ;;  %s13183_s18 = sld [smem:[#allocation25_spill]]  ;;  %s12524_s23 = sld [smem:[#allocation2]] }
  0x70   :  { %10973 = vmatprep.subr.bf16.mxu0 %v11628_v3  ;;  %10012 = vmatprep.subr.mxu1 %v11629_v6  ;;  %s4685_s22 = sld [smem:[#allocation4]]  ;;  %s9415_s26 = sld [smem:[#allocation2 + $0x1]] }
  0x71   :  { %10005 = vmatmul.mubr.f32.vlgmr.msra.gmra.mrb[2].mxu1 %v11629_v6  ;;  %s9416_s1 = sld [smem:[#allocation4 + $0x1]]  ;;  %s9427_s28 = sld [smem:[#allocation2 + $0x2]] }
  0x72   :  { %10010 = vmatmul.mubr.msk.f32.vlgmr.msra.gmra.mrb[2].mxu0 %vm306_vm2, %v231_v8  ;;  %10013 = vmatpush3.msk.msra.mxu1 %vm310_vm0, %v11894_v20  ;;  %s9428_s2 = sld [smem:[#allocation4 + $0x2]]  ;;  %s13184_s10 = sld [smem:[#allocation26_spill]] }
  0x73   :  { %10975 = vmatpush3.bf16.msra.mxu0 %v11891_v19  ;;  %10025 = vmatprep.mubr.msk.f32.mxu0 %vm11630_vm1, %v11629_v6  ;;  %s13185_s7 = sld [smem:[#allocation28_spill]]  ;;  %s12949_s0 = sld [smem:[#allocation2 + $0x3]] }
  0x74   :  { %10976 = vmatprep.subr.bf16.mxu0 %v11628_v3  ;;  %10014 = vmatprep.mubr.msk.f32.mxu1 %vm11630_vm1, %v11629_v6 }
  0x75   :  { %10015 = vmatmul.mubr.msk.f32.vlgmr.msra.gmra.mrb[4].mxu1 %vm306_vm2, %v231_v8  ;;  %10979 = vmatprep.subr.bf16.mxu1 %v11628_v3  ;;  %v9274_v8 = vld [vmem:[%s11641_s5 + $0x4] sm:$0x3] }
  0x76   :  { %10981 = vmatpush3.bf16.msra.mxu1 %v11846_v4  ;;  %10036 = vmatprep.mubr.msk.f32.mxu1 %vm11630_vm1, %v11629_v6 }
  0x77   :  { %10978 = vmatpush3.bf16.msra.mxu0 %v11905_v23  ;;  %10982 = vmatprep.subr.bf16.mxu1 %v11628_v3 }
  0x78   :  { %10039 = vmatprep.subr.mxu0 %v11629_v6 }
  0x7a   :  { %10026 = vmatmul.mubr.f32.vlgmr.msra.gmra.mrb[4].mxu0 %v11629_v6  ;;  %10984 = vmatpush3.bf16.msra.mxu1 %v11861_v11 }
  0x7b   :  { %10040 = vmatpush3.msk.msra.mxu0 %vm310_vm0, %v11851_v7  ;;  %10041 = vmatprep.mubr.msk.f32.mxu0 %vm11630_vm1, %v11629_v6 }
  0x7c   :  { %10985 = vmatprep.subr.bf16.mxu1 %v11628_v3  ;;  %10055 = vmatprep.subr.mxu0 %v11629_v6 }
  0x7e   :  { %10042 = vmatmul.mubr.msk.f32.vlgmr.msra.gmra.mrb[6].mxu0 %vm306_vm2, %v9262_v24 }
  0x7f   :  { %10056 = vmatpush3.msk.msra.mxu0 %vm310_vm0, %v11881_v16  ;;  %10057 = vmatprep.mubr.msk.f32.mxu0 %vm11630_vm1, %v11629_v6 }
  0x80   :  { %10060 = vmatprep.subr.mxu0 %v11629_v6 }
  0x82   :  { %10058 = vmatmul.mubr.msk.f32.vlgmr.msra.gmra.mrb[8].mxu0 %vm306_vm2, %v9262_v24 }
  0x83   :  { %10061 = vmatpush3.msk.msra.mxu0 %vm310_vm0, %v11894_v20  ;;  %10062 = vmatprep.mubr.msk.f32.mxu0 %vm11630_vm1, %v11629_v6 }
  0x84   :  { %10997 = vmatprep.subr.bf16.mxu0 %v11628_v3 }
  0x86   :  { %10063 = vmatmul.mubr.msk.f32.vlgmr.msra.gmra.mrb[10].mxu0 %vm306_vm2, %v9262_v24 }
  0x87   :  { %10999 = vmatpush3.bf16.msra.mxu0 %v11846_v4  ;;  %10084 = vmatprep.mubr.msk.f32.mxu0 %vm11630_vm1, %v11629_v6 }
  0x88   :  { %11000 = vmatprep.subr.bf16.mxu0 %v11628_v3 }
  0x8b   :  { %11002 = vmatpush3.bf16.msra.mxu0 %v11861_v11 }
  0x8c   :  { %11003 = vmatprep.subr.bf16.mxu0 %v11628_v3 }
 0x13b   :  { %v380_v25 = vpop.f32.mrb[0].mxu1 }
 0x13c   :  { %v9995_v26 = vpop.f32.mrb[1].mxu1 }
 0x141   :  { %v302_v28 = vpop.f32.mrb[0].mxu0 }
 0x142   :  { %v381_v29 = vadd.f32 %v380_v25, %v302_v28  ;;  %v9990_v30 = vpop.f32.mrb[1].mxu0 }
 0x144   :  { %v384_v31 = vadd.f32 %v11949_v27, %v381_v29  ;;  %v457_v32 = vpop.f32.mrb[2].mxu1 }
 0x145   :  { %v530_v34 = vpop.f32.mrb[2].mxu0  ;;  %v10006_v35 = vpop.f32.mrb[3].mxu1 }
 0x146   :  { %v9256_v36 = vmul.f32 -1.442695, %v384_v31  ;;  %v531_v37 = vadd.f32 %v530_v34, %v457_v32  ;;  %v10011_v38 = vpop.f32.mrb[3].mxu0 }
 0x148   :  { %11446 = vpow2.f32 %v9256_v36  ;;  %v534_v39 = vadd.f32 %v11953_v33, %v531_v37  ;;  %v610_v40 = vpop.f32.mrb[4].mxu1 }
 0x149   :  { %v10016_v41 = vpop.f32.mrb[5].mxu1  ;;  %v611_v52 = vadd.f32 %v11960_v50, %v610_v40 }
 0x14a   :  { %v9259_v42 = vmul.f32 -1.442695, %v534_v39 }
 0x14c   :  { %11448 = vpow2.f32 %v9259_v42 }
 0x14d   :  { %v680_v43 = vpop.f32.mrb[4].mxu0 }
 0x14e   :  { %v10027_v44 = vpop.f32.mrb[5].mxu0  ;;  %v681_v51 = vadd.f32 %v11957_v48, %v680_v43 }
 0x151   :  { %v835_v62 = vpop.f32.mrb[6].mxu0 }
 0x152   :  { %v11447_v45 = vpop.eup %11446  ;;  %v10043_v63 = vpop.f32.mrb[7].mxu0 }
 0x153   :  { %v388_v46 = vadd.f32 1.0, %v11447_v45 }
 0x155   :  { %11450 = vrcp.f32 %v388_v46  ;;  %v982_v0 = vpop.f32.mrb[8].mxu0 }
 0x156   :  { %v11449_v47 = vpop.eup %11448  ;;  %v10059_v1 = vpop.f32.mrb[9].mxu0 }
 0x157   :  { %v538_v49 = vadd.f32 1.0, %v11449_v47 }
 0x159   :  { %11452 = vrcp.f32 %v538_v49  ;;  %v1059_v2 = vpop.f32.mrb[10].mxu0 }
 0x15a   :  { %v10064_v5 = vpop.f32.mrb[11].mxu0  ;;  %v1060_v35 = vadd.f32 %v11960_v50, %v1059_v2 }
 0x15f   :  { %v11451_v53 = vpop.eup %11450 }
 0x160   :  { %v684_v54 = vmul.f32 %v11451_v53, %v681_v51  ;;  %v9286_v53 = vld [vmem:[%s11641_s5 + $0x6] sm:$0x3] }
 0x162   :  { %v685_v55 = vadd.f32 %v684_v54, %v611_v52 }
 0x163   :  { %v11453_v56 = vpop.eup %11452 }
 0x164   :  { %11454 = vtanh.f32 %v685_v55  ;;  %v687_v57 = vsub.f32 1.0, %v11453_v56  ;;  %v689_v60 = vmul.f32 0.0, %v11453_v56 }
 0x16e   :  { %v11455_v58 = vpop.eup %11454 }
 0x16f   :  { %v688_v59 = vmul.f32 %v11455_v58, %v687_v57 }
 0x171   :  { %v11964_v61 = vadd.f32 %v689_v60, %v688_v59 }
 0x173   :  { %10037 = vmatmul.mubr.msk.f32.vlgmr.msra.gmra.mrb[6].mxu1 %vm232_vm3, %v11964_v61 }
 0x174   :  { %10987 = vmatpush3.bf16.msra.mxu1 %v11865_v12  ;;  %10052 = vmatprep.mubr.msk.f32.mxu1 %vm11630_vm1, %v11629_v6 }
 0x175   :  { %10988 = vmatprep.subr.bf16.mxu1 %v11628_v3 }
 0x178   :  { %10990 = vmatpush3.bf16.msra.mxu1 %v11875_v15 }
 0x179   :  { %10991 = vmatprep.subr.bf16.mxu1 %v11628_v3 }
 0x17b   :  { %10053 = vmatmul.mubr.msk.f32.vlgmr.msra.gmra.mrb[8].mxu1 %vm232_vm3, %v11964_v61 }
 0x17c   :  { %10993 = vmatpush3.bf16.msra.mxu1 %v11891_v19  ;;  %10073 = vmatprep.mubr.msk.f32.mxu1 %vm11630_vm1, %v11629_v6 }
 0x17d   :  { %10994 = vmatprep.subr.bf16.mxu1 %v11628_v3 }
 0x180   :  { %10996 = vmatpush3.bf16.msra.mxu1 %v11905_v23 }
 0x181   :  { %10087 = vmatprep.subr.mxu1 %v11629_v6 }
 0x183   :  { %10074 = vmatmul.mubr.msk.f32.vlgmr.msra.gmra.mrb[10].mxu1 %vm232_vm3, %v11964_v61 }
 0x184   :  { %10088 = vmatpush3.msk.msra.mxu1 %vm310_vm0, %v11851_v7  ;;  %10089 = vmatprep.mubr.msk.f32.mxu1 %vm11630_vm1, %v11629_v6 }
 0x185   :  { %10103 = vmatprep.subr.mxu1 %v11629_v6 }
 0x187   :  { %10090 = vmatmul.mubr.msk.f32.vlgmr.msra.gmra.mrb[12].mxu1 %vm306_vm2, %v9274_v8 }
 0x188   :  { %10104 = vmatpush3.msk.msra.mxu1 %vm310_vm0, %v11881_v16  ;;  %10105 = vmatprep.mubr.msk.f32.mxu1 %vm11630_vm1, %v11629_v6 }
 0x189   :  { %10108 = vmatprep.subr.mxu1 %v11629_v6 }
 0x18b   :  { %10106 = vmatmul.mubr.msk.f32.vlgmr.msra.gmra.mrb[14].mxu1 %vm306_vm2, %v9274_v8 }
 0x18c   :  { %10109 = vmatpush3.msk.msra.mxu1 %vm310_vm0, %v11894_v20  ;;  %10110 = vmatprep.mubr.msk.f32.mxu1 %vm11630_vm1, %v11629_v6 }
 0x18d   :  { %11015 = vmatprep.subr.bf16.mxu1 %v11628_v3 }
 0x18f   :  { %10111 = vmatmul.mubr.msk.f32.vlgmr.msra.gmra.mrb[16].mxu1 %vm306_vm2, %v9274_v8 }
 0x190   :  { %11017 = vmatpush3.bf16.msra.mxu1 %v11846_v4  ;;  %10132 = vmatprep.mubr.msk.f32.mxu1 %vm11630_vm1, %v11629_v6 }
 0x191   :  { %11018 = vmatprep.subr.bf16.mxu1 %v11628_v3 }
 0x194   :  { %11020 = vmatpush3.bf16.msra.mxu1 %v11861_v11 }
 0x195   :  { %11021 = vmatprep.subr.bf16.mxu1 %v11628_v3 }
 0x246   :  { %v762_v9 = vpop.f32.mrb[6].mxu1 }
 0x247   :  { %v836_v10 = vadd.f32 %v835_v62, %v762_v9  ;;  %v10038_v13 = vpop.f32.mrb[7].mxu1 }
 0x249   :  { %v839_v14 = vadd.f32 %v11949_v27, %v836_v10 }
 0x24b   :  { %v9266_v17 = vmul.f32 -1.442695, %v839_v14 }
 0x24d   :  { %11456 = vpow2.f32 %v9266_v17 }
 0x24e   :  { %v912_v18 = vpop.f32.mrb[8].mxu1 }
 0x24f   :  { %v983_v21 = vadd.f32 %v982_v0, %v912_v18  ;;  %v10054_v22 = vpop.f32.mrb[9].mxu1 }
 0x251   :  { %v986_v24 = vadd.f32 %v11953_v33, %v983_v21 }
 0x253   :  { %v9270_v25 = vmul.f32 -1.442695, %v986_v24 }
 0x255   :  { %11458 = vpow2.f32 %v9270_v25 }
 0x256   :  { %v1129_v26 = vpop.f32.mrb[10].mxu1 }
 0x257   :  { %v11457_v28 = vpop.eup %11456  ;;  %v10075_v29 = vpop.f32.mrb[11].mxu1  ;;  %v1130_v34 = vadd.f32 %v11957_v48, %v1129_v26 }
 0x258   :  { %v843_v30 = vadd.f32 1.0, %v11457_v28 }
 0x25a   :  { %11460 = vrcp.f32 %v843_v30  ;;  %v1284_v45 = vpop.f32.mrb[12].mxu1 }
 0x25b   :  { %v10091_v46 = vpop.f32.mrb[13].mxu1 }
 0x25e   :  { %v1431_v47 = vpop.f32.mrb[14].mxu1 }
 0x25f   :  { %v11459_v31 = vpop.eup %11458  ;;  %v10107_v49 = vpop.f32.mrb[15].mxu1 }
 0x260   :  { %v990_v32 = vadd.f32 1.0, %v11459_v31 }
 0x262   :  { %11462 = vrcp.f32 %v990_v32  ;;  %v1508_v51 = vpop.f32.mrb[16].mxu1 }
 0x263   :  { %v10112_v52 = vpop.f32.mrb[17].mxu1  ;;  %v1509_v13 = vadd.f32 %v11960_v50, %v1508_v51 }
 0x264   :  { %v11461_v36 = vpop.eup %11460 }
 0x265   :  { %v1133_v37 = vmul.f32 %v11461_v36, %v1130_v34  ;;  %v9298_v36 = vld [vmem:[%s11641_s5 + $0x8] sm:$0x3] }
 0x267   :  { %v1134_v38 = vadd.f32 %v1133_v37, %v1060_v35 }
 0x269   :  { %11464 = vtanh.f32 %v1134_v38 }
 0x26c   :  { %v11463_v39 = vpop.eup %11462 }
 0x26d   :  { %v1136_v40 = vsub.f32 1.0, %v11463_v39  ;;  %v1138_v43 = vmul.f32 %v11463_v39, %v11964_v61 }
 0x273   :  { %v11465_v41 = vpop.eup %11464 }
 0x274   :  { %v1137_v42 = vmul.f32 %v11465_v41, %v1136_v40 }
 0x276   :  { %v12014_v44 = vadd.f32 %v1138_v43, %v1137_v42 }
 0x278   :  { %10085 = vmatmul.mubr.msk.f32.vlgmr.msra.gmra.mrb[12].mxu0 %vm232_vm3, %v12014_v44 }
 0x279   :  { %11005 = vmatpush3.bf16.msra.mxu0 %v11865_v12  ;;  %10100 = vmatprep.mubr.msk.f32.mxu0 %vm11630_vm1, %v11629_v6 }
 0x27a   :  { %11006 = vmatprep.subr.bf16.mxu0 %v11628_v3 }
 0x27d   :  { %11008 = vmatpush3.bf16.msra.mxu0 %v11875_v15 }
 0x27e   :  { %11009 = vmatprep.subr.bf16.mxu0 %v11628_v3 }
 0x280   :  { %10101 = vmatmul.mubr.msk.f32.vlgmr.msra.gmra.mrb[14].mxu0 %vm232_vm3, %v12014_v44 }
 0x281   :  { %11011 = vmatpush3.bf16.msra.mxu0 %v11891_v19  ;;  %10121 = vmatprep.mubr.msk.f32.mxu0 %vm11630_vm1, %v11629_v6 }
 0x282   :  { %11012 = vmatprep.subr.bf16.mxu0 %v11628_v3 }
 0x285   :  { %11014 = vmatpush3.bf16.msra.mxu0 %v11905_v23 }
 0x286   :  { %10135 = vmatprep.subr.mxu0 %v11629_v6 }
 0x288   :  { %10122 = vmatmul.mubr.msk.f32.vlgmr.msra.gmra.mrb[16].mxu0 %vm232_vm3, %v12014_v44 }
 0x289   :  { %10136 = vmatpush3.msk.msra.mxu0 %vm310_vm0, %v11851_v7  ;;  %10137 = vmatprep.mubr.msk.f32.mxu0 %vm11630_vm1, %v11629_v6 }
 0x28a   :  { %10151 = vmatprep.subr.mxu0 %v11629_v6 }
 0x28c   :  { %10138 = vmatmul.mubr.msk.f32.vlgmr.msra.gmra.mrb[18].mxu0 %vm306_vm2, %v9286_v53 }
 0x28d   :  { %10152 = vmatpush3.msk.msra.mxu0 %vm310_vm0, %v11881_v16  ;;  %10153 = vmatprep.mubr.msk.f32.mxu0 %vm11630_vm1, %v11629_v6 }
 0x28e   :  { %10156 = vmatprep.subr.mxu0 %v11629_v6 }
 0x290   :  { %10154 = vmatmul.mubr.msk.f32.vlgmr.msra.gmra.mrb[20].mxu0 %vm306_vm2, %v9286_v53 }
 0x291   :  { %10157 = vmatpush3.msk.msra.mxu0 %vm310_vm0, %v11894_v20  ;;  %10158 = vmatprep.mubr.msk.f32.mxu0 %vm11630_vm1, %v11629_v6 }
 0x292   :  { %11033 = vmatprep.subr.bf16.mxu0 %v11628_v3 }
 0x294   :  { %10159 = vmatmul.mubr.msk.f32.vlgmr.msra.gmra.mrb[22].mxu0 %vm306_vm2, %v9286_v53 }
 0x295   :  { %11035 = vmatpush3.bf16.msra.mxu0 %v11846_v4  ;;  %10180 = vmatprep.mubr.msk.f32.mxu0 %vm11630_vm1, %v11629_v6 }
 0x296   :  { %11036 = vmatprep.subr.bf16.mxu0 %v11628_v3 }
 0x299   :  { %11038 = vmatpush3.bf16.msra.mxu0 %v11861_v11 }
 0x29a   :  { %11039 = vmatprep.subr.bf16.mxu0 %v11628_v3 }
 0x34b   :  { %v1211_v54 = vpop.f32.mrb[12].mxu0 }
 0x34c   :  { %v1285_v55 = vadd.f32 %v1284_v45, %v1211_v54  ;;  %v10086_v56 = vpop.f32.mrb[13].mxu0 }
 0x34e   :  { %v1288_v57 = vadd.f32 %v11949_v27, %v1285_v55 }
 0x350   :  { %v9278_v58 = vmul.f32 -1.442695, %v1288_v57 }
 0x352   :  { %11466 = vpow2.f32 %v9278_v58 }
 0x353   :  { %v1361_v59 = vpop.f32.mrb[14].mxu0 }
 0x354   :  { %v1432_v60 = vadd.f32 %v1431_v47, %v1361_v59  ;;  %v10102_v61 = vpop.f32.mrb[15].mxu0 }
 0x356   :  { %v1435_v62 = vadd.f32 %v11953_v33, %v1432_v60 }
 0x358   :  { %v9282_v63 = vmul.f32 -1.442695, %v1435_v62 }
 0x35a   :  { %11468 = vpow2.f32 %v9282_v63 }
 0x35b   :  { %v1578_v0 = vpop.f32.mrb[16].mxu0 }
 0x35c   :  { %v11467_v1 = vpop.eup %11466  ;;  %v10123_v2 = vpop.f32.mrb[17].mxu0  ;;  %v1579_v10 = vadd.f32 %v11957_v48, %v1578_v0 }
 0x35d   :  { %v1292_v5 = vadd.f32 1.0, %v11467_v1 }
 0x35f   :  { %11470 = vrcp.f32 %v1292_v5  ;;  %v1733_v29 = vpop.f32.mrb[18].mxu0 }
 0x360   :  { %v10139_v30 = vpop.f32.mrb[19].mxu0 }
 0x363   :  { %v1880_v31 = vpop.f32.mrb[20].mxu0 }
 0x364   :  { %v11469_v8 = vpop.eup %11468  ;;  %v10155_v32 = vpop.f32.mrb[21].mxu0 }
 0x365   :  { %v1439_v9 = vadd.f32 1.0, %v11469_v8 }
 0x367   :  { %11472 = vrcp.f32 %v1439_v9  ;;  %v1957_v34 = vpop.f32.mrb[22].mxu0 }
 0x368   :  { %v10160_v35 = vpop.f32.mrb[23].mxu0  ;;  %v1958_v56 = vadd.f32 %v11960_v50, %v1957_v34 }
 0x369   :  { %v11471_v14 = vpop.eup %11470 }
 0x36a   :  { %v1582_v17 = vmul.f32 %v11471_v14, %v1579_v10  ;;  %v9310_v14 = vld [vmem:[%s11641_s5 + $0xa] sm:$0x3] }
 0x36c   :  { %v1583_v18 = vadd.f32 %v1582_v17, %v1509_v13 }
 0x36e   :  { %11474 = vtanh.f32 %v1583_v18 }
 0x371   :  { %v11473_v21 = vpop.eup %11472 }
 0x372   :  { %v1585_v22 = vsub.f32 1.0, %v11473_v21  ;;  %v1587_v26 = vmul.f32 %v11473_v21, %v12014_v44 }
 0x378   :  { %v11475_v24 = vpop.eup %11474 }
 0x379   :  { %v1586_v25 = vmul.f32 %v11475_v24, %v1585_v22 }
 0x37b   :  { %v12064_v28 = vadd.f32 %v1587_v26, %v1586_v25 }
 0x37d   :  { %10133 = vmatmul.mubr.msk.f32.vlgmr.msra.gmra.mrb[18].mxu1 %vm232_vm3, %v12064_v28 }
 0x37e   :  { %11023 = vmatpush3.bf16.msra.mxu1 %v11865_v12  ;;  %10148 = vmatprep.mubr.msk.f32.mxu1 %vm11630_vm1, %v11629_v6 }
 0x37f   :  { %11024 = vmatprep.subr.bf16.mxu1 %v11628_v3 }
 0x382   :  { %11026 = vmatpush3.bf16.msra.mxu1 %v11875_v15 }
 0x383   :  { %11027 = vmatprep.subr.bf16.mxu1 %v11628_v3 }
 0x385   :  { %10149 = vmatmul.mubr.msk.f32.vlgmr.msra.gmra.mrb[20].mxu1 %vm232_vm3, %v12064_v28 }
 0x386   :  { %11029 = vmatpush3.bf16.msra.mxu1 %v11891_v19  ;;  %10169 = vmatprep.mubr.msk.f32.mxu1 %vm11630_vm1, %v11629_v6 }
 0x387   :  { %11030 = vmatprep.subr.bf16.mxu1 %v11628_v3 }
 0x38a   :  { %11032 = vmatpush3.bf16.msra.mxu1 %v11905_v23 }
 0x38b   :  { %10183 = vmatprep.subr.mxu1 %v11629_v6 }
 0x38d   :  { %10170 = vmatmul.mubr.msk.f32.vlgmr.msra.gmra.mrb[22].mxu1 %vm232_vm3, %v12064_v28 }
 0x38e   :  { %10184 = vmatpush3.msk.msra.mxu1 %vm310_vm0, %v11851_v7  ;;  %10185 = vmatprep.mubr.msk.f32.mxu1 %vm11630_vm1, %v11629_v6 }
 0x38f   :  { %10199 = vmatprep.subr.mxu1 %v11629_v6 }
 0x391   :  { %10186 = vmatmul.mubr.msk.f32.vlgmr.msra.gmra.mrb[24].mxu1 %vm306_vm2, %v9298_v36 }
 0x392   :  { %10200 = vmatpush3.msk.msra.mxu1 %vm310_vm0, %v11881_v16  ;;  %10201 = vmatprep.mubr.msk.f32.mxu1 %vm11630_vm1, %v11629_v6 }
 0x393   :  { %10204 = vmatprep.subr.mxu1 %v11629_v6 }
 0x395   :  { %10202 = vmatmul.mubr.msk.f32.vlgmr.msra.gmra.mrb[26].mxu1 %vm306_vm2, %v9298_v36 }
 0x396   :  { %10205 = vmatpush3.msk.msra.mxu1 %vm310_vm0, %v11894_v20  ;;  %10206 = vmatprep.mubr.msk.f32.mxu1 %vm11630_vm1, %v11629_v6 }
 0x397   :  { %11051 = vmatprep.subr.bf16.mxu1 %v11628_v3 }
 0x399   :  { %10207 = vmatmul.mubr.msk.f32.vlgmr.msra.gmra.mrb[28].mxu1 %vm306_vm2, %v9298_v36 }
 0x39a   :  { %11053 = vmatpush3.bf16.msra.mxu1 %v11846_v4  ;;  %10228 = vmatprep.mubr.msk.f32.mxu1 %vm11630_vm1, %v11629_v6 }
 0x39b   :  { %11054 = vmatprep.subr.bf16.mxu1 %v11628_v3 }
 0x39e   :  { %11056 = vmatpush3.bf16.msra.mxu1 %v11861_v11 }
 0x39f   :  { %11057 = vmatprep.subr.bf16.mxu1 %v11628_v3 }
 0x450   :  { %v1660_v37 = vpop.f32.mrb[18].mxu1 }
 0x451   :  { %v1734_v38 = vadd.f32 %v1733_v29, %v1660_v37  ;;  %v10134_v39 = vpop.f32.mrb[19].mxu1 }
 0x453   :  { %v1737_v40 = vadd.f32 %v11949_v27, %v1734_v38 }
 0x455   :  { %v9290_v41 = vmul.f32 -1.442695, %v1737_v40 }
 0x457   :  { %11476 = vpow2.f32 %v9290_v41 }
 0x458   :  { %v1810_v42 = vpop.f32.mrb[20].mxu1 }
 0x459   :  { %v1881_v43 = vadd.f32 %v1880_v31, %v1810_v42  ;;  %v10150_v44 = vpop.f32.mrb[21].mxu1 }
 0x45b   :  { %v1884_v45 = vadd.f32 %v11953_v33, %v1881_v43 }
 0x45d   :  { %v9294_v46 = vmul.f32 -1.442695, %v1884_v45 }
 0x45f   :  { %11478 = vpow2.f32 %v9294_v46 }
 0x460   :  { %v2027_v47 = vpop.f32.mrb[22].mxu1 }
 0x461   :  { %v11477_v49 = vpop.eup %11476  ;;  %v10171_v51 = vpop.f32.mrb[23].mxu1  ;;  %v2028_v55 = vadd.f32 %v11957_v48, %v2027_v47 }
 0x462   :  { %v1741_v52 = vadd.f32 1.0, %v11477_v49 }
 0x464   :  { %11480 = vrcp.f32 %v1741_v52  ;;  %v2182_v2 = vpop.f32.mrb[24].mxu1 }
 0x465   :  { %v10187_v5 = vpop.f32.mrb[25].mxu1 }
 0x468   :  { %v2329_v8 = vpop.f32.mrb[26].mxu1 }
 0x469   :  { %v11479_v53 = vpop.eup %11478  ;;  %v10203_v9 = vpop.f32.mrb[27].mxu1 }
 0x46a   :  { %v1888_v54 = vadd.f32 1.0, %v11479_v53 }
 0x46c   :  { %11482 = vrcp.f32 %v1888_v54  ;;  %v2406_v10 = vpop.f32.mrb[28].mxu1 }
 0x46d   :  { %v10208_v13 = vpop.f32.mrb[29].mxu1  ;;  %v2407_v39 = vadd.f32 %v11960_v50, %v2406_v10 }
 0x46e   :  { %v11481_v57 = vpop.eup %11480 }
 0x46f   :  { %v2031_v58 = vmul.f32 %v11481_v57, %v2028_v55  ;;  %v9322_v57 = vld [vmem:[%s11641_s5 + $0xc] sm:$0x3] }
 0x471   :  { %v2032_v59 = vadd.f32 %v2031_v58, %v1958_v56 }
 0x473   :  { %11484 = vtanh.f32 %v2032_v59 }
 0x476   :  { %v11483_v60 = vpop.eup %11482 }
 0x477   :  { %v2034_v61 = vsub.f32 1.0, %v11483_v60  ;;  %v2036_v0 = vmul.f32 %v11483_v60, %v12064_v28 }
 0x47d   :  { %v11485_v62 = vpop.eup %11484 }
 0x47e   :  { %v2035_v63 = vmul.f32 %v11485_v62, %v2034_v61 }
 0x480   :  { %v12114_v1 = vadd.f32 %v2036_v0, %v2035_v63 }
 0x482   :  { %10181 = vmatmul.mubr.msk.f32.vlgmr.msra.gmra.mrb[24].mxu0 %vm232_vm3, %v12114_v1 }
 0x483   :  { %11041 = vmatpush3.bf16.msra.mxu0 %v11865_v12  ;;  %10196 = vmatprep.mubr.msk.f32.mxu0 %vm11630_vm1, %v11629_v6 }
 0x484   :  { %11042 = vmatprep.subr.bf16.mxu0 %v11628_v3 }
 0x487   :  { %11044 = vmatpush3.bf16.msra.mxu0 %v11875_v15 }
 0x488   :  { %11045 = vmatprep.subr.bf16.mxu0 %v11628_v3 }
 0x48a   :  { %10197 = vmatmul.mubr.msk.f32.vlgmr.msra.gmra.mrb[26].mxu0 %vm232_vm3, %v12114_v1 }
 0x48b   :  { %11047 = vmatpush3.bf16.msra.mxu0 %v11891_v19  ;;  %10217 = vmatprep.mubr.msk.f32.mxu0 %vm11630_vm1, %v11629_v6 }
 0x48c   :  { %11048 = vmatprep.subr.bf16.mxu0 %v11628_v3 }
 0x48f   :  { %11050 = vmatpush3.bf16.msra.mxu0 %v11905_v23 }
 0x490   :  { %10231 = vmatprep.subr.mxu0 %v11629_v6 }
 0x492   :  { %10218 = vmatmul.mubr.msk.f32.vlgmr.msra.gmra.mrb[28].mxu0 %vm232_vm3, %v12114_v1 }
 0x493   :  { %10232 = vmatpush3.msk.msra.mxu0 %vm310_vm0, %v11851_v7  ;;  %10233 = vmatprep.mubr.msk.f32.mxu0 %vm11630_vm1, %v11629_v6 }
 0x494   :  { %10247 = vmatprep.subr.mxu0 %v11629_v6 }
 0x496   :  { %10234 = vmatmul.mubr.msk.f32.vlgmr.msra.gmra.mrb[30].mxu0 %vm306_vm2, %v9310_v14 }
 0x497   :  { %10248 = vmatpush3.msk.msra.mxu0 %vm310_vm0, %v11881_v16  ;;  %10249 = vmatprep.mubr.msk.f32.mxu0 %vm11630_vm1, %v11629_v6 }
 0x498   :  { %10252 = vmatprep.subr.mxu0 %v11629_v6 }
 0x49a   :  { %10250 = vmatmul.mubr.msk.f32.vlgmr.msra.gmra.mrb[32].mxu0 %vm306_vm2, %v9310_v14 }
 0x49b   :  { %10253 = vmatpush3.msk.msra.mxu0 %vm310_vm0, %v11894_v20  ;;  %10254 = vmatprep.mubr.msk.f32.mxu0 %vm11630_vm1, %v11629_v6 }
 0x49c   :  { %11069 = vmatprep.subr.bf16.mxu0 %v11628_v3 }
 0x49e   :  { %10255 = vmatmul.mubr.msk.f32.vlgmr.msra.gmra.mrb[34].mxu0 %vm306_vm2, %v9310_v14 }
 0x49f   :  { %11071 = vmatpush3.bf16.msra.mxu0 %v11846_v4  ;;  %10276 = vmatprep.mubr.msk.f32.mxu0 %vm11630_vm1, %v11629_v6 }
 0x4a0   :  { %11072 = vmatprep.subr.bf16.mxu0 %v11628_v3 }
 0x4a3   :  { %11074 = vmatpush3.bf16.msra.mxu0 %v11861_v11 }
 0x4a4   :  { %11075 = vmatprep.subr.bf16.mxu0 %v11628_v3 }
 0x555   :  { %v2109_v17 = vpop.f32.mrb[24].mxu0 }
 0x556   :  { %v2183_v18 = vadd.f32 %v2182_v2, %v2109_v17  ;;  %v10182_v21 = vpop.f32.mrb[25].mxu0 }
 0x558   :  { %v2186_v22 = vadd.f32 %v11949_v27, %v2183_v18 }
 0x55a   :  { %v9302_v24 = vmul.f32 -1.442695, %v2186_v22 }
 0x55c   :  { %11486 = vpow2.f32 %v9302_v24 }
 0x55d   :  { %v2259_v25 = vpop.f32.mrb[26].mxu0 }
 0x55e   :  { %v2330_v26 = vadd.f32 %v2329_v8, %v2259_v25  ;;  %v10198_v28 = vpop.f32.mrb[27].mxu0 }
 0x560   :  { %v2333_v29 = vadd.f32 %v11953_v33, %v2330_v26 }
 0x562   :  { %v9306_v30 = vmul.f32 -1.442695, %v2333_v29 }
 0x564   :  { %11488 = vpow2.f32 %v9306_v30 }
 0x565   :  { %v2476_v31 = vpop.f32.mrb[28].mxu0 }
 0x566   :  { %v11487_v32 = vpop.eup %11486  ;;  %v10219_v34 = vpop.f32.mrb[29].mxu0  ;;  %v2477_v38 = vadd.f32 %v11957_v48, %v2476_v31 }
 0x567   :  { %v2190_v35 = vadd.f32 1.0, %v11487_v32 }
 0x569   :  { %11490 = vrcp.f32 %v2190_v35  ;;  %v2631_v51 = vpop.f32.mrb[30].mxu0 }
 0x56a   :  { %v10235_v52 = vpop.f32.mrb[31].mxu0 }
 0x56d   :  { %v2778_v53 = vpop.f32.mrb[32].mxu0 }
 0x56e   :  { %v11489_v36 = vpop.eup %11488  ;;  %v10251_v54 = vpop.f32.mrb[33].mxu0 }
 0x56f   :  { %v2337_v37 = vadd.f32 1.0, %v11489_v36 }
 0x571   :  { %11492 = vrcp.f32 %v2337_v37  ;;  %v2855_v55 = vpop.f32.mrb[34].mxu0 }
 0x572   :  { %v10256_v56 = vpop.f32.mrb[35].mxu0  ;;  %v2856_v17 = vadd.f32 %v11960_v50, %v2855_v55 }
 0x573   :  { %v11491_v40 = vpop.eup %11490 }
 0x574   :  { %v2480_v41 = vmul.f32 %v11491_v40, %v2477_v38  ;;  %v9334_v38 = vld [vmem:[%s11641_s5 + $0xe] sm:$0x3]  ;;  %s13164_s5 = sld [smem:[#allocation10_spill]] }
 0x576   :  { %v2481_v42 = vadd.f32 %v2480_v41, %v2407_v39 }
 0x578   :  { %11494 = vtanh.f32 %v2481_v42 }
 0x57b   :  { %v11493_v43 = vpop.eup %11492 }
 0x57c   :  { %v2483_v44 = vsub.f32 1.0, %v11493_v43  ;;  %v2485_v47 = vmul.f32 %v11493_v43, %v12114_v1 }
 0x582   :  { %v11495_v45 = vpop.eup %11494 }
 0x583   :  { %v2484_v46 = vmul.f32 %v11495_v45, %v2483_v44 }
 0x585   :  { %v12164_v49 = vadd.f32 %v2485_v47, %v2484_v46 }
 0x587   :  { %10229 = vmatmul.mubr.msk.f32.vlgmr.msra.gmra.mrb[30].mxu1 %vm232_vm3, %v12164_v49 }
 0x588   :  { %11059 = vmatpush3.bf16.msra.mxu1 %v11865_v12  ;;  %10244 = vmatprep.mubr.msk.f32.mxu1 %vm11630_vm1, %v11629_v6 }
 0x589   :  { %11060 = vmatprep.subr.bf16.mxu1 %v11628_v3 }
 0x58c   :  { %11062 = vmatpush3.bf16.msra.mxu1 %v11875_v15 }
 0x58d   :  { %11063 = vmatprep.subr.bf16.mxu1 %v11628_v3 }
 0x58f   :  { %10245 = vmatmul.mubr.msk.f32.vlgmr.msra.gmra.mrb[32].mxu1 %vm232_vm3, %v12164_v49 }
 0x590   :  { %11065 = vmatpush3.bf16.msra.mxu1 %v11891_v19  ;;  %10265 = vmatprep.mubr.msk.f32.mxu1 %vm11630_vm1, %v11629_v6 }
 0x591   :  { %11066 = vmatprep.subr.bf16.mxu1 %v11628_v3 }
 0x594   :  { %11068 = vmatpush3.bf16.msra.mxu1 %v11905_v23 }
 0x595   :  { %10279 = vmatprep.subr.mxu1 %v11629_v6 }
 0x597   :  { %10266 = vmatmul.mubr.msk.f32.vlgmr.msra.gmra.mrb[34].mxu1 %vm232_vm3, %v12164_v49 }
 0x598   :  { %10280 = vmatpush3.msk.msra.mxu1 %vm310_vm0, %v11851_v7  ;;  %10281 = vmatprep.mubr.msk.f32.mxu1 %vm11630_vm1, %v11629_v6 }
 0x599   :  { %10295 = vmatprep.subr.mxu1 %v11629_v6 }
 0x59b   :  { %10282 = vmatmul.mubr.msk.f32.vlgmr.msra.gmra.mrb[36].mxu1 %vm306_vm2, %v9322_v57 }
 0x59c   :  { %10296 = vmatpush3.msk.msra.mxu1 %vm310_vm0, %v11881_v16  ;;  %10297 = vmatprep.mubr.msk.f32.mxu1 %vm11630_vm1, %v11629_v6 }
 0x59d   :  { %10300 = vmatprep.subr.mxu1 %v11629_v6 }
 0x59f   :  { %10298 = vmatmul.mubr.msk.f32.vlgmr.msra.gmra.mrb[38].mxu1 %vm306_vm2, %v9322_v57 }
 0x5a0   :  { %10301 = vmatpush3.msk.msra.mxu1 %vm310_vm0, %v11894_v20  ;;  %10302 = vmatprep.mubr.msk.f32.mxu1 %vm11630_vm1, %v11629_v6 }
 0x5a1   :  { %11087 = vmatprep.subr.bf16.mxu1 %v11628_v3 }
 0x5a3   :  { %10303 = vmatmul.mubr.msk.f32.vlgmr.msra.gmra.mrb[40].mxu1 %vm306_vm2, %v9322_v57 }
 0x5a4   :  { %11089 = vmatpush3.bf16.msra.mxu1 %v11846_v4  ;;  %10324 = vmatprep.mubr.msk.f32.mxu1 %vm11630_vm1, %v11629_v6 }
 0x5a5   :  { %11090 = vmatprep.subr.bf16.mxu1 %v11628_v3 }
 0x5a8   :  { %11092 = vmatpush3.bf16.msra.mxu1 %v11861_v11 }
 0x5a9   :  { %11093 = vmatprep.subr.bf16.mxu1 %v11628_v3 }
 0x65a   :  { %v2558_v58 = vpop.f32.mrb[30].mxu1 }
 0x65b   :  { %v2632_v59 = vadd.f32 %v2631_v51, %v2558_v58  ;;  %v10230_v60 = vpop.f32.mrb[31].mxu1 }
 0x65d   :  { %v2635_v61 = vadd.f32 %v11949_v27, %v2632_v59 }
 0x65f   :  { %v9314_v62 = vmul.f32 -1.442695, %v2635_v61 }
 0x661   :  { %11496 = vpow2.f32 %v9314_v62 }
 0x662   :  { %v2708_v63 = vpop.f32.mrb[32].mxu1 }
 0x663   :  { %v2779_v0 = vadd.f32 %v2778_v53, %v2708_v63  ;;  %v10246_v1 = vpop.f32.mrb[33].mxu1 }
 0x665   :  { %v2782_v4 = vadd.f32 %v11953_v33, %v2779_v0 }
 0x667   :  { %v9318_v2 = vmul.f32 -1.442695, %v2782_v4 }
 0x669   :  { %11498 = vpow2.f32 %v9318_v2 }
 0x66a   :  { %v2925_v5 = vpop.f32.mrb[34].mxu1 }
 0x66b   :  { %v11497_v8 = vpop.eup %11496  ;;  %v10267_v9 = vpop.f32.mrb[35].mxu1  ;;  %v2926_v14 = vadd.f32 %v11957_v48, %v2925_v5  ;;  %v3834_v5 = vld [vmem:[%s11696_s24] sm:$0xff] }
 0x66c   :  { %v2639_v11 = vadd.f32 1.0, %v11497_v8  ;;  %v3835_v8 = vld [vmem:[%s11696_s24 + $0x8] sm:$0xff]  ;;  %v3836_v9 = vld [vmem:[%s11696_s24 + $0x10] sm:$0xff] }
 0x66e   :  { %11500 = vrcp.f32 %v2639_v11  ;;  %v3080_v31 = vpop.f32.mrb[36].mxu1  ;;  %v11106_v11 = vpack.c.bf16 %v3835_v8, %v3834_v5  ;;  %v9365_v8 = vld [vmem:[%s13167_s17 + $0x40] sm:$0xf] }
 0x66f   :  { %v10283_v32 = vpop.f32.mrb[37].mxu1 }
 0x672   :  { %v3227_v34 = vpop.f32.mrb[38].mxu1 }
 0x673   :  { %v11499_v10 = vpop.eup %11498  ;;  %v10299_v35 = vpop.f32.mrb[39].mxu1 }
 0x674   :  { %v2786_v13 = vadd.f32 1.0, %v11499_v10  ;;  %v3837_v10 = vld [vmem:[%s11696_s24 + $0x18] sm:$0xff]  ;;  %s13175_s24 = sld [smem:[#allocation15_spill]] }
 0x676   :  { %11502 = vrcp.f32 %v2786_v13  ;;  %v3304_v36 = vpop.f32.mrb[40].mxu1 }
 0x677   :  { %v10304_v37 = vpop.f32.mrb[41].mxu1  ;;  %v3305_v55 = vadd.f32 %v11960_v50, %v3304_v36 }
 0x678   :  { %v11501_v18 = vpop.eup %11500 }
 0x679   :  { %v2929_v21 = vmul.f32 %v11501_v18, %v2926_v14 }
 0x67b   :  { %v2930_v22 = vadd.f32 %v2929_v21, %v2856_v17 }
 0x67d   :  { %11504 = vtanh.f32 %v2930_v22 }
 0x680   :  { %v11503_v24 = vpop.eup %11502 }
 0x681   :  { %v2932_v25 = vsub.f32 1.0, %v11503_v24  ;;  %v2934_v29 = vmul.f32 %v11503_v24, %v12164_v49 }
 0x687   :  { %v11505_v26 = vpop.eup %11504 }
 0x688   :  { %v2933_v28 = vmul.f32 %v11505_v26, %v2932_v25 }
 0x68a   :  { %v12214_v30 = vadd.f32 %v2934_v29, %v2933_v28 }
 0x68c   :  { %10277 = vmatmul.mubr.msk.f32.vlgmr.msra.gmra.mrb[36].mxu0 %vm232_vm3, %v12214_v30 }
 0x68d   :  { %11077 = vmatpush3.bf16.msra.mxu0 %v11865_v12  ;;  %10292 = vmatprep.mubr.msk.f32.mxu0 %vm11630_vm1, %v11629_v6 }
 0x68e   :  { %11078 = vmatprep.subr.bf16.mxu0 %v11628_v3 }
 0x691   :  { %11080 = vmatpush3.bf16.msra.mxu0 %v11875_v15 }
 0x692   :  { %11081 = vmatprep.subr.bf16.mxu0 %v11628_v3 }
 0x694   :  { %10293 = vmatmul.mubr.msk.f32.vlgmr.msra.gmra.mrb[38].mxu0 %vm232_vm3, %v12214_v30 }
 0x695   :  { %11083 = vmatpush3.bf16.msra.mxu0 %v11891_v19  ;;  %10313 = vmatprep.mubr.msk.f32.mxu0 %vm11630_vm1, %v11629_v6 }
 0x696   :  { %11084 = vmatprep.subr.bf16.mxu0 %v11628_v3 }
 0x699   :  { %11086 = vmatpush3.bf16.msra.mxu0 %v11905_v23 }
 0x69a   :  { %10327 = vmatprep.subr.mxu0 %v11629_v6 }
 0x69c   :  { %10314 = vmatmul.mubr.msk.f32.vlgmr.msra.gmra.mrb[40].mxu0 %vm232_vm3, %v12214_v30 }
 0x69d   :  { %10328 = vmatpush3.msk.msra.mxu0 %vm310_vm0, %v11851_v7  ;;  %10329 = vmatprep.mubr.msk.f32.mxu0 %vm11630_vm1, %v11629_v6 }
 0x69e   :  { %10343 = vmatprep.subr.mxu0 %v11629_v6 }
 0x6a0   :  { %10330 = vmatmul.mubr.msk.f32.vlgmr.msra.gmra.mrb[42].mxu0 %vm306_vm2, %v9334_v38 }
 0x6a1   :  { %10344 = vmatpush3.msk.msra.mxu0 %vm310_vm0, %v11881_v16  ;;  %10345 = vmatprep.mubr.msk.f32.mxu0 %vm11630_vm1, %v11629_v6 }
 0x6a2   :  { %10348 = vmatprep.subr.mxu0 %v11629_v6 }
 0x6a4   :  { %10346 = vmatmul.mubr.msk.f32.vlgmr.msra.gmra.mrb[44].mxu0 %vm306_vm2, %v9334_v38 }
 0x6a5   :  { %10349 = vmatpush3.msk.msra.mxu0 %vm310_vm0, %v11894_v20  ;;  %10350 = vmatprep.mubr.msk.f32.mxu0 %vm11630_vm1, %v11629_v6  ;;  %vm7939_vm0 = vcmask 237568  }
 0x6a6   :  { %11105 = vmatprep.subr.bf16.mxu0 %v11628_v3 }
 0x6a8   :  { %10351 = vmatmul.mubr.msk.f32.vlgmr.msra.gmra.mrb[46].mxu0 %vm306_vm2, %v9334_v38 }
 0x6a9   :  { %10372 = vmatprep.mubr.msk.f32.mxu0 %vm11630_vm1, %v11629_v6  ;;  %11107 = vmatpush3.bf16.msra.mxu0 %v11106_v11 }
 0x6aa   :  { %11108 = vmatprep.subr.bf16.mxu0 %v11628_v3 }
 0x75f   :  { %v3007_v7 = vpop.f32.mrb[36].mxu0 }
 0x760   :  { %v3081_v16 = vadd.f32 %v3080_v31, %v3007_v7  ;;  %v10278_v39 = vpop.f32.mrb[37].mxu0 }
 0x762   :  { %v3084_v40 = vadd.f32 %v11949_v27, %v3081_v16 }
 0x764   :  { %v9326_v41 = vmul.f32 -1.442695, %v3084_v40 }
 0x766   :  { %11506 = vpow2.f32 %v9326_v41 }
 0x767   :  { %v3157_v42 = vpop.f32.mrb[38].mxu0 }
 0x768   :  { %v3228_v43 = vadd.f32 %v3227_v34, %v3157_v42  ;;  %v10294_v20 = vpop.f32.mrb[39].mxu0 }
 0x769   :  { %v4085_v20 = vld [vmem:[%s13167_s17] sm:$0xff] }
 0x76a   :  { %v3231_v44 = vadd.f32 %v11953_v33, %v3228_v43  ;;  %v3998_v43 = vld [vmem:[%s13164_s5] sm:$0x1]  ;;  %s9440_s5 = sld [smem:[#allocation4 + $0x3]] }
 0x76c   :  { %v9330_v45 = vmul.f32 -1.442695, %v3231_v44  ;;  %v4086_v44 = vld [vmem:[%s13167_s17 + $0x8] sm:$0xff] }
 0x76e   :  { %11508 = vpow2.f32 %v9330_v45 }
 0x76f   :  { %v3374_v46 = vpop.f32.mrb[40].mxu0 }
 0x770   :  { %v11507_v47 = vpop.eup %11506  ;;  %v10315_v49 = vpop.f32.mrb[41].mxu0  ;;  %v3375_v54 = vadd.f32 %v11957_v48, %v3374_v46 }
 0x771   :  { %v3088_v51 = vadd.f32 1.0, %v11507_v47  ;;  %v3918_v49 = vld [vmem:[%s13168_s21] sm:$0x3f] }
 0x773   :  { %11510 = vrcp.f32 %v3088_v51  ;;  %v11112_v51 = vpack.c.bf16 %v4086_v44, %v4085_v20  ;;  %v4618_v20 = vld [vmem:[%s13176_s30] sm:$0xff]  ;;  %v4619_v44 = vld [vmem:[%s13176_s30 + $0x8] sm:$0xff] }
 0x778   :  { %v11509_v52 = vpop.eup %11508 }
 0x779   :  { %v3235_v53 = vadd.f32 1.0, %v11509_v52  ;;  %v9350_v52 = vld [vmem:[%s13169_s25] ss:$0 sm:$0xff] }
 0x77b   :  { %11512 = vrcp.f32 %v3235_v53 }
 0x77d   :  { %v11511_v56 = vpop.eup %11510 }
 0x77e   :  { %v3378_v57 = vmul.f32 %v11511_v56, %v3375_v54  ;;  %v4087_v56 = vld [vmem:[%s13167_s17 + $0x10] sm:$0xf] }
 0x780   :  { %v3379_v58 = vadd.f32 %v3378_v57, %v3305_v55 }
 0x782   :  { %11514 = vtanh.f32 %v3379_v58  ;;  %v9356_v58 = vld [vmem:[%s13167_s17 + $0x18] sm:$0xff] }
 0x785   :  { %v11513_v59 = vpop.eup %11512 }
 0x786   :  { %v3381_v60 = vsub.f32 1.0, %v11513_v59  ;;  %v3383_v63 = vmul.f32 %v11513_v59, %v12214_v30  ;;  %v9357_v59 = vld [vmem:[%s13167_s17 + $0x20] sm:$0xff] }
 0x78c   :  { %v11515_v61 = vpop.eup %11514 }
 0x78d   :  { %v3382_v62 = vmul.f32 %v11515_v61, %v3381_v60  ;;  %v11115_v60 = vpack.c.bf16 %v9357_v59, %v9356_v58  ;;  %v9358_v61 = vld [vmem:[%s13167_s17 + $0x28] sm:$0xf] }
 0x78f   :  { %v3384_v0 = vadd.f32 %v3383_v63, %v3382_v62 }
 0x791   :  { %10325 = vmatmul.mubr.msk.f32.vlgmr.msra.gmra.mrb[42].mxu1 %vm232_vm3, %v3384_v0 }
 0x792   :  { %11095 = vmatpush3.bf16.msra.mxu1 %v11865_v12  ;;  %10340 = vmatprep.mubr.msk.f32.mxu1 %vm11630_vm1, %v11629_v6  ;;  %v3529_v12 = vpop.f32.mrb[42].mxu0 }
 0x793   :  { %11096 = vmatprep.subr.bf16.mxu1 %v11628_v3 }
 0x796   :  { %11098 = vmatpush3.bf16.msra.mxu1 %v11875_v15  ;;  %v10331_v15 = vpop.f32.mrb[43].mxu0 }
 0x797   :  { %11099 = vmatprep.subr.bf16.mxu1 %v11628_v3  ;;  %v3676_v1 = vpop.f32.mrb[44].mxu0 }
 0x798   :  { %v10347_v4 = vpop.f32.mrb[45].mxu0 }
 0x799   :  { %10341 = vmatmul.mubr.msk.f32.vlgmr.msra.gmra.mrb[44].mxu1 %vm232_vm3, %v3384_v0 }
 0x79a   :  { %11101 = vmatpush3.bf16.msra.mxu1 %v11891_v19  ;;  %10361 = vmatprep.mubr.msk.f32.mxu1 %vm11630_vm1, %v11629_v6  ;;  %v3753_v19 = vpop.f32.mrb[46].mxu0 }
 0x79b   :  { %11102 = vmatprep.subr.bf16.mxu1 %v11628_v3  ;;  %v10352_v2 = vpop.f32.mrb[47].mxu0 }
 0x79c   :  { %v9364_v2 = vld [vmem:[%s13167_s17 + $0x38] sm:$0xff] }
 0x79e   :  { %11104 = vmatpush3.bf16.msra.mxu1 %v11905_v23  ;;  %v11109_v23 = vpack.c.bf16 %v3837_v10, %v3836_v9  ;;  %v9360_v9 = vld [vmem:[%s13170_s29 + $0x1] ss:$0 sm:$0xff] }
 0x79f   :  { %10375 = vmatprep.subr.mxu1 %v11629_v6 }
 0x7a0   :  { %11110 = vmatpush3.bf16.msra.mxu0 %v11109_v23 }
 0x7a1   :  { %10362 = vmatmul.mubr.msk.f32.vlgmr.msra.gmra.mrb[46].mxu1 %vm232_vm3, %v3384_v0  ;;  %10380 = vmatprep.subr.mxu0 %v11629_v6 }
 0x7a2   :  { %10377 = vmatprep.mubr.msk.f32.mxu1 %vm11630_vm1, %v11629_v6 }
 0x864   :  { %v3456_v13 = vpop.f32.mrb[42].mxu1 }
 0x865   :  { %v3530_v14 = vadd.f32 %v3529_v12, %v3456_v13  ;;  %v10326_v17 = vpop.f32.mrb[43].mxu1 }
 0x866   :  { %v9371_v17 = vld [vmem:[%s13167_s17 + $0x50] sm:$0xff] }
 0x867   :  { %v3533_v18 = vadd.f32 %v11949_v27, %v3530_v14  ;;  %v3754_v27 = vadd.f32 %v11960_v50, %v3753_v19  ;;  %v9346_v50 = vld [vmem:[%s13166_s13] ss:$0 sm:$0xff]  ;;  %v9363_v19 = vld [vmem:[%s13167_s17 + $0x30] sm:$0xff]  ;;  %v9370_v14 = vld [vmem:[%s13167_s17 + $0x48] sm:$0xff]  ;;  %s13188_s13 = sld [smem:[#allocation29_spill]] }
 0x868   :  { %v11118_v5 = vpack.c.bf16 %v9364_v2, %v9363_v19 }
 0x869   :  { %v9338_v21 = vmul.f32 -1.442695, %v3533_v18  ;;  %v11121_v18 = vpack.c.bf16 %v9371_v17, %v9370_v14  ;;  %v12428_v17 = vld [vmem:[%s13176_s30 + $0x48] sm:$0xff] }
 0x86b   :  { %11516 = vpow2.f32 %v9338_v21  ;;  %v9372_v21 = vld [vmem:[%s13167_s17 + $0x58] sm:$0xf] }
 0x86c   :  { %v3606_v22 = vpop.f32.mrb[44].mxu1 }
 0x86d   :  { %v3677_v24 = vadd.f32 %v3676_v1, %v3606_v22  ;;  %v10342_v25 = vpop.f32.mrb[45].mxu1  ;;  %v9367_v22 = vld [vmem:[%s13170_s29 + $0x2] ss:$0 sm:$0xff] }
 0x86f   :  { %v3680_v26 = vadd.f32 %v11953_v33, %v3677_v24 }
 0x871   :  { %v9342_v28 = vmul.f32 -1.442695, %v3680_v26 }
 0x873   :  { %11518 = vpow2.f32 %v9342_v28 }
 0x874   :  { %v3823_v29 = vpop.f32.mrb[46].mxu1 }
 0x875   :  { %v11517_v30 = vpop.eup %11516  ;;  %v10363_v31 = vpop.f32.mrb[47].mxu1  ;;  %v3824_v36 = vadd.f32 %v11957_v48, %v3823_v29  ;;  %v3997_v48 = vld [vmem:[%s13165_s9] sm:$0xf]  ;;  %s13186_s9 = sld [smem:[#allocation27_spill]] }
 0x876   :  { %v3537_v32 = vadd.f32 1.0, %v11517_v30  ;;  %v4441_v29 = vld [vmem:[%s13171_s3] sm:$0xff]  ;;  %v4442_v30 = vld [vmem:[%s13171_s3 + $0x8] sm:$0xff] }
 0x877   :  { %v11124_v31 = vpack.c.bf16 %v4442_v30, %v4441_v29  ;;  %v9390_v29 = vld [vmem:[%s13176_s30 + $0x60] sm:$0xff] }
 0x878   :  { %11520 = vrcp.f32 %v3537_v32  ;;  %v4443_v32 = vld [vmem:[%s13171_s3 + $0x10] sm:$0xf] }
 0x87d   :  { %v11519_v34 = vpop.eup %11518 }
 0x87e   :  { %v3684_v35 = vadd.f32 1.0, %v11519_v34  ;;  %v9374_v34 = vld [vmem:[%s13170_s29 + $0x3] ss:$0 sm:$0xff] }
 0x880   :  { %11522 = vrcp.f32 %v3684_v35 }
 0x882   :  { %v11521_v37 = vpop.eup %11520 }
 0x883   :  { %v3827_v38 = vmul.f32 %v11521_v37, %v3824_v36 }
 0x885   :  { %v3828_v7 = vadd.f32 %v3827_v38, %v3754_v27  ;;  %v4527_v38 = vld [vmem:[%s13172_s8] sm:$0x3] }
 0x887   :  { %11524 = vtanh.f32 %v3828_v7  ;;  %v4679_v7 = vld [vmem:[%s13173_s14] sm:$0x3f] }
 0x88a   :  { %v11523_v33 = vpop.eup %11522 }
 0x88b   :  { %v3830_v16 = vsub.f32 1.0, %v11523_v33  ;;  %v3832_v41 = vmul.f32 %v11523_v33, %v3384_v0  ;;  %v9353_v0 = vld [vmem:[%s13170_s29] ss:$0 sm:$0xff]  ;;  %v11631_v33 = vmov 0  }
 0x88c   :  { %11445 = vset.pattern.permute.xlu0 %v11631_v33  ;;  %v9394_v33 = vld [vmem:[%s13176_s30 + $0x80] sm:$0xff] }
 0x88d   :  { %4688 = vperm.xlu0 %11445, %v4679_v7   ;;  %v9393_v7 = vld [vmem:[%s13176_s30 + $0x78] sm:$0xff] }
 0x891   :  { %v11525_v39 = vpop.eup %11524 }
 0x892   :  { %v3831_v40 = vmul.f32 %v11525_v39, %v3830_v16  ;;  %v4604_v16 = vld [vmem:[%s13174_s19] sm:$0xff]  ;;  %v4605_v39 = vld [vmem:[%s13174_s19 + $0x8] sm:$0x3] }
 0x894   :  { %v3833_v42 = vadd.f32 %v3832_v41, %v3831_v40  ;;  %v9377_v40 = vld [vmem:[%s13175_s24] ss:$0 sm:$0xff] }
 0x896   :  { %10373 = vmatmul.mubr.msk.f32.vlgmr.msra.gmra.mrb[48].mxu0 %vm232_vm3, %v3833_v42  ;;  %v12364_v42 = vpack.c.bf16 %v4605_v39, %v4604_v16  ;;  %v9395_v16 = vld [vmem:[%s13176_s30 + $0x88] sm:$0xff]  ;;  %v12466_v39 = vpack.c.bf16 %v9394_v33, %v9393_v7 }
 0x897   :  { %10381 = vmatpush3.msk.msra.mxu0 %vm4010_vm4, %v3998_v43  ;;  %10382 = vmatprep.mubr.msk.f32.mxu0 %vm11630_vm1, %v11629_v6 }
 0x898   :  { %11114 = vmatprep.subr.bf16.mxu0 %v11628_v3 }
 0x89a   :  { %10383 = vmatmul.mubr.msk.f32.vlgmr.msra.gmra.mrb[50].mxu0 %vm4006_vm5, %v3997_v48 }
 0x89b   :  { %10400 = vmatprep.mubr.msk.f32.mxu0 %vm11630_vm1, %v11629_v6  ;;  %11116 = vmatpush3.bf16.msra.mxu0 %v11115_v60 }
 0x89c   :  { %10398 = vmatprep.subr.mxu0 %v11629_v6 }
 0x89f   :  { %10399 = vmatpush3.msk.msra.mxu0 %vm4099_vm8, %v9358_v61 }
 0x8a0   :  { %11120 = vmatprep.subr.bf16.mxu0 %v11628_v3 }
 0x90c   :  { %v12399_v59 = vpop.permute.xlu0 %4688 }
 0x969   :  { %v3914_v45 = vpop.f32.mrb[48].mxu0 }
 0x96a   :  { %v3915_v46 = vadd.f32 %v9346_v50, %v3914_v45  ;;  %v10374_v47 = vpop.f32.mrb[49].mxu0  ;;  %v12384_v45 = vpack.c.bf16 %v4619_v44, %v4618_v20 }
 0x96b   :  { %v4621_v47 = vld [vmem:[%s13176_s30 + $0x18] sm:$0xff] }
 0x96c   :  { %10376 = vmatpush3.msk.msra.mxu1 %vm3923_vm6, %v3915_v46  ;;  %v4620_v46 = vld [vmem:[%s13176_s30 + $0x10] sm:$0xff] }
 0x96d   :  { %11111 = vmatprep.subr.bf16.mxu1 %v11628_v3  ;;  %10378 = vmatmul.mubr.msk.f32.vlgmr.msra.gmra.mrb[48].mxu1 %vm3919_vm7, %v3918_v49  ;;  %v4080_v53 = vpop.f32.mrb[50].mxu0  ;;  %v12390_v49 = vpack.c.bf16 %v4621_v47, %v4620_v46 }
 0x96e   :  { %v4081_v54 = vadd.f32 %v9350_v52, %v4080_v53  ;;  %11113 = vmatpush3.bf16.msra.mxu1 %v11112_v51  ;;  %v10384_v55 = vpop.f32.mrb[51].mxu0  ;;  %10391 = vmatprep.mubr.msk.f32.mxu1 %vm11630_vm1, %v11629_v6  ;;  %v12395_v51 = vld [vmem:[%s13176_s30 + $0x20] sm:$0xff]  ;;  %v4691_v52 = vlaneseq }
 0x96f   :  { %10389 = vmatprep.subr.mxu1 %v11629_v6 }
 0x970   :  { %v4084_v57 = vmax.f32 %v4081_v54, 0.0  ;;  %v4692_v53 = vshrl.u32 %v4691_v52, 7  ;;  %v4606_v52 = vld [vmem:[%s13181_s16] sm:$0xff] }
 0x972   :  { %10390 = vmatpush3.msk.msra.mxu1 %vm4099_vm8, %v4087_v56  ;;  %v4693_v54 = vsub.s32 0, %v4692_v53  ;;  %v5171_v55 = vsub.s32 1, %v4692_v53  ;;  %v5645_v56 = vsub.s32 2, %v4692_v53 }
 0x973   :  { %10392 = vmatmul.mubr.msk.f32.vlgmr.msra.gmra.mrb[50].mxu1 %vm4095_vm9, %v4084_v57  ;;  %11117 = vmatprep.subr.bf16.mxu1 %v11628_v3  ;;  %v6119_v57 = vsub.s32 3, %v4692_v53  ;;  %v4607_v53 = vld [vmem:[%s13181_s16 + $0x8] sm:$0xff] }
 0x974   :  { %10409 = vmatprep.mubr.msk.f32.mxu1 %vm11630_vm1, %v11629_v6  ;;  %11119 = vmatpush3.bf16.msra.mxu1 %v11118_v5 }
 0x975   :  { %10407 = vmatprep.subr.mxu1 %v11629_v6 }
 0x978   :  { %10408 = vmatpush3.msk.msra.mxu1 %vm4099_vm8, %v9365_v8 }
 0x979   :  { %11123 = vmatprep.subr.bf16.mxu1 %v11628_v3 }
 0xa40   :  { %v12318_v62 = vpop.f32.mrb[48].mxu1 }
 0xa41   :  { %v10379_v63 = vpop.f32.mrb[49].mxu1  ;;  %4681 = vst.msk [vmem:[%s11829_s20] sm:$0x3f] %vm4680_vm10, %v12318_v62 }
 0xa46   :  { %v4169_v12 = vpop.f32.mrb[50].mxu1 }
 0xa47   :  { %v4170_v15 = vadd.f32 %v9353_v0, %v4169_v12  ;;  %v10393_v1 = vpop.f32.mrb[51].mxu1 }
 0xa48   :  { %v12409_v1 = vld [vmem:[%s13179_s6] ss:$0 sm:$0xff] }
 0xa49   :  { %v4173_v4 = vmax.f32 %v4170_v15, 0.0 }
 0xa4b   :  { %10401 = vmatmul.mubr.msk.f32.vlgmr.msra.gmra.mrb[52].mxu0 %vm4095_vm9, %v4173_v4 }
 0xa4c   :  { %10418 = vmatprep.mubr.msk.f32.mxu0 %vm11630_vm1, %v11629_v6  ;;  %11122 = vmatpush3.bf16.msra.mxu0 %v11121_v18  ;;  %v12433_v18 = vld [vmem:[%s13180_s11] ss:$0 sm:$0xff] }
 0xa4d   :  { %10416 = vmatprep.subr.mxu0 %v11629_v6 }
 0xa50   :  { %10417 = vmatpush3.msk.msra.mxu0 %vm4099_vm8, %v9372_v21 }
 0xa51   :  { %10430 = vmatprep.subr.mxu0 %v11629_v6 }
 0xb1e   :  { %v4258_v11 = vpop.f32.mrb[52].mxu0 }
 0xb1f   :  { %v4259_v10 = vadd.f32 %v9360_v9, %v4258_v11  ;;  %v10402_v23 = vpop.f32.mrb[53].mxu0  ;;  %v9383_v9 = vld [vmem:[%s13176_s30 + $0x28] sm:$0xff]  ;;  %v9384_v11 = vld [vmem:[%s13176_s30 + $0x30] sm:$0xff] }
 0xb20   :  { %v12418_v23 = vpack.c.bf16 %v9384_v11, %v9383_v9  ;;  %v5145_v9 = vsub.f32 0.5, %v12318_v62 }
 0xb21   :  { %v4262_v13 = vmax.f32 %v4259_v10, 0.0  ;;  %v9385_v10 = vld [vmem:[%s13176_s30 + $0x38] sm:$0xff] }
 0xb23   :  { %10410 = vmatmul.mubr.msk.f32.vlgmr.msra.gmra.mrb[52].mxu1 %vm4095_vm9, %v4262_v13  ;;  %v9386_v13 = vld [vmem:[%s13176_s30 + $0x40] sm:$0xff] }
 0xb24   :  { %10427 = vmatprep.mubr.msk.f32.mxu1 %vm11630_vm1, %v11629_v6  ;;  %11125 = vmatpush3.bf16.msra.mxu1 %v11124_v31  ;;  %v12422_v14 = vpack.c.bf16 %v9386_v13, %v9385_v10  ;;  %v9391_v31 = vld [vmem:[%s13176_s30 + $0x68] sm:$0xff]  ;;  %v5154_v10 = vstv %s12524_s23  ;;  %v5157_v13 = vld [vmem:[%s13183_s18] sm:$0x3f] }
 0xb25   :  { %10425 = vmatprep.subr.mxu1 %v11629_v6 }
 0xb28   :  { %10426 = vmatpush3.msk.msra.mxu1 %vm4099_vm8, %v4443_v32  ;;  %v12446_v32 = vpack.c.bf16 %v9391_v31, %v9390_v29 }
 0xb29   :  { %11130 = vmatprep.subr.bf16.mxu1 %v11628_v3 }
 0xbf6   :  { %v4347_v24 = vpop.f32.mrb[52].mxu1 }
 0xbf7   :  { %v4348_v25 = vadd.f32 %v9367_v22, %v4347_v24  ;;  %v10411_v26 = vpop.f32.mrb[53].mxu1 }
 0xbf8   :  { %v9388_v26 = vld [vmem:[%s13176_s30 + $0x50] sm:$0xff] }
 0xbf9   :  { %v4351_v28 = vmax.f32 %v4348_v25, 0.0 }
 0xbfb   :  { %10419 = vmatmul.mubr.msk.f32.vlgmr.msra.gmra.mrb[54].mxu0 %vm4095_vm9, %v4351_v28  ;;  %v9389_v28 = vld [vmem:[%s13176_s30 + $0x58] sm:$0xff] }
 0xbfc   :  { %10432 = vmatprep.mubr.msk.f32.mxu0 %vm11630_vm1, %v11629_v6  ;;  %10431 = vmatpush3.msk.msra.mxu0 %vm3923_vm6, %v4527_v38  ;;  %v12442_v30 = vpack.c.bf16 %v9389_v28, %v9388_v26 }
 0xbfd   :  { %11126 = vmatprep.subr.bf16.mxu0 %v11628_v3 }
 0xcce   :  { %v4436_v35 = vpop.f32.mrb[54].mxu0 }
 0xccf   :  { %v4437_v36 = vadd.f32 %v9374_v34, %v4436_v35  ;;  %v10420_v27 = vpop.f32.mrb[55].mxu0  ;;  %v12452_v34 = vld [vmem:[%s13176_s30 + $0x70] sm:$0xff]  ;;  %v12457_v35 = vld [vmem:[%s13180_s11 + $0x1] ss:$0 sm:$0xff] }
 0xcd1   :  { %v4440_v37 = vmax.f32 %v4437_v36, 0.0 }
 0xcd3   :  { %10428 = vmatmul.mubr.msk.f32.vlgmr.msra.gmra.mrb[54].mxu1 %vm4095_vm9, %v4440_v37 }
 0xcd4   :  { %10452 = vmatprep.mubr.msk.f32.mxu1 %vm11630_vm1, %v11629_v6  ;;  %11132 = vmatpush3.bf16.msra.mxu1 %v12384_v45 }
 0xcd5   :  { %11133 = vmatprep.subr.bf16.mxu1 %v11628_v3 }
 0xcd8   :  { %11135 = vmatpush3.bf16.msra.mxu1 %v12390_v49 }
 0xcd9   :  { %10450 = vmatprep.subr.mxu1 %v11629_v6 }
 0xcdc   :  { %10451 = vmatpush3.msra.mxu1 %v12395_v51 }
 0xcdd   :  { %11142 = vmatprep.subr.bf16.mxu1 %v11628_v3 }
 0xda6   :  { %v4523_v41 = vpop.f32.mrb[54].mxu1 }
 0xda7   :  { %v4524_v48 = vadd.f32 %v9377_v40, %v4523_v41  ;;  %v10429_v50 = vpop.f32.mrb[55].mxu1  ;;  %v9396_v40 = vld [vmem:[%s13176_s30 + $0x90] sm:$0xff] }
 0xda8   :  { %v12470_v41 = vpack.c.bf16 %v9396_v40, %v9395_v16  ;;  %v12481_v50 = vld [vmem:[%s13180_s11 + $0x2] ss:$0 sm:$0xff] }
 0xda9   :  { %10433 = vmatmul.mubr.msk.f32.vlgmr.msra.gmra.mrb[56].mxu0 %vm3919_vm7, %v4524_v48  ;;  %v12476_v48 = vld [vmem:[%s13176_s30 + $0x98] sm:$0xff] }
 0xdaa   :  { %11129 = vmatpush3.bf16.msk.msra.mxu0 %vm12367_vm12, %v12364_v42  ;;  %10439 = vmatprep.mubr.msk.f32.mxu0 %vm11630_vm1, %v11629_v6 }
 0xdab   :  { %11136 = vmatprep.subr.bf16.mxu0 %v11628_v3 }
 0xdad   :  { %10440 = vmatmul.mubr.msk.f32.vlgmr.msra.gmra.mrb[58].mxu0 %vm4696_vm13, %v12318_v62 }
 0xdae   :  { %10465 = vmatprep.mubr.msk.f32.mxu0 %vm11630_vm1, %v11629_v6  ;;  %11138 = vmatpush3.bf16.msra.mxu0 %v12418_v23 }
 0xdaf   :  { %11139 = vmatprep.subr.bf16.mxu0 %v11628_v3 }
 0xdb2   :  { %11141 = vmatpush3.bf16.msra.mxu0 %v12422_v14 }
 0xdb3   :  { %10463 = vmatprep.subr.mxu0 %v11629_v6 }
 0xdb6   :  { %10464 = vmatpush3.msra.mxu0 %v12428_v17 }
 0xdb7   :  { %11148 = vmatprep.subr.bf16.mxu0 %v11628_v3 }
 0xe7c   :  { %v4600_v58 = vpop.f32.mrb[56].mxu0 }
 0xe7d   :  { %v10434_v60 = vpop.f32.mrb[57].mxu0  ;;  %v4694_v61 = vrot.slane %v4600_v58, %v4693_v54  ;;  %v12401_v63 = vrot.slane %v4600_v58, %v5171_v55  ;;  %v12403_v0 = vrot.slane %v4600_v58, %v5645_v56  ;;  %v12405_v12 = vrot.slane %v4600_v58, %v6119_v57  ;;  %v4608_v54 = vld [vmem:[%s13181_s16 + $0x10] sm:$0xff]  ;;  %v4609_v56 = vld [vmem:[%s13181_s16 + $0x18] sm:$0xff]  ;;  %v12504_v58 = vld [vmem:[%s13181_s16 + $0x20] sm:$0xff] }
 0xe7e   :  { %v12494_v55 = vpack.c.bf16 %v4607_v53, %v4606_v52  ;;  %v12498_v57 = vpack.c.bf16 %v4609_v56, %v4608_v54  ;;  %v12509_v60 = vld [vmem:[%s13180_s11 + $0x3] ss:$0 sm:$0xff] }
 0xe7f   :  { %v4695_v15 = vmul.f32 %v4694_v61, %v12399_v59  ;;  %v5173_v33 = vmul.f32 %v12401_v63, %v12399_v59 }
 0xe80   :  { %v4769_v4 = vpop.f32.mrb[58].mxu0 }
 0xe81   :  { %v4770_v19 = vadd.f32 %v4769_v4, %v4695_v15  ;;  %v10441_v2 = vpop.f32.mrb[59].mxu0 }
 0xe82   :  { %v12527_v2 = vld [vmem:[%s13182_s15] ss:$0 sm:$0xff] }
 0xe83   :  { %v4773_v5 = vadd.f32 %v12409_v1, %v4770_v19 }
 0xe85   :  { %v4774_v8 = vmax.f32 %v4773_v5, 0.0 }
 0xe87   :  { %10453 = vmatmul.mubr.msk.f32.vlgmr.msra.gmra.mrb[56].mxu1 %vm4775_vm14, %v4774_v8 }
 0xe88   :  { %10478 = vmatprep.mubr.msk.f32.mxu1 %vm11630_vm1, %v11629_v6  ;;  %11144 = vmatpush3.bf16.msra.mxu1 %v12442_v30 }
 0xe89   :  { %11145 = vmatprep.subr.bf16.mxu1 %v11628_v3 }
 0xe8c   :  { %11147 = vmatpush3.bf16.msra.mxu1 %v12446_v32 }
 0xe8d   :  { %10476 = vmatprep.subr.mxu1 %v11629_v6 }
 0xe90   :  { %10477 = vmatpush3.msra.mxu1 %v12452_v34 }
 0xe91   :  { %11154 = vmatprep.subr.bf16.mxu1 %v11628_v3 }
 0xf5a   :  { %v4845_v21 = vpop.f32.mrb[56].mxu1 }
 0xf5b   :  { %v4846_v22 = vadd.f32 %v12433_v18, %v4845_v21  ;;  %v10454_v24 = vpop.f32.mrb[57].mxu1  ;;  %v5158_v21 = vstv %s4685_s22 }
 0xf5d   :  { %11526 = vtanh.f32 %v4846_v22 }
 0xf67   :  { %v11527_v25 = vpop.eup %11526 }
 0xf68   :  { %10466 = vmatmul.mubr.msk.f32.vlgmr.msra.gmra.mrb[60].mxu0 %vm4775_vm14, %v11527_v25  ;;  %v5159_v25 = vmul.f32 %v5158_v21, %v5157_v13 }
 0xf69   :  { %10491 = vmatprep.mubr.msk.f32.mxu0 %vm11630_vm1, %v11629_v6  ;;  %11150 = vmatpush3.bf16.msra.mxu0 %v12466_v39 }
 0xf6a   :  { %11151 = vmatprep.subr.bf16.mxu0 %v11628_v3 }
 0xf6d   :  { %11153 = vmatpush3.bf16.msra.mxu0 %v12470_v41 }
 0xf6e   :  { %10489 = vmatprep.subr.mxu0 %v11629_v6 }
 0xf71   :  { %10490 = vmatpush3.msra.mxu0 %v12476_v48 }
 0xf72   :  { %11160 = vmatprep.subr.bf16.mxu0 %v11628_v3 }
0x103b   :  { %v4919_v36 = vpop.f32.mrb[60].mxu0 }
0x103c   :  { %v4920_v27 = vadd.f32 %v12457_v35, %v4919_v36  ;;  %v10467_v37 = vpop.f32.mrb[61].mxu0 }
0x103e   :  { %11528 = vtanh.f32 %v4920_v27 }
0x1048   :  { %v11529_v38 = vpop.eup %11528 }
0x1049   :  { %10479 = vmatmul.mubr.msk.f32.vlgmr.msra.gmra.mrb[58].mxu1 %vm4775_vm14, %v11529_v38 }
0x104a   :  { %10504 = vmatprep.mubr.msk.f32.mxu1 %vm11630_vm1, %v11629_v6  ;;  %11156 = vmatpush3.bf16.msra.mxu1 %v12494_v55 }
0x104b   :  { %11157 = vmatprep.subr.bf16.mxu1 %v11628_v3 }
0x104e   :  { %11159 = vmatpush3.bf16.msra.mxu1 %v12498_v57 }
0x104f   :  { %10502 = vmatprep.subr.mxu1 %v11629_v6 }
0x1052   :  { %10503 = vmatpush3.msra.mxu1 %v12504_v58 }
0x1053   :  { %11170 = vmatprep.subr.bf16.mxu1 %v11628_v3 }
0x111c   :  { %v4993_v20 = vpop.f32.mrb[58].mxu1 }
0x111d   :  { %v4994_v44 = vadd.f32 %v12481_v50, %v4993_v20  ;;  %v10480_v46 = vpop.f32.mrb[59].mxu1 }
0x111f   :  { %11530 = vtanh.f32 %v4994_v44 }
0x1129   :  { %v11531_v47 = vpop.eup %11530 }
0x112a   :  { %10492 = vmatmul.mubr.msk.f32.vlgmr.msra.gmra.mrb[62].mxu0 %vm4775_vm14, %v11531_v47 }
0x112b   :  { %11163 = vmatpush3.bf16.msk.msra.mxu0 %vm12367_vm12, %v12364_v42  ;;  %10511 = vmatprep.mubr.msk.f32.mxu0 %vm11630_vm1, %v11629_v6 }
0x112c   :  { %11164 = vmatprep.subr.bf16.mxu0 %v11628_v3 }
0x11fd   :  { %v5067_v61 = vpop.f32.mrb[62].mxu0 }
0x11fe   :  { %v5068_v15 = vadd.f32 %v12509_v60, %v5067_v61  ;;  %v10493_v4 = vpop.f32.mrb[63].mxu0 }
0x1200   :  { %11532 = vtanh.f32 %v5068_v15 }
0x120a   :  { %v11533_v19 = vpop.eup %11532 }
0x120b   :  { %10505 = vmatmul.mubr.msk.f32.vlgmr.msra.gmra.mrb[60].mxu1 %vm4775_vm14, %v11533_v19 }
0x120c   :  { %11172 = vmatpush3.bf16.msra.mxu1 %v12418_v23  ;;  %10537 = vmatprep.mubr.msk.f32.mxu1 %vm11630_vm1, %v11629_v6 }
0x120d   :  { %11173 = vmatprep.subr.bf16.mxu1 %v11628_v3 }
0x1210   :  { %11175 = vmatpush3.bf16.msra.mxu1 %v12422_v14 }
0x1211   :  { %10535 = vmatprep.subr.mxu1 %v11629_v6 }
0x1214   :  { %10536 = vmatpush3.msra.mxu1 %v12428_v17 }
0x1215   :  { %11182 = vmatprep.subr.bf16.mxu1 %v11628_v3 }
0x12de   :  { %v5141_v5 = vpop.f32.mrb[60].mxu1 }
0x12df   :  { %v5142_v8 = vadd.f32 %v12527_v2, %v5141_v5  ;;  %v10506_v11 = vpop.f32.mrb[61].mxu1 }
0x12e1   :  { %v5146_v22 = vsub.f32 %v5142_v8, %v5145_v9 }
0x12e3   :  { %v5155_v24 = vmul.f32 %v5154_v10, %v5146_v22  ;;  %v5147_v26 = vsub.f32 %v5146_v22, %v5145_v9 }
0x12e5   :  { %v5156_v28 = vadd.f32 %v5155_v24, %v12318_v62  ;;  %v5148_v29 = vmul.f32 10.0, %v5147_v26  ;;  %v5627_v26 = vstv %s9415_s26 }
0x12e7   :  { %v12534_v31 = vadd.f32 %v5159_v25, %v5156_v28  ;;  %v5149_v36 = vmul.f32 %v5148_v29, %v5148_v29  ;;  %v9424_v28 = vld [vmem:[%s13183_s18 + $0x8] sm:$0x3f]  ;;  %v5632_v29 = vstv %s9416_s1 }
0x12e9   :  { %10512 = vmatmul.mubr.msk.f32.vlgmr.msra.gmra.mrb[64].mxu0 %vm4696_vm13, %v12534_v31  ;;  %v5150_v27 = vsel %vm4680_vm10, %v5149_v36, 0.0  ;;  %9413 = vst.msk [vmem:[%s11829_s20 + $0x8] sm:$0x3f] %vm4680_vm10, %v12534_v31  ;;  %v5618_v24 = vsub.f32 0.5, %v12534_v31 }
0x12ea   :  { %5151 = vadd.xlane.f32.xlu0 %v5150_v27  ;;  %11166 = vmatpush3.bf16.msra.mxu0 %v12384_v45 }
0x12eb   :  { %11167 = vmatprep.subr.bf16.mxu0 %v11628_v3  ;;  %10524 = vmatprep.mubr.msk.f32.mxu0 %vm11630_vm1, %v11629_v6 }
0x12ee   :  { %11169 = vmatpush3.bf16.msra.mxu0 %v12390_v49 }
0x12ef   :  { %10522 = vmatprep.subr.mxu0 %v11629_v6 }
0x12f2   :  { %10523 = vmatpush3.msra.mxu0 %v12395_v51 }
0x12f3   :  { %11176 = vmatprep.subr.bf16.mxu0 %v11628_v3 }
0x1377   :  { %v5152_v37 = vpop.xlane.xlu0 %5151 }
0x1378   :  { %v5153_v38 = vmul.f32 0.5, %v5152_v37  ;;  %v5633_v37 = vmul.f32 %v9424_v28, %v5632_v29 }
0x137a   :  { %v12550_v7 = vmul.f32 %v5154_v10, %v5153_v38 }
0x137c   :  { %9414 = vst.msk [vmem:[%s11834_s12 + $0x8] sm:$0x3f] %vm4682_vm15, %v12550_v7 }
0x13bc   :  { %v5243_v16 = vpop.f32.mrb[64].mxu0 }
0x13bd   :  { %v5244_v40 = vadd.f32 %v5243_v16, %v5173_v33  ;;  %v10513_v20 = vpop.f32.mrb[65].mxu0 }
0x13bf   :  { %v5247_v44 = vadd.f32 %v12409_v1, %v5244_v40 }
0x13c1   :  { %v5248_v46 = vmax.f32 %v5247_v44, 0.0 }
0x13c3   :  { %10525 = vmatmul.mubr.msk.f32.vlgmr.msra.gmra.mrb[66].mxu0 %vm4775_vm14, %v5248_v46 }
0x13c4   :  { %11178 = vmatpush3.bf16.msra.mxu0 %v12442_v30  ;;  %10550 = vmatprep.mubr.msk.f32.mxu0 %vm11630_vm1, %v11629_v6 }
0x13c5   :  { %11179 = vmatprep.subr.bf16.mxu0 %v11628_v3 }
0x13c8   :  { %11181 = vmatpush3.bf16.msra.mxu0 %v12446_v32 }
0x13c9   :  { %10548 = vmatprep.subr.mxu0 %v11629_v6 }
0x13cc   :  { %10549 = vmatpush3.msra.mxu0 %v12452_v34 }
0x13cd   :  { %11188 = vmatprep.subr.bf16.mxu0 %v11628_v3 }
0x1496   :  { %v5318_v63 = vpop.f32.mrb[66].mxu0 }
0x1497   :  { %v5319_v47 = vadd.f32 %v12433_v18, %v5318_v63  ;;  %v10526_v52 = vpop.f32.mrb[67].mxu0 }
0x1499   :  { %11534 = vtanh.f32 %v5319_v47 }
0x14a3   :  { %v11535_v53 = vpop.eup %11534 }
0x14a4   :  { %10538 = vmatmul.mubr.msk.f32.vlgmr.msra.gmra.mrb[62].mxu1 %vm4775_vm14, %v11535_v53  ;;  %v5647_v53 = vmul.f32 %v12403_v0, %v12399_v59 }
0x14a5   :  { %11184 = vmatpush3.bf16.msra.mxu1 %v12466_v39  ;;  %10563 = vmatprep.mubr.msk.f32.mxu1 %vm11630_vm1, %v11629_v6 }
0x14a6   :  { %11185 = vmatprep.subr.bf16.mxu1 %v11628_v3 }
0x14a9   :  { %11187 = vmatpush3.bf16.msra.mxu1 %v12470_v41 }
0x14aa   :  { %10561 = vmatprep.subr.mxu1 %v11629_v6 }
0x14ad   :  { %10562 = vmatpush3.msra.mxu1 %v12476_v48 }
0x14ae   :  { %11194 = vmatprep.subr.bf16.mxu1 %v11628_v3 }
0x1577   :  { %v5392_v54 = vpop.f32.mrb[62].mxu1 }
0x1578   :  { %v5393_v56 = vadd.f32 %v12457_v35, %v5392_v54  ;;  %v10539_v61 = vpop.f32.mrb[63].mxu1 }
0x157a   :  { %11536 = vtanh.f32 %v5393_v56 }
0x1584   :  { %v11537_v15 = vpop.eup %11536 }
0x1585   :  { %10551 = vmatmul.mubr.msk.f32.vlgmr.msra.gmra.mrb[68].mxu0 %vm4775_vm14, %v11537_v15 }
0x1586   :  { %11190 = vmatpush3.bf16.msra.mxu0 %v12494_v55  ;;  %10576 = vmatprep.mubr.msk.f32.mxu0 %vm11630_vm1, %v11629_v6 }
0x1587   :  { %11191 = vmatprep.subr.bf16.mxu0 %v11628_v3 }
0x158a   :  { %11193 = vmatpush3.bf16.msra.mxu0 %v12498_v57 }
0x158b   :  { %10574 = vmatprep.subr.mxu0 %v11629_v6 }
0x158e   :  { %10575 = vmatpush3.msra.mxu0 %v12504_v58 }
0x158f   :  { %11204 = vmatprep.subr.bf16.mxu0 %v11628_v3 }
0x1658   :  { %v5466_v4 = vpop.f32.mrb[68].mxu0 }
0x1659   :  { %v5467_v19 = vadd.f32 %v12481_v50, %v5466_v4  ;;  %v10552_v5 = vpop.f32.mrb[69].mxu0 }
0x165b   :  { %11538 = vtanh.f32 %v5467_v19 }
0x1665   :  { %v11539_v8 = vpop.eup %11538 }
0x1666   :  { %10564 = vmatmul.mubr.msk.f32.vlgmr.msra.gmra.mrb[64].mxu1 %vm4775_vm14, %v11539_v8 }
0x1667   :  { %11197 = vmatpush3.bf16.msk.msra.mxu1 %vm12367_vm12, %v12364_v42  ;;  %10583 = vmatprep.mubr.msk.f32.mxu1 %vm11630_vm1, %v11629_v6 }
0x1668   :  { %11198 = vmatprep.subr.bf16.mxu1 %v11628_v3 }
0x1739   :  { %v5540_v9 = vpop.f32.mrb[64].mxu1 }
0x173a   :  { %v5541_v11 = vadd.f32 %v12509_v60, %v5540_v9  ;;  %v10565_v10 = vpop.f32.mrb[65].mxu1 }
0x173c   :  { %11540 = vtanh.f32 %v5541_v11 }
0x1746   :  { %v11541_v13 = vpop.eup %11540 }
0x1747   :  { %10577 = vmatmul.mubr.msk.f32.vlgmr.msra.gmra.mrb[70].mxu0 %vm4775_vm14, %v11541_v13 }
0x1748   :  { %11206 = vmatpush3.bf16.msra.mxu0 %v12418_v23  ;;  %10609 = vmatprep.mubr.msk.f32.mxu0 %vm11630_vm1, %v11629_v6 }
0x1749   :  { %11207 = vmatprep.subr.bf16.mxu0 %v11628_v3 }
0x174c   :  { %11209 = vmatpush3.bf16.msra.mxu0 %v12422_v14 }
0x174d   :  { %10607 = vmatprep.subr.mxu0 %v11629_v6 }
0x1750   :  { %10608 = vmatpush3.msra.mxu0 %v12428_v17 }
0x1751   :  { %11216 = vmatprep.subr.bf16.mxu0 %v11628_v3 }
0x181a   :  { %v5614_v21 = vpop.f32.mrb[70].mxu0 }
0x181b   :  { %v5615_v22 = vadd.f32 %v12527_v2, %v5614_v21  ;;  %v10578_v25 = vpop.f32.mrb[71].mxu0 }
0x181d   :  { %v5619_v36 = vsub.f32 %v5615_v22, %v5618_v24 }
0x181f   :  { %v5628_v27 = vmul.f32 %v5627_v26, %v5619_v36  ;;  %v5620_v38 = vsub.f32 %v5619_v36, %v5618_v24 }
0x1821   :  { %v5629_v33 = vadd.f32 %v5628_v27, %v12534_v31  ;;  %v5621_v16 = vmul.f32 10.0, %v5620_v38  ;;  %v9436_v38 = vld [vmem:[%s13183_s18 + $0x10] sm:$0x3f] }
0x1823   :  { %v12609_v40 = vadd.f32 %v5633_v37, %v5629_v33  ;;  %v5622_v20 = vmul.f32 %v5621_v16, %v5621_v16  ;;  %v6101_v37 = vstv %s9427_s28  ;;  %v6106_v33 = vstv %s9428_s2 }
0x1825   :  { %9425 = vst.msk [vmem:[%s11829_s20 + $0x10] sm:$0x3f] %vm4680_vm10, %v12609_v40  ;;  %10584 = vmatmul.mubr.msk.f32.vlgmr.msra.gmra.mrb[66].mxu1 %vm4696_vm13, %v12609_v40  ;;  %v5623_v44 = vsel %vm4680_vm10, %v5622_v20, 0.0  ;;  %v6107_v20 = vmul.f32 %v9436_v38, %v6106_v33  ;;  %v9472_v38 = vld [vmem:[%s13184_s10 + $0xb8] sm:$0x3] }
0x1826   :  { %5624 = vadd.xlane.f32.xlu1 %v5623_v44  ;;  %11200 = vmatpush3.bf16.msra.mxu1 %v12384_v45 }
0x1827   :  { %11201 = vmatprep.subr.bf16.mxu1 %v11628_v3  ;;  %10596 = vmatprep.mubr.msk.f32.mxu1 %vm11630_vm1, %v11629_v6 }
0x182a   :  { %11203 = vmatpush3.bf16.msra.mxu1 %v12390_v49 }
0x182b   :  { %10594 = vmatprep.subr.mxu1 %v11629_v6 }
0x182e   :  { %10595 = vmatpush3.msra.mxu1 %v12395_v51 }
0x182f   :  { %11210 = vmatprep.subr.bf16.mxu1 %v11628_v3 }
0x18b3   :  { %v5625_v46 = vpop.xlane.xlu1 %5624 }
0x18b4   :  { %v5626_v63 = vmul.f32 0.5, %v5625_v46 }
0x18b6   :  { %v5635_v47 = vmul.f32 %v5627_v26, %v5626_v63 }
0x18b8   :  { %v12626_v52 = vadd.f32 %v5635_v47, %v12550_v7 }
0x18ba   :  { %9426 = vst.msk [vmem:[%s11834_s12 + $0x10] sm:$0x3f] %vm4682_vm15, %v12626_v52 }
0x18f8   :  { %v5717_v54 = vpop.f32.mrb[66].mxu1 }
0x18f9   :  { %v5718_v56 = vadd.f32 %v5717_v54, %v5647_v53  ;;  %v10585_v61 = vpop.f32.mrb[67].mxu1 }
0x18fb   :  { %v5721_v15 = vadd.f32 %v12409_v1, %v5718_v56 }
0x18fd   :  { %v5722_v4 = vmax.f32 %v5721_v15, 0.0 }
0x18ff   :  { %10597 = vmatmul.mubr.msk.f32.vlgmr.msra.gmra.mrb[68].mxu1 %vm4775_vm14, %v5722_v4 }
0x1900   :  { %11212 = vmatpush3.bf16.msra.mxu1 %v12442_v30  ;;  %10622 = vmatprep.mubr.msk.f32.mxu1 %vm11630_vm1, %v11629_v6 }
0x1901   :  { %11213 = vmatprep.subr.bf16.mxu1 %v11628_v3 }
0x1904   :  { %11215 = vmatpush3.bf16.msra.mxu1 %v12446_v32 }
0x1905   :  { %10620 = vmatprep.subr.mxu1 %v11629_v6 }
0x1908   :  { %10621 = vmatpush3.msra.mxu1 %v12452_v34 }
0x1909   :  { %11222 = vmatprep.subr.bf16.mxu1 %v11628_v3 }
0x19d2   :  { %v5792_v0 = vpop.f32.mrb[68].mxu1 }
0x19d3   :  { %v5793_v7 = vadd.f32 %v12433_v18, %v5792_v0  ;;  %v10598_v19 = vpop.f32.mrb[69].mxu1 }
0x19d5   :  { %11542 = vtanh.f32 %v5793_v7 }
0x19df   :  { %v11543_v5 = vpop.eup %11542 }
0x19e0   :  { %10610 = vmatmul.mubr.msk.f32.vlgmr.msra.gmra.mrb[72].mxu0 %vm4775_vm14, %v11543_v5  ;;  %v6589_v5 = vld [vmem:[%s13184_s10] sm:$0xff] }
0x19e1   :  { %11218 = vmatpush3.bf16.msra.mxu0 %v12466_v39  ;;  %10635 = vmatprep.mubr.msk.f32.mxu0 %vm11630_vm1, %v11629_v6 }
0x19e2   :  { %11219 = vmatprep.subr.bf16.mxu0 %v11628_v3 }
0x19e5   :  { %11221 = vmatpush3.bf16.msra.mxu0 %v12470_v41 }
0x19e6   :  { %10633 = vmatprep.subr.mxu0 %v11629_v6 }
0x19e9   :  { %10634 = vmatpush3.msra.mxu0 %v12476_v48 }
0x19ea   :  { %11228 = vmatprep.subr.bf16.mxu0 %v11628_v3 }
0x1ab3   :  { %v5866_v8 = vpop.f32.mrb[72].mxu0 }
0x1ab4   :  { %v5867_v9 = vadd.f32 %v12457_v35, %v5866_v8  ;;  %v10611_v11 = vpop.f32.mrb[73].mxu0 }
0x1ab5   :  { %v9456_v11 = vld [vmem:[%s13184_s10 + $0x38] sm:$0x3] }
0x1ab6   :  { %11544 = vtanh.f32 %v5867_v9  ;;  %v9455_v9 = vld [vmem:[%s13184_s10 + $0x30] sm:$0xff] }
0x1ac0   :  { %v11545_v10 = vpop.eup %11544 }
0x1ac1   :  { %10623 = vmatmul.mubr.msk.f32.vlgmr.msra.gmra.mrb[70].mxu1 %vm4775_vm14, %v11545_v10  ;;  %v12764_v10 = vpack.c.bf16 %v9456_v11, %v9455_v9  ;;  %v9470_v11 = vld [vmem:[%s13184_s10 + $0xa8] sm:$0x3] }
0x1ac2   :  { %11224 = vmatpush3.bf16.msra.mxu1 %v12494_v55  ;;  %10648 = vmatprep.mubr.msk.f32.mxu1 %vm11630_vm1, %v11629_v6 }
0x1ac3   :  { %11225 = vmatprep.subr.bf16.mxu1 %v11628_v3 }
0x1ac6   :  { %11227 = vmatpush3.bf16.msra.mxu1 %v12498_v57 }
0x1ac7   :  { %10646 = vmatprep.subr.mxu1 %v11629_v6 }
0x1aca   :  { %10647 = vmatpush3.msra.mxu1 %v12504_v58 }
0x1acb   :  { %11238 = vmatprep.subr.bf16.mxu1 %v11628_v3 }
0x1b94   :  { %v5940_v13 = vpop.f32.mrb[70].mxu1 }
0x1b95   :  { %v5941_v21 = vadd.f32 %v12481_v50, %v5940_v13  ;;  %v10624_v22 = vpop.f32.mrb[71].mxu1  ;;  %v9459_v13 = vld [vmem:[%s13184_s10 + $0x50] sm:$0xff] }
0x1b97   :  { %11546 = vtanh.f32 %v5941_v21  ;;  %v9460_v21 = vld [vmem:[%s13184_s10 + $0x58] sm:$0x3] }
0x1b98   :  { %v12776_v22 = vpack.c.bf16 %v9460_v21, %v9459_v13 }
0x1ba1   :  { %v11547_v24 = vpop.eup %11546 }
0x1ba2   :  { %10636 = vmatmul.mubr.msk.f32.vlgmr.msra.gmra.mrb[74].mxu0 %vm4775_vm14, %v11547_v24  ;;  %v6866_v24 = vrot.slane %v12318_v62, 3 }
0x1ba3   :  { %11231 = vmatpush3.bf16.msk.msra.mxu0 %vm12367_vm12, %v12364_v42  ;;  %10655 = vmatprep.mubr.msk.f32.mxu0 %vm11630_vm1, %v11629_v6 }
0x1ba4   :  { %11232 = vmatprep.subr.bf16.mxu0 %v11628_v3 }
0x1c75   :  { %v6014_v25 = vpop.f32.mrb[74].mxu0 }
0x1c76   :  { %v6015_v26 = vadd.f32 %v12509_v60, %v6014_v25  ;;  %v10637_v28 = vpop.f32.mrb[75].mxu0  ;;  %v9463_v25 = vld [vmem:[%s13184_s10 + $0x70] sm:$0xff] }
0x1c78   :  { %11548 = vtanh.f32 %v6015_v26  ;;  %v9464_v26 = vld [vmem:[%s13184_s10 + $0x78] sm:$0x3] }
0x1c79   :  { %v12788_v28 = vpack.c.bf16 %v9464_v26, %v9463_v25  ;;  %v7248_v25 = vrot.slane %v12534_v31, 2  ;;  %v9473_v26 = vld [vmem:[%s13184_s10 + $0xc0] sm:$0xff] }
0x1c82   :  { %v11549_v29 = vpop.eup %11548 }
0x1c83   :  { %10649 = vmatmul.mubr.msk.f32.vlgmr.msra.gmra.mrb[72].mxu1 %vm4775_vm14, %v11549_v29  ;;  %v7020_v29 = vrot.slane %v12318_v62, 5 }
0x1c84   :  { %11240 = vmatpush3.bf16.msra.mxu1 %v12418_v23  ;;  %10681 = vmatprep.mubr.msk.f32.mxu1 %vm11630_vm1, %v11629_v6  ;;  %v6092_v23 = vsub.f32 0.5, %v12609_v40 }
0x1c85   :  { %11241 = vmatprep.subr.bf16.mxu1 %v11628_v3 }
0x1c88   :  { %11243 = vmatpush3.bf16.msra.mxu1 %v12422_v14 }
0x1c89   :  { %10679 = vmatprep.subr.mxu1 %v11629_v6 }
0x1c8c   :  { %10680 = vmatpush3.msra.mxu1 %v12428_v17 }
0x1c8d   :  { %11250 = vmatprep.subr.bf16.mxu1 %v11628_v3 }
0x1d56   :  { %v6088_v42 = vpop.f32.mrb[72].mxu1 }
0x1d57   :  { %v6089_v36 = vadd.f32 %v12527_v2, %v6088_v42  ;;  %v10650_v27 = vpop.f32.mrb[73].mxu1  ;;  %v9467_v42 = vld [vmem:[%s13184_s10 + $0x90] sm:$0xff] }
0x1d58   :  { %v7171_v27 = vrot.slane %v12534_v31, 1 }
0x1d59   :  { %v6093_v16 = vsub.f32 %v6089_v36, %v6092_v23  ;;  %v9468_v36 = vld [vmem:[%s13184_s10 + $0x98] sm:$0x3] }
0x1d5b   :  { %v6102_v14 = vmul.f32 %v6101_v37, %v6093_v16  ;;  %v6094_v44 = vsub.f32 %v6093_v16, %v6092_v23  ;;  %v12800_v23 = vpack.c.bf16 %v9468_v36, %v9467_v42  ;;  %v7325_v16 = vrot.slane %v12534_v31, 3 }
0x1d5d   :  { %v6103_v17 = vadd.f32 %v6102_v14, %v12609_v40  ;;  %v6095_v46 = vmul.f32 10.0, %v6094_v44  ;;  %v9475_v14 = vld [vmem:[%s13184_s10 + $0xd0] sm:$0xff] }
0x1d5f   :  { %v12685_v63 = vadd.f32 %v6107_v20, %v6103_v17  ;;  %v6096_v47 = vmul.f32 %v6095_v46, %v6095_v46  ;;  %v9476_v20 = vld [vmem:[%s13184_s10 + $0xd8] sm:$0x3]  ;;  %v7479_v17 = vrot.slane %v12534_v31, 5  ;;  %v7630_v46 = vrot.slane %v12609_v40, 1 }
0x1d60   :  { %v12824_v44 = vpack.c.bf16 %v9476_v20, %v9475_v14 }
0x1d61   :  { %9437 = vst.msk [vmem:[%s11829_s20 + $0x18] sm:$0x3f] %vm4680_vm10, %v12685_v63  ;;  %10656 = vmatmul.mubr.msk.f32.vlgmr.msra.gmra.mrb[76].mxu0 %vm4696_vm13, %v12685_v63  ;;  %v6097_v53 = vsel %vm4680_vm10, %v6096_v47, 0.0 }
0x1d62   :  { %6098 = vadd.xlane.f32.xlu1 %v6097_v53  ;;  %11234 = vmatpush3.bf16.msra.mxu0 %v12384_v45  ;;  %v6121_v45 = vmul.f32 %v12405_v12, %v12399_v59 }
0x1d63   :  { %11235 = vmatprep.subr.bf16.mxu0 %v11628_v3  ;;  %10668 = vmatprep.mubr.msk.f32.mxu0 %vm11630_vm1, %v11629_v6 }
0x1d66   :  { %11237 = vmatpush3.bf16.msra.mxu0 %v12390_v49 }
0x1d67   :  { %10666 = vmatprep.subr.mxu0 %v11629_v6 }
0x1d6a   :  { %10667 = vmatpush3.msra.mxu0 %v12395_v51 }
0x1d6b   :  { %11244 = vmatprep.subr.bf16.mxu0 %v11628_v3 }
0x1def   :  { %v6099_v54 = vpop.xlane.xlu1 %6098 }
0x1df0   :  { %v6100_v56 = vmul.f32 0.5, %v6099_v54 }
0x1df2   :  { %v6109_v61 = vmul.f32 %v6101_v37, %v6100_v56  ;;  %v9471_v37 = vld [vmem:[%s13184_s10 + $0xb0] sm:$0xff] }
0x1df3   :  { %v12812_v33 = vpack.c.bf16 %v9472_v38, %v9471_v37  ;;  %v7402_v37 = vrot.slane %v12534_v31, 4  ;;  %v9477_v38 = vld [vmem:[%s13184_s10 + $0xe0] sm:$0xff] }
0x1df4   :  { %v12702_v15 = vadd.f32 %v6109_v61, %v12626_v52 }
0x1df6   :  { %9438 = vst.msk [vmem:[%s11834_s12 + $0x18] sm:$0x3f] %vm4682_vm15, %v12702_v15 }
0x1e34   :  { %v6191_v4 = vpop.f32.mrb[76].mxu0 }
0x1e35   :  { %v6192_v49 = vadd.f32 %v6191_v4, %v6121_v45  ;;  %v10657_v0 = vpop.f32.mrb[77].mxu0  ;;  %v9453_v4 = vld [vmem:[%s13184_s10 + $0x20] sm:$0xff] }
0x1e37   :  { %v6195_v7 = vadd.f32 %v12409_v1, %v6192_v49  ;;  %v9454_v49 = vld [vmem:[%s13184_s10 + $0x28] sm:$0x3] }
0x1e39   :  { %v6196_v51 = vmax.f32 %v6195_v7, 0.0 }
0x1e3b   :  { %10669 = vmatmul.mubr.msk.f32.vlgmr.msra.gmra.mrb[78].mxu0 %vm4775_vm14, %v6196_v51  ;;  %v12844_v51 = vpack.c.bf16 %v9454_v49, %v9453_v4  ;;  %v9448_v4 = vld [vmem:[%s13183_s18 + $0x18] sm:$0x3f]  ;;  %v6580_v49 = vstv %s9440_s5 }
0x1e3c   :  { %11246 = vmatpush3.bf16.msra.mxu0 %v12442_v30  ;;  %10694 = vmatprep.mubr.msk.f32.mxu0 %vm11630_vm1, %v11629_v6 }
0x1e3d   :  { %11247 = vmatprep.subr.bf16.mxu0 %v11628_v3 }
0x1e40   :  { %11249 = vmatpush3.bf16.msra.mxu0 %v12446_v32 }
0x1e41   :  { %10692 = vmatprep.subr.mxu0 %v11629_v6 }
0x1e44   :  { %10693 = vmatpush3.msra.mxu0 %v12452_v34 }
0x1e45   :  { %11256 = vmatprep.subr.bf16.mxu0 %v11628_v3 }
0x1f0e   :  { %v6266_v59 = vpop.f32.mrb[78].mxu0 }
0x1f0f   :  { %v6267_v12 = vadd.f32 %v12433_v18, %v6266_v59  ;;  %v10670_v1 = vpop.f32.mrb[79].mxu0 }
0x1f10   :  { %v9458_v1 = vld [vmem:[%s13184_s10 + $0x48] sm:$0x3] }
0x1f11   :  { %11550 = vtanh.f32 %v6267_v12  ;;  %v9457_v12 = vld [vmem:[%s13184_s10 + $0x40] sm:$0xff] }
0x1f1b   :  { %v11551_v52 = vpop.eup %11550 }
0x1f1c   :  { %10682 = vmatmul.mubr.msk.f32.vlgmr.msra.gmra.mrb[74].mxu1 %vm4775_vm14, %v11551_v52 }
0x1f1d   :  { %11252 = vmatpush3.bf16.msra.mxu1 %v12466_v39  ;;  %10707 = vmatprep.mubr.msk.f32.mxu1 %vm11630_vm1, %v11629_v6 }
0x1f1e   :  { %11253 = vmatprep.subr.bf16.mxu1 %v11628_v3 }
0x1f21   :  { %11255 = vmatpush3.bf16.msra.mxu1 %v12470_v41 }
0x1f22   :  { %10705 = vmatprep.subr.mxu1 %v11629_v6 }
0x1f25   :  { %10706 = vmatpush3.msra.mxu1 %v12476_v48  ;;  %v9451_v48 = vld [vmem:[%s13184_s10 + $0x10] sm:$0xff] }
0x1f26   :  { %11262 = vmatprep.subr.bf16.mxu1 %v11628_v3 }
0x1fef   :  { %v6340_v18 = vpop.f32.mrb[74].mxu1 }
0x1ff0   :  { %v6341_v30 = vadd.f32 %v12457_v35, %v6340_v18  ;;  %v10683_v32 = vpop.f32.mrb[75].mxu1  ;;  %v12856_v18 = vpack.c.bf16 %v9458_v1, %v9457_v12 }
0x1ff1   :  { %v6789_v32 = vrot.slane %v12318_v62, 2 }
0x1ff2   :  { %11552 = vtanh.f32 %v6341_v30 }
0x1ffc   :  { %v11553_v34 = vpop.eup %11552 }
0x1ffd   :  { %10695 = vmatmul.mubr.msk.f32.vlgmr.msra.gmra.mrb[80].mxu0 %vm4775_vm14, %v11553_v34  ;;  %v9461_v34 = vld [vmem:[%s13184_s10 + $0x60] sm:$0xff] }
0x1ffe   :  { %11258 = vmatpush3.bf16.msra.mxu0 %v12494_v55  ;;  %10720 = vmatprep.mubr.msk.f32.mxu0 %vm11630_vm1, %v11629_v6  ;;  %v9452_v55 = vld [vmem:[%s13184_s10 + $0x18] sm:$0x3] }
0x1fff   :  { %11259 = vmatprep.subr.bf16.mxu0 %v11628_v3  ;;  %v12742_v19 = vpack.c.bf16 %v9452_v55, %v9451_v48  ;;  %v6943_v55 = vrot.slane %v12318_v62, 4 }
0x2002   :  { %11261 = vmatpush3.bf16.msra.mxu0 %v12498_v57  ;;  %v6590_v57 = vld [vmem:[%s13184_s10 + $0x8] sm:$0x3] }
0x2003   :  { %10718 = vmatprep.subr.mxu0 %v11629_v6 }
0x2006   :  { %10719 = vmatpush3.msra.mxu0 %v12504_v58  ;;  %v6640_v58 = vrot.slane %v12318_v62, 1 }
0x2007   :  { %11270 = vmatprep.subr.bf16.mxu0 %v11628_v3 }
0x20d0   :  { %v6414_v35 = vpop.f32.mrb[80].mxu0 }
0x20d1   :  { %v6415_v39 = vadd.f32 %v12481_v50, %v6414_v35  ;;  %v10696_v41 = vpop.f32.mrb[81].mxu0  ;;  %v12752_v50 = vpack.c.bf16 %v6590_v57, %v6589_v5  ;;  %v9462_v35 = vld [vmem:[%s13184_s10 + $0x68] sm:$0x3]  ;;  %v9465_v5 = vld [vmem:[%s13184_s10 + $0x80] sm:$0xff] }
0x20d2   :  { %v12870_v41 = vpack.c.bf16 %v9462_v35, %v9461_v34  ;;  %v9466_v57 = vld [vmem:[%s13184_s10 + $0x88] sm:$0x3] }
0x20d3   :  { %11554 = vtanh.f32 %v6415_v39 }
0x20dd   :  { %v11555_v8 = vpop.eup %11554 }
0x20de   :  { %10708 = vmatmul.mubr.msk.f32.vlgmr.msra.gmra.mrb[76].mxu1 %vm4775_vm14, %v11555_v8 }
0x20df   :  { %11265 = vmatpush3.bf16.msk.msra.mxu1 %vm12367_vm12, %v12742_v19  ;;  %10727 = vmatprep.mubr.msk.f32.mxu1 %vm11630_vm1, %v11629_v6 }
0x20e0   :  { %11266 = vmatprep.subr.bf16.mxu1 %v11628_v3 }
0x20e2   :  { %10728 = vmatmul.mubr.msk.f32.vlgmr.msra.gmra.mrb[78].mxu1 %vm4696_vm13, %v6640_v58  ;;  %v12884_v58 = vpack.c.bf16 %v9466_v57, %v9465_v5 }
0x20e3   :  { %11269 = vmatpush3.bf16.msk.msra.mxu1 %vm12367_vm12, %v12752_v50  ;;  %10734 = vmatprep.mubr.msk.f32.mxu1 %vm11630_vm1, %v11629_v6 }
0x20e4   :  { %11274 = vmatprep.subr.bf16.mxu1 %v11628_v3 }
0x20e6   :  { %10735 = vmatmul.mubr.msk.f32.vlgmr.msra.gmra.mrb[80].mxu1 %vm4696_vm13, %v12318_v62  ;;  %v9469_v62 = vld [vmem:[%s13184_s10 + $0xa0] sm:$0xff] }
0x20e7   :  { %11277 = vmatpush3.bf16.msk.msra.mxu1 %vm12367_vm12, %v12764_v10  ;;  %10748 = vmatprep.mubr.msk.f32.mxu1 %vm11630_vm1, %v11629_v6  ;;  %v12898_v21 = vpack.c.bf16 %v9470_v11, %v9469_v62 }
0x20e8   :  { %11282 = vmatprep.subr.bf16.mxu1 %v11628_v3 }
0x20ea   :  { %10749 = vmatmul.mubr.msk.f32.vlgmr.msra.gmra.mrb[82].mxu1 %vm4696_vm13, %v6866_v24 }
0x20eb   :  { %11285 = vmatpush3.bf16.msk.msra.mxu1 %vm12367_vm12, %v12776_v22  ;;  %10762 = vmatprep.mubr.msk.f32.mxu1 %vm11630_vm1, %v11629_v6 }
0x20ec   :  { %11290 = vmatprep.subr.bf16.mxu1 %v11628_v3 }
0x20ee   :  { %10763 = vmatmul.mubr.msk.f32.vlgmr.msra.gmra.mrb[84].mxu1 %vm4696_vm13, %v7020_v29  ;;  %v9474_v29 = vld [vmem:[%s13184_s10 + $0xc8] sm:$0x3] }
0x20ef   :  { %11293 = vmatpush3.bf16.msk.msra.mxu1 %vm12367_vm12, %v12788_v28  ;;  %10776 = vmatprep.mubr.msk.f32.mxu1 %vm11630_vm1, %v11629_v6  ;;  %v12912_v36 = vpack.c.bf16 %v9474_v29, %v9473_v26 }
0x20f0   :  { %11298 = vmatprep.subr.bf16.mxu1 %v11628_v3 }
0x20f2   :  { %10777 = vmatmul.mubr.msk.f32.vlgmr.msra.gmra.mrb[86].mxu1 %vm4696_vm13, %v7171_v27 }
0x20f3   :  { %11301 = vmatpush3.bf16.msk.msra.mxu1 %vm12367_vm12, %v12800_v23  ;;  %10790 = vmatprep.mubr.msk.f32.mxu1 %vm11630_vm1, %v11629_v6 }
0x20f4   :  { %11306 = vmatprep.subr.bf16.mxu1 %v11628_v3 }
0x20f6   :  { %10791 = vmatmul.mubr.msk.f32.vlgmr.msra.gmra.mrb[88].mxu1 %vm4696_vm13, %v7325_v16  ;;  %v9478_v16 = vld [vmem:[%s13184_s10 + $0xe8] sm:$0x3] }
0x20f7   :  { %11309 = vmatpush3.bf16.msk.msra.mxu1 %vm12367_vm12, %v12812_v33  ;;  %10804 = vmatprep.mubr.msk.f32.mxu1 %vm11630_vm1, %v11629_v6  ;;  %v12926_v20 = vpack.c.bf16 %v9478_v16, %v9477_v38 }
0x20f8   :  { %11314 = vmatprep.subr.bf16.mxu1 %v11628_v3 }
0x20fa   :  { %10805 = vmatmul.mubr.msk.f32.vlgmr.msra.gmra.mrb[90].mxu1 %vm4696_vm13, %v7479_v17  ;;  %v6633_v17 = vld [vmem:[%s13185_s7] sm:$0xff] }
0x20fb   :  { %11317 = vmatpush3.bf16.msk.msra.mxu1 %vm12367_vm12, %v12824_v44  ;;  %10818 = vmatprep.mubr.msk.f32.mxu1 %vm11630_vm1, %v11629_v6 }
0x20fc   :  { %11322 = vmatprep.subr.bf16.mxu1 %v11628_v3 }
0x20fe   :  { %10819 = vmatmul.mubr.msk.f32.vlgmr.msra.gmra.mrb[92].mxu1 %vm4696_vm13, %v7630_v46  ;;  %v6634_v46 = vld [vmem:[%s13185_s7 + $0x8] sm:$0x3] }
0x20ff   :  { %10832 = vmatprep.mubr.msk.f32.mxu1 %vm11630_vm1, %v11629_v6 }
0x21b1   :  { %v6488_v47 = vpop.f32.mrb[76].mxu1 }
0x21b2   :  { %v6489_v53 = vadd.f32 %v12509_v60, %v6488_v47  ;;  %v10709_v54 = vpop.f32.mrb[77].mxu1  ;;  %v12943_v47 = vpack.c.bf16 %v6634_v46, %v6633_v17 }
0x21b4   :  { %11556 = vtanh.f32 %v6489_v53  ;;  %11325 = vmatpush3.bf16.msk.msra.mxu1 %vm12367_vm12, %v12943_v47 }
0x21b5   :  { %v6712_v56 = vpop.f32.mrb[78].mxu1  ;;  %11330 = vmatprep.subr.bf16.mxu1 %v11628_v3 }
0x21b6   :  { %v10729_v61 = vpop.f32.mrb[79].mxu1 }
0x21b9   :  { %v6785_v45 = vpop.f32.mrb[80].mxu1 }
0x21ba   :  { %v12842_v0 = vadd.f32 %v6785_v45, %v6712_v56  ;;  %v10736_v7 = vpop.f32.mrb[81].mxu1  ;;  %v6566_v56 = vsub.f32 0.5, %v12685_v63  ;;  %v6575_v45 = vstv %s12949_s0 }
0x21bd   :  { %v12846_v59 = vpop.f32.mrb[82].mxu1 }
0x21be   :  { %v11557_v52 = vpop.eup %11556  ;;  %v10750_v60 = vpop.f32.mrb[83].mxu1 }
0x21bf   :  { %10721 = vmatmul.mubr.msk.f32.vlgmr.msra.gmra.mrb[82].mxu0 %vm4775_vm14, %v11557_v52  ;;  %v6581_v52 = vmul.f32 %v9448_v4, %v6580_v49 }
0x21c0   :  { %11273 = vmatpush3.bf16.msk.msra.mxu0 %vm12367_vm12, %v12844_v51  ;;  %10741 = vmatprep.mubr.msk.f32.mxu0 %vm11630_vm1, %v11629_v6 }
0x21c1   :  { %v12858_v30 = vpop.f32.mrb[84].mxu1  ;;  %11278 = vmatprep.subr.bf16.mxu0 %v11628_v3 }
0x21c2   :  { %v10764_v39 = vpop.f32.mrb[85].mxu1 }
0x21c3   :  { %10742 = vmatmul.mubr.msk.f32.vlgmr.msra.gmra.mrb[84].mxu0 %vm4696_vm13, %v6789_v32 }
0x21c4   :  { %11281 = vmatpush3.bf16.msk.msra.mxu0 %vm12367_vm12, %v12856_v18  ;;  %10755 = vmatprep.mubr.msk.f32.mxu0 %vm11630_vm1, %v11629_v6 }
0x21c5   :  { %v12872_v48 = vpop.f32.mrb[86].mxu1  ;;  %11286 = vmatprep.subr.bf16.mxu0 %v11628_v3 }
0x21c6   :  { %v10778_v8 = vpop.f32.mrb[87].mxu1 }
0x21c7   :  { %10756 = vmatmul.mubr.msk.f32.vlgmr.msra.gmra.mrb[86].mxu0 %vm4696_vm13, %v6943_v55 }
0x21c8   :  { %11289 = vmatpush3.bf16.msk.msra.mxu0 %vm12367_vm12, %v12870_v41  ;;  %10769 = vmatprep.mubr.msk.f32.mxu0 %vm11630_vm1, %v11629_v6 }
0x21c9   :  { %v12886_v9 = vpop.f32.mrb[88].mxu1  ;;  %11294 = vmatprep.subr.bf16.mxu0 %v11628_v3 }
0x21ca   :  { %v10792_v13 = vpop.f32.mrb[89].mxu1 }
0x21cb   :  { %10770 = vmatmul.mubr.msk.f32.vlgmr.msra.gmra.mrb[88].mxu0 %vm4696_vm13, %v12534_v31  ;;  %v7707_v31 = vrot.slane %v12609_v40, 2 }
0x21cc   :  { %11297 = vmatpush3.bf16.msk.msra.mxu0 %vm12367_vm12, %v12884_v58  ;;  %10783 = vmatprep.mubr.msk.f32.mxu0 %vm11630_vm1, %v11629_v6 }
0x21cd   :  { %v12900_v24 = vpop.f32.mrb[90].mxu1  ;;  %11302 = vmatprep.subr.bf16.mxu0 %v11628_v3 }
0x21ce   :  { %v10806_v42 = vpop.f32.mrb[91].mxu1 }
0x21cf   :  { %10784 = vmatmul.mubr.msk.f32.vlgmr.msra.gmra.mrb[90].mxu0 %vm4696_vm13, %v7248_v25 }
0x21d0   :  { %11305 = vmatpush3.bf16.msk.msra.mxu0 %vm12367_vm12, %v12898_v21  ;;  %10797 = vmatprep.mubr.msk.f32.mxu0 %vm11630_vm1, %v11629_v6 }
0x21d1   :  { %v12914_v27 = vpop.f32.mrb[92].mxu1  ;;  %11310 = vmatprep.subr.bf16.mxu0 %v11628_v3 }
0x21d2   :  { %v10820_v14 = vpop.f32.mrb[93].mxu1 }
0x21d3   :  { %10798 = vmatmul.mubr.msk.f32.vlgmr.msra.gmra.mrb[92].mxu0 %vm4696_vm13, %v7402_v37 }
0x21d4   :  { %11313 = vmatpush3.bf16.msk.msra.mxu0 %vm12367_vm12, %v12912_v36  ;;  %10811 = vmatprep.mubr.msk.f32.mxu0 %vm11630_vm1, %v11629_v6 }
0x21d5   :  { %11318 = vmatprep.subr.bf16.mxu0 %v11628_v3 }
0x21d7   :  { %10812 = vmatmul.mubr.msk.f32.vlgmr.msra.gmra.mrb[94].mxu0 %vm4696_vm13, %v12609_v40 }
0x21d8   :  { %11321 = vmatpush3.bf16.msk.msra.mxu0 %vm12367_vm12, %v12926_v20  ;;  %10825 = vmatprep.mubr.msk.f32.mxu0 %vm11630_vm1, %v11629_v6 }
0x21d9   :  { %11326 = vmatprep.subr.bf16.mxu0 %v11628_v3 }
0x21db   :  { %10826 = vmatmul.mubr.msk.f32.vlgmr.msra.gmra.mrb[96].mxu0 %vm4696_vm13, %v7707_v31 }
0x21dc   :  { %10839 = vmatprep.mubr.msk.f32.mxu0 %vm11630_vm1, %v11629_v6 }
0x2292   :  { %v6562_v53 = vpop.f32.mrb[82].mxu0 }
0x2293   :  { %v6563_v54 = vadd.f32 %v12527_v2, %v6562_v53  ;;  %v10722_v61 = vpop.f32.mrb[83].mxu0 }
0x2295   :  { %v6567_v7 = vsub.f32 %v6563_v54, %v6566_v56 }
0x2296   :  { %v6861_v12 = vpop.f32.mrb[84].mxu0 }
0x2297   :  { %v6576_v1 = vmul.f32 %v6575_v45, %v6567_v7  ;;  %v6865_v60 = vadd.f32 %v6861_v12, %v12842_v0  ;;  %v10743_v32 = vpop.f32.mrb[85].mxu0  ;;  %v6568_v34 = vsub.f32 %v6567_v7, %v6566_v56  ;;  %v12972_v56 = vld [vmem:[%s13186_s9] sm:$0x1] }
0x2298   :  { %v13055_v32 = vld [vmem:[%s13188_s13] sm:$0x1] }
0x2299   :  { %v6577_v35 = vadd.f32 %v6576_v1, %v12685_v63  ;;  %v6942_v2 = vadd.f32 %v12846_v59, %v6865_v60  ;;  %v6569_v39 = vmul.f32 10.0, %v6568_v34 }
0x229a   :  { %v7015_v55 = vpop.f32.mrb[86].mxu0 }
0x229b   :  { %v12960_v5 = vadd.f32 %v6581_v52, %v6577_v35  ;;  %v7019_v57 = vadd.f32 %v7015_v55, %v6942_v2  ;;  %v10757_v8 = vpop.f32.mrb[87].mxu0  ;;  %v6570_v62 = vmul.f32 %v6569_v39, %v6569_v39 }
0x229d   :  { %9449 = vst.msk [vmem:[%s11829_s20 + $0x20] sm:$0x3f] %vm4680_vm10, %v12960_v5  ;;  %v6571_v11 = vsel %vm4680_vm10, %v6570_v62, 0.0  ;;  %v7096_v0 = vadd.f32 %v12858_v30, %v7019_v57  ;;  %s13187_s20 = sld [smem:[#allocation30_spill]]  ;;  %v8306_v62 = vrot.slane %v12685_v63, 2 }
0x229e   :  { %6572 = vadd.xlane.f32.xlu1 %v6571_v11  ;;  %v7166_v13 = vpop.f32.mrb[88].mxu0 }
0x229f   :  { %v7170_v25 = vadd.f32 %v7166_v13, %v7096_v0  ;;  %v10771_v26 = vpop.f32.mrb[89].mxu0 }
0x22a1   :  { %v7247_v59 = vadd.f32 %v12872_v48, %v7170_v25 }
0x22a2   :  { %v7320_v29 = vpop.f32.mrb[90].mxu0 }
0x22a3   :  { %v7324_v42 = vadd.f32 %v7320_v29, %v7247_v59  ;;  %v10785_v37 = vpop.f32.mrb[91].mxu0 }
0x22a5   :  { %v7401_v38 = vadd.f32 %v12886_v9, %v7324_v42  ;;  %v7941_v9 = vrot.slane %v12609_v40, 4  ;;  %v6639_v42 = vld [vmem:[%s11824_s4] sm:$0x1] }
0x22a6   :  { %v7474_v16 = vpop.f32.mrb[92].mxu0 }
0x22a7   :  { %v7478_v14 = vadd.f32 %v7474_v16, %v7401_v38  ;;  %v10799_v31 = vpop.f32.mrb[93].mxu0 }
0x22a9   :  { %v7555_v17 = vadd.f32 %v12900_v24, %v7478_v14  ;;  %v8087_v24 = vrot.slane %v12609_v40, 5 }
0x22aa   :  { %v7625_v46 = vpop.f32.mrb[94].mxu0 }
0x22ab   :  { %v7629_v53 = vadd.f32 %v7625_v46, %v7555_v17  ;;  %v10813_v30 = vpop.f32.mrb[95].mxu0 }
0x22ad   :  { %v7706_v54 = vadd.f32 %v12914_v27, %v7629_v53  ;;  %v6636_v27 = vld [vmem:[%s13187_s20 + $0x8] sm:$0x3] }
0x22ae   :  { %v7779_v61 = vpop.f32.mrb[96].mxu0 }
0x22af   :  { %v7783_v4 = vadd.f32 %v7779_v61, %v7706_v54  ;;  %v10827_v48 = vpop.f32.mrb[97].mxu0 }
0x22b1   :  { %v7784_v49 = vadd.f32 %v7783_v4, %v12972_v56 }
0x22b3   :  { %v7785_v7 = vmax.f32 %v7784_v49, 0.0 }
0x22b5   :  { %10833 = vmatmul.mubr.msk.f32.vlgmr.msra.gmra.mrb[94].mxu1 %vm4696_vm13, %v7785_v7 }
0x22b6   :  { %11333 = vmatpush3.bf16.msk.msra.mxu1 %vm12367_vm12, %v12742_v19  ;;  %10846 = vmatprep.mubr.msk.f32.mxu1 %vm11630_vm1, %v11629_v6  ;;  %v8232_v19 = vrot.slane %v12685_v63, 1 }
0x22b7   :  { %11338 = vmatprep.subr.bf16.mxu1 %v11628_v3 }
0x22b9   :  { %10847 = vmatmul.mubr.msk.f32.vlgmr.msra.gmra.mrb[96].mxu1 %vm4696_vm13, %v7941_v9 }
0x22ba   :  { %11341 = vmatpush3.bf16.msk.msra.mxu1 %vm12367_vm12, %v12844_v51  ;;  %10860 = vmatprep.mubr.msk.f32.mxu1 %vm11630_vm1, %v11629_v6  ;;  %v8380_v51 = vrot.slane %v12685_v63, 3 }
0x22bb   :  { %11346 = vmatprep.subr.bf16.mxu1 %v11628_v3 }
0x22bd   :  { %10861 = vmatmul.mubr.msk.f32.vlgmr.msra.gmra.mrb[98].mxu1 %vm4696_vm13, %v8087_v24 }
0x22be   :  { %11349 = vmatpush3.bf16.msk.msra.mxu1 %vm12367_vm12, %v12856_v18  ;;  %10874 = vmatprep.mubr.msk.f32.mxu1 %vm11630_vm1, %v11629_v6  ;;  %v8528_v18 = vrot.slane %v12685_v63, 5 }
0x22bf   :  { %11354 = vmatprep.subr.bf16.mxu1 %v11628_v3 }
0x22c1   :  { %10875 = vmatmul.mubr.msk.f32.vlgmr.msra.gmra.mrb[100].mxu1 %vm4696_vm13, %v8232_v19 }
0x22c2   :  { %11357 = vmatpush3.bf16.msk.msra.mxu1 %vm12367_vm12, %v12870_v41  ;;  %10888 = vmatprep.mubr.msk.f32.mxu1 %vm11630_vm1, %v11629_v6  ;;  %v8676_v41 = vrot.slane %v12960_v5, 1 }
0x22c3   :  { %11362 = vmatprep.subr.bf16.mxu1 %v11628_v3 }
0x22c5   :  { %10889 = vmatmul.mubr.msk.f32.vlgmr.msra.gmra.mrb[102].mxu1 %vm4696_vm13, %v8380_v51 }
0x22c6   :  { %11365 = vmatpush3.bf16.msk.msra.mxu1 %vm12367_vm12, %v12884_v58  ;;  %10902 = vmatprep.mubr.msk.f32.mxu1 %vm11630_vm1, %v11629_v6  ;;  %v8824_v58 = vrot.slane %v12960_v5, 3 }
0x22c7   :  { %11370 = vmatprep.subr.bf16.mxu1 %v11628_v3 }
0x22c9   :  { %10903 = vmatmul.mubr.msk.f32.vlgmr.msra.gmra.mrb[104].mxu1 %vm4696_vm13, %v8528_v18 }
0x22ca   :  { %11373 = vmatpush3.bf16.msk.msra.mxu1 %vm12367_vm12, %v12898_v21  ;;  %10916 = vmatprep.mubr.msk.f32.mxu1 %vm11630_vm1, %v11629_v6  ;;  %v8972_v21 = vrot.slane %v12960_v5, 5 }
0x22cb   :  { %11378 = vmatprep.subr.bf16.mxu1 %v11628_v3 }
0x22cd   :  { %10917 = vmatmul.mubr.msk.f32.vlgmr.msra.gmra.mrb[106].mxu1 %vm4696_vm13, %v8676_v41 }
0x22ce   :  { %11381 = vmatpush3.bf16.msk.msra.mxu1 %vm12367_vm12, %v12912_v36  ;;  %10930 = vmatprep.mubr.msk.f32.mxu1 %vm11630_vm1, %v11629_v6  ;;  %v6635_v36 = vld [vmem:[%s13187_s20] sm:$0xff] }
0x22cf   :  { %11386 = vmatprep.subr.bf16.mxu1 %v11628_v3  ;;  %v11327_v12 = vpack.c.bf16 %v6636_v27, %v6635_v36 }
0x22d1   :  { %10931 = vmatmul.mubr.msk.f32.vlgmr.msra.gmra.mrb[108].mxu1 %vm4696_vm13, %v8824_v58  ;;  %11329 = vmatpush3.bf16.msk.msra.mxu0 %vm12367_vm12, %v11327_v12 }
0x22d2   :  { %11389 = vmatpush3.bf16.msk.msra.mxu1 %vm12367_vm12, %v12926_v20  ;;  %10944 = vmatprep.mubr.msk.f32.mxu1 %vm11630_vm1, %v11629_v6 }
0x22d3   :  { %11394 = vmatprep.subr.bf16.mxu1 %v11628_v3  ;;  %11334 = vmatprep.subr.bf16.mxu0 %v11628_v3 }
0x22d5   :  { %10945 = vmatmul.mubr.msk.f32.vlgmr.msra.gmra.mrb[110].mxu1 %vm4696_vm13, %v8972_v21 }
0x22d6   :  { %10958 = vmatprep.mubr.msk.f32.mxu1 %vm11630_vm1, %v11629_v6  ;;  %11397 = vmatpush3.bf16.msk.msra.mxu1 %vm12367_vm12, %v11327_v12 }
0x232b   :  { %v6573_v20 = vpop.xlane.xlu1 %6572 }
0x232c   :  { %v6574_v1 = vmul.f32 0.5, %v6573_v20 }
0x232e   :  { %v6583_v52 = vmul.f32 %v6575_v45, %v6574_v1 }
0x2330   :  { %v6584_v60 = vadd.f32 %v6583_v52, %v12702_v15  ;;  %v8014_v15 = vrot.slane %v12609_v40, 3 }
0x2332   :  { %9450 = vst.msk [vmem:[%s11834_s12 + $0x20] sm:$0x3f] %vm4682_vm15, %v6584_v60 }
0x2388   :  { %v7858_v34 = vpop.f32.mrb[94].mxu1 }
0x2389   :  { %v7859_v35 = vadd.f32 %v7858_v34, %v13055_v32  ;;  %v10834_v2 = vpop.f32.mrb[95].mxu1 }
0x238b   :  { %v7862_v39 = vmax.f32 %v7859_v35, 0.0 }
0x238c   :  { %v8010_v55 = vpop.f32.mrb[96].mxu1 }
0x238d   :  { %10840 = vmatmul.mubr.msk.f32.vlgmr.msra.gmra.mrb[98].mxu0 %vm4696_vm13, %v7862_v39  ;;  %v10848_v57 = vpop.f32.mrb[97].mxu1 }
0x238e   :  { %11337 = vmatpush3.bf16.msk.msra.mxu0 %vm12367_vm12, %v12752_v50  ;;  %10853 = vmatprep.mubr.msk.f32.mxu0 %vm11630_vm1, %v11629_v6 }
0x238f   :  { %11342 = vmatprep.subr.bf16.mxu0 %v11628_v3 }
0x2390   :  { %v8156_v45 = vpop.f32.mrb[98].mxu1 }
0x2391   :  { %10854 = vmatmul.mubr.msk.f32.vlgmr.msra.gmra.mrb[100].mxu0 %vm4696_vm13, %v8014_v15  ;;  %v10862_v8 = vpop.f32.mrb[99].mxu1 }
0x2392   :  { %11345 = vmatpush3.bf16.msk.msra.mxu0 %vm12367_vm12, %v12764_v10  ;;  %10867 = vmatprep.mubr.msk.f32.mxu0 %vm11630_vm1, %v11629_v6 }
0x2393   :  { %11350 = vmatprep.subr.bf16.mxu0 %v11628_v3 }
0x2394   :  { %v8301_v50 = vpop.f32.mrb[100].mxu1 }
0x2395   :  { %10868 = vmatmul.mubr.msk.f32.vlgmr.msra.gmra.mrb[102].mxu0 %vm4696_vm13, %v12685_v63  ;;  %v10876_v40 = vpop.f32.mrb[101].mxu1 }
0x2396   :  { %11353 = vmatpush3.bf16.msk.msra.mxu0 %vm12367_vm12, %v12776_v22  ;;  %10881 = vmatprep.mubr.msk.f32.mxu0 %vm11630_vm1, %v11629_v6  ;;  %v8454_v22 = vrot.slane %v12685_v63, 4 }
0x2397   :  { %11358 = vmatprep.subr.bf16.mxu0 %v11628_v3 }
0x2398   :  { %v8449_v10 = vpop.f32.mrb[102].mxu1 }
0x2399   :  { %10882 = vmatmul.mubr.msk.f32.vlgmr.msra.gmra.mrb[104].mxu0 %vm4696_vm13, %v8306_v62  ;;  %v10890_v11 = vpop.f32.mrb[103].mxu1 }
0x239a   :  { %11361 = vmatpush3.bf16.msk.msra.mxu0 %vm12367_vm12, %v12788_v28  ;;  %10895 = vmatprep.mubr.msk.f32.mxu0 %vm11630_vm1, %v11629_v6 }
0x239b   :  { %11366 = vmatprep.subr.bf16.mxu0 %v11628_v3 }
0x239c   :  { %v8597_v0 = vpop.f32.mrb[104].mxu1 }
0x239d   :  { %10896 = vmatmul.mubr.msk.f32.vlgmr.msra.gmra.mrb[106].mxu0 %vm4696_vm13, %v8454_v22  ;;  %v10904_v13 = vpop.f32.mrb[105].mxu1 }
0x239e   :  { %11369 = vmatpush3.bf16.msk.msra.mxu0 %vm12367_vm12, %v12800_v23  ;;  %10909 = vmatprep.mubr.msk.f32.mxu0 %vm11630_vm1, %v11629_v6  ;;  %v8750_v23 = vrot.slane %v12960_v5, 2 }
0x239f   :  { %11374 = vmatprep.subr.bf16.mxu0 %v11628_v3 }
0x23a0   :  { %v8745_v28 = vpop.f32.mrb[106].mxu1 }
0x23a1   :  { %10910 = vmatmul.mubr.msk.f32.vlgmr.msra.gmra.mrb[108].mxu0 %vm4696_vm13, %v12960_v5  ;;  %v10918_v63 = vpop.f32.mrb[107].mxu1 }
0x23a2   :  { %11377 = vmatpush3.bf16.msk.msra.mxu0 %vm12367_vm12, %v12812_v33  ;;  %10923 = vmatprep.mubr.msk.f32.mxu0 %vm11630_vm1, %v11629_v6  ;;  %v8898_v33 = vrot.slane %v12960_v5, 4 }
0x23a3   :  { %11382 = vmatprep.subr.bf16.mxu0 %v11628_v3 }
0x23a4   :  { %v8893_v25 = vpop.f32.mrb[108].mxu1 }
0x23a5   :  { %10924 = vmatmul.mubr.msk.f32.vlgmr.msra.gmra.mrb[110].mxu0 %vm4696_vm13, %v8750_v23  ;;  %v10932_v26 = vpop.f32.mrb[109].mxu1 }
0x23a6   :  { %11385 = vmatpush3.bf16.msk.msra.mxu0 %vm12367_vm12, %v12824_v44  ;;  %10937 = vmatprep.mubr.msk.f32.mxu0 %vm11630_vm1, %v11629_v6 }
0x23a7   :  { %11390 = vmatprep.subr.bf16.mxu0 %v11628_v3 }
0x23a8   :  { %v9041_v59 = vpop.f32.mrb[110].mxu1 }
0x23a9   :  { %10938 = vmatmul.mubr.msk.f32.vlgmr.msra.gmra.mrb[112].mxu0 %vm4696_vm13, %v8898_v33  ;;  %v10946_v29 = vpop.f32.mrb[111].mxu1 }
0x23aa   :  { %11393 = vmatpush3.bf16.msk.msra.mxu0 %vm12367_vm12, %v12943_v47  ;;  %10951 = vmatprep.mubr.msk.f32.mxu0 %vm11630_vm1, %v11629_v6 }
0x2460   :  { %v7935_v44 = vpop.f32.mrb[98].mxu0 }
0x2461   :  { %v7936_v37 = vadd.f32 %v7935_v44, %v6639_v42  ;;  %v10841_v38 = vpop.f32.mrb[99].mxu0 }
0x2463   :  { %7940 = vst.msk [vmem:[%s11839_s27] sm:$0x1] %vm7939_vm0, %v7936_v37 }
0x2464   :  { %v8083_v5 = vpop.f32.mrb[100].mxu0 }
0x2465   :  { %v8084_v3 = vadd.f32 %v8083_v5, %v8010_v55  ;;  %v10855_v16 = vpop.f32.mrb[101].mxu0 }
0x2467   :  { %v8160_v14 = vadd.f32 %v8156_v45, %v8084_v3 }
0x2468   :  { %v8227_v31 = vpop.f32.mrb[102].mxu0 }
0x2469   :  { %v8231_v17 = vadd.f32 %v8227_v31, %v8160_v14  ;;  %v10869_v46 = vpop.f32.mrb[103].mxu0 }
0x246b   :  { %v8305_v53 = vadd.f32 %v8301_v50, %v8231_v17 }
0x246c   :  { %v8375_v43 = vpop.f32.mrb[104].mxu0 }
0x246d   :  { %v8379_v47 = vadd.f32 %v8375_v43, %v8305_v53  ;;  %v10883_v30 = vpop.f32.mrb[105].mxu0 }
0x246f   :  { %v8453_v54 = vadd.f32 %v8449_v10, %v8379_v47 }
0x2470   :  { %v8523_v6 = vpop.f32.mrb[106].mxu0 }
0x2471   :  { %v8527_v61 = vadd.f32 %v8523_v6, %v8453_v54  ;;  %v10897_v4 = vpop.f32.mrb[107].mxu0 }
0x2473   :  { %v8601_v48 = vadd.f32 %v8597_v0, %v8527_v61 }
0x2474   :  { %v8671_v49 = vpop.f32.mrb[108].mxu0 }
0x2475   :  { %v8675_v7 = vadd.f32 %v8671_v49, %v8601_v48  ;;  %v10911_v9 = vpop.f32.mrb[109].mxu0 }
0x2477   :  { %v8749_v24 = vadd.f32 %v8745_v28, %v8675_v7 }
0x2478   :  { %v8819_v19 = vpop.f32.mrb[110].mxu0 }
0x2479   :  { %v8823_v51 = vadd.f32 %v8819_v19, %v8749_v24  ;;  %v10925_v18 = vpop.f32.mrb[111].mxu0 }
0x247b   :  { %v8897_v41 = vadd.f32 %v8893_v25, %v8823_v51 }
0x247c   :  { %v8967_v58 = vpop.f32.mrb[112].mxu0 }
0x247d   :  { %v8971_v21 = vadd.f32 %v8967_v58, %v8897_v41  ;;  %v10939_v36 = vpop.f32.mrb[113].mxu0 }
0x247f   :  { %v9045_v27 = vadd.f32 %v9041_v59, %v8971_v21 }
0x2481   :  { %v9046_v12 = vadd.f32 %v9045_v27, %v12972_v56 }
0x2483   :  { %v9047_v20 = vmax.f32 %v9046_v12, 0.0 }
0x2485   :  { %10952 = vmatmul.mubr.msk.f32.vlgmr.msra.gmra.mrb[114].mxu0 %vm4696_vm13, %v9047_v20 }
0x2558   :  { %v9117_v1 = vpop.f32.mrb[114].mxu0 }
0x2559   :  { %v9118_v52 = vadd.f32 %v9117_v1, %v13055_v32  ;;  %v10953_v60 = vpop.f32.mrb[115].mxu0 }
0x255b   :  { %v9121_v34 = vmax.f32 %v9118_v52, 0.0 }
0x255d   :  { %10959 = vmatmul.mubr.msk.f32.vlgmr.msra.gmra.mrb[112].mxu1 %vm4696_vm13, %v9121_v34 }
0x2630   :  { %v9191_v35 = vpop.f32.mrb[112].mxu1 }
0x2631   :  { %v9192_v2 = vadd.f32 %v9191_v35, %v6639_v42  ;;  %v10960_v39 = vpop.f32.mrb[113].mxu1 }
0x2633   :  { %9195 = vst.msk [vmem:[%s11839_s27 + $0x1] sm:$0x1] %vm7939_vm0, %v9192_v2 }
0x2634   :  { %9208 = vsyncpa [#allocation3], 1 }
0x2635   :  { %9209 = vsyncpa [#allocation5], 1 }

</bundles_post_ra>
